<compile_context>
chip_gen: v7x
topology: tpu7x:2x2x1
jax: 0.10.0
libtpu: 0.0.40
codegen_flags: <defaults>
</compile_context>

<pallas_src>
import math
import functools

import numpy as np
import jax
import jax.numpy as jnp
from jax import lax
from jax.experimental import pallas as pl
from jax.experimental.pallas import tpu as pltpu

# ----------------------------- model hyper-params -----------------------------
WORD_DIM = 16            # vocabulary size (columns of E_bu)
HIDDEN   = 64            # hidden_dim (default of the module)
NCLASS   = 4
DEGREE   = 2             # max children per parent (kernel specialised for 2)
NHEAD    = 8             # multi_head
DK       = HIDDEN // NHEAD
DFF      = 2 * HIDDEN    # PositionwiseFeedForward inner dim
NLAYERS  = 2             # Encoder / Decoder depth
LN_EPS   = 1e-6
HP       = 128           # lane-tile-aligned segment width inside fused projections
NEG_INF  = -1e9

assert DEGREE == 2, "kernel attention path is specialised for degree-2 trees"

# unfused packed-parameter bookkeeping (used by the reference + wrapper packing)
N_ATTN = NLAYERS * 4 + NLAYERS * 8     # 8 encoder linears + 16 decoder linears = 24
N_FFN  = NLAYERS * 2                   # 2 encoder FFNs + 2 decoder FFNs
N_LN   = NLAYERS * 2 + 1 + NLAYERS * 3 + 1   # 5 encoder LNs + 7 decoder LNs = 12


def _attn_idx_enc(l):        return 4 * l
def _attn_idx_dec_self(l):   return 4 * NLAYERS + 8 * l
def _attn_idx_dec_src(l):    return 4 * NLAYERS + 8 * l + 4
def _ffn_idx_enc(l):         return l
def _ffn_idx_dec(l):         return NLAYERS + l
def _ln_idx_enc(l, s):       return 2 * l + s
LN_ENC_FINAL = 2 * NLAYERS
def _ln_idx_dec(l, s):       return 2 * NLAYERS + 1 + 3 * l + s
LN_DEC_FINAL = 2 * NLAYERS + 1 + 3 * NLAYERS


# ================================ Pallas kernel ================================
def _bu_transformer_kernel(
    sched_ref,                                   # scalar-prefetch: flat 1-D int32 in SMEM
    leaf_h_ref, xe_ref, m0_ref, m1_ref, hsum_ref,
    w_eqkv_ref, b_eqkv_ref, w_eo_ref, b_eo_ref,  # encoder attention (LN folded, lane-padded)
    w_dself_ref, b_dself_ref,                    # decoder seq-1 self-attn collapsed linear
    w_dq_ref, b_dq_ref,                          # decoder cross Q (LN folded)
    w_dkv_ref, b_dkv_ref,                        # decoder cross K|V (enc-final LN folded)
    w_dco_ref, b_dco_ref,                        # decoder cross out
    w1_ref, b1_ref, w2_ref, b2_ref,              # FFN (LN folded into W1)
    lnf_g_ref, lnf_b_ref,                        # decoder-final LN affine
    wout_ref, bout_ref,                          # classification head
    out_ref,                                     # (1, NCLASS)
    node_h_ref, xin_ref,                         # VMEM scratches
    *, num_leaves, nl_pad, maxw, num_levels, root_row):

    W = maxw

    # ---- seed the node table with the leaf embeddings (once) ----
    node_h_ref[0:num_leaves, :] = leaf_h_ref[...]

    hsum = hsum_ref[...]                         # (H, H) block-diag head-sum, 1/sqrt(dk) baked in

    def ln_norm(x):                              # affine folded into the next matmul
        mu = jnp.mean(x, axis=-1, keepdims=True)
        d = x - mu
        var = jnp.sum(d * d, axis=-1, keepdims=True) * (1.0 / (HIDDEN - 1))
        return d * pl.reciprocal(jnp.sqrt(var) + LN_EPS, approx=True)

    def ffw(xn, i):                              # W2(relu(W1' xn)) ; W1' has LN affine folded
        h = (jnp.dot(xn, w1_ref[i], preferred_element_type=jnp.float32)
             + b1_ref[pl.ds(i, 1), :])
        h = jnp.maximum(h, 0.0)
        return (jnp.dot(h, w2_ref[i], preferred_element_type=jnp.float32)
                + b2_ref[pl.ds(i, 1), :])

    def mix2(s0, s1, v0, v1):                    # 2-key softmax + weighted value sum
        m = jnp.maximum(s0, s1)
        e0 = jnp.exp(s0 - m)
        e1 = jnp.exp(s1 - m)
        inv = pl.reciprocal(e0 + e1, approx=True)
        return (e0 * inv) * v0 + (e1 * inv) * v1

    # --------------------- wavefront recurrence over levels ---------------------
    @pl.loop(0, num_levels)
    def _(lev):
        poff = pl.multiple_of(lev * W, 8)        # parent-slot offset inside level tables
        soff = lev * (2 * W)                     # offset inside the flat child schedule

        # gather child rows for the whole level into the persistent scratch:
        # rows [0:W) = child0 of each slot, rows [W:2W) = child1 of each slot
        for j in range(W):
            c0 = sched_ref[soff + j]
            c1 = sched_ref[soff + W + j]
            xin_ref[pl.ds(j, 1), :] = node_h_ref[pl.ds(c0, 1), :]
            xin_ref[pl.ds(W + j, 1), :] = node_h_ref[pl.ds(c1, 1), :]

        x = xin_ref[...]                                        # (2W, H)
        m0 = m0_ref[pl.ds(poff, W), :]                          # additive key masks (W, H)
        m1 = m1_ref[pl.ds(poff, W), :]

        # -------------------- Encoder over the children --------------------
        for l in range(NLAYERS):
            xn = ln_norm(x)
            qkv = (jnp.dot(xn, w_eqkv_ref[l], preferred_element_type=jnp.float32)
                   + b_eqkv_ref[pl.ds(l, 1), :])                # (2W, 3*HP), tile-aligned slices
            q = qkv[:, 0:HIDDEN]
            k = qkv[:, HP:HP + HIDDEN]
            v = qkv[:, 2 * HP:2 * HP + HIDDEN]
            q0, q1 = q[0:W, :], q[W:2 * W, :]
            k0, k1 = k[0:W, :], k[W:2 * W, :]
            v0, v1 = v[0:W, :], v[W:2 * W, :]
            # one MXU pass for all per-head scores (4 query/key pairings stacked on sublanes)
            prod = jnp.concatenate([q0 * k0, q0 * k1, q1 * k0, q1 * k1], axis=0)
            s = jnp.dot(prod, hsum, preferred_element_type=jnp.float32)
            ctx0 = mix2(s[0:W, :] + m0, s[W:2 * W, :] + m1, v0, v1)
            ctx1 = mix2(s[2 * W:3 * W, :] + m0, s[3 * W:4 * W, :] + m1, v0, v1)
            ctx = jnp.concatenate([ctx0, ctx1], axis=0)
            x = x + (jnp.dot(ctx, w_eo_ref[l], preferred_element_type=jnp.float32)
                     + b_eo_ref[pl.ds(l, 1), :])
            x = x + ffw(ln_norm(x), _ffn_idx_enc(l))
        mem_n = ln_norm(x)                       # enc-final LN affine folded into w_dkv

        # -------- Decoder: parents of the level cross-attend to the memory --------
        y = xe_ref[pl.ds(poff, W), :]                           # (W, H)
        for l in range(NLAYERS):
            # seq-1 self-attention collapsed to a fused linear (LN affine folded)
            yn = ln_norm(y)
            y = y + (jnp.dot(yn, w_dself_ref[l], preferred_element_type=jnp.float32)
                     + b_dself_ref[pl.ds(l, 1), :])
            # cross-attention over the (masked) 2-row-per-parent memory
            yn = ln_norm(y)
            q = (jnp.dot(yn, w_dq_ref[l], preferred_element_type=jnp.float32)
                 + b_dq_ref[pl.ds(l, 1), :])
            kv = (jnp.dot(mem_n, w_dkv_ref[l], preferred_element_type=jnp.float32)
                  + b_dkv_ref[pl.ds(l, 1), :])                  # (2W, 2*HP), tile-aligned
            k = kv[:, 0:HIDDEN]
            v = kv[:, HP:HP + HIDDEN]
            k0, k1 = k[0:W, :], k[W:2 * W, :]
            v0, v1 = v[0:W, :], v[W:2 * W, :]
            prod = jnp.concatenate([q * k0, q * k1], axis=0)
            s = jnp.dot(prod, hsum, preferred_element_type=jnp.float32)
            ctx = mix2(s[0:W, :] + m0, s[W:2 * W, :] + m1, v0, v1)
            y = y + (jnp.dot(ctx, w_dco_ref[l], preferred_element_type=jnp.float32)
                     + b_dco_ref[pl.ds(l, 1), :])
            y = y + ffw(ln_norm(y), _ffn_idx_dec(l))
        parent_h = lnf_g_ref[...] * ln_norm(y) + lnf_b_ref[...]  # (W, H)

        # one contiguous store of the whole level's parents
        noff = pl.multiple_of(nl_pad + lev * W, 8)
        node_h_ref[pl.ds(noff, W), :] = parent_h

    # ---- classification head: exactly once, on the root (last parent) ----
    root_h = node_h_ref[pl.ds(root_row, 1), :]
    logits = (jnp.dot(root_h, wout_ref[...], preferred_element_type=jnp.float32)
              + bout_ref[...])
    mx = jnp.max(logits, axis=-1, keepdims=True)
    e = jnp.exp(logits - mx)
    out_ref[...] = e / jnp.sum(e, axis=-1, keepdims=True)       # exact once, sum(p)==1


# ============================ parameter packing ============================
def _pack_params(params):
    """Fuse attention linears, fold pre-norm LN affines, lane-pad fused projections."""
    Wa, ba = params['W_attn_t'], params['b_attn']
    lg, lb = params['ln_g'], params['ln_b']
    W1, b1 = params['W1_t'], params['b1']

    def fw(g, M):       return g[:, None] * M            # diag(g) @ M
    def fb(bl, M, b):   return bl @ M + b

    w_eqkv = jnp.zeros((NLAYERS, HIDDEN, 3 * HP), jnp.float32)
    b_eqkv = jnp.zeros((NLAYERS, 3 * HP), jnp.float32)
    w_dkv  = jnp.zeros((NLAYERS, HIDDEN, 2 * HP), jnp.float32)
    b_dkv  = jnp.zeros((NLAYERS, 2 * HP), jnp.float32)
    w_eo, b_eo, w_dself, b_dself = [], [], [], []
    w_dq, b_dq, w_dco, b_dco = [], [], [], []
    w1p, b1p = [], []

    ge, be = lg[LN_ENC_FINAL], lb[LN_ENC_FINAL]
    for l in range(NLAYERS):
        # encoder self-attention: pre-norm LN folded into fused, lane-padded QKV
        i = _attn_idx_enc(l)
        g, bl = lg[_ln_idx_enc(l, 0)], lb[_ln_idx_enc(l, 0)]
        for s, off in ((0, 0), (1, HP), (2, 2 * HP)):
            w_eqkv = w_eqkv.at[l, :, off:off + HIDDEN].set(fw(g, Wa[i + s]))
            b_eqkv = b_eqkv.at[l, off:off + HIDDEN].set(fb(bl, Wa[i + s], ba[i + s]))
        w_eo.append(Wa[i + 3]); b_eo.append(ba[i + 3])

        # decoder seq-1 self-attention: out = yn_hat @ (diag(g) Wv Wo) + (bln Wv Wo + bv Wo + bo)
        i = _attn_idx_dec_self(l)
        g, bl = lg[_ln_idx_dec(l, 0)], lb[_ln_idx_dec(l, 0)]
        Wvo = Wa[i + 2] @ Wa[i + 3]
        w_dself.append(fw(g, Wvo))
        b_dself.append(bl @ Wvo + ba[i + 2] @ Wa[i + 3] + ba[i + 3])

        # decoder cross-attention: Q gets its pre-norm fold, K|V get the enc-final LN fold
        i = _attn_idx_dec_src(l)
        g, bl = lg[_ln_idx_dec(l, 1)], lb[_ln_idx_dec(l, 1)]
        w_dq.append(fw(g, Wa[i])); b_dq.append(fb(bl, Wa[i], ba[i]))
        w_dkv = w_dkv.at[l, :, 0:HIDDEN].set(fw(ge, Wa[i + 1]))
        b_dkv = b_dkv.at[l, 0:HIDDEN].set(fb(be, Wa[i + 1], ba[i + 1]))
        w_dkv = w_dkv.at[l, :, HP:HP + HIDDEN].set(fw(ge, Wa[i + 2]))
        b_dkv = b_dkv.at[l, HP:HP + HIDDEN].set(fb(be, Wa[i + 2], ba[i + 2]))
        w_dco.append(Wa[i + 3]); b_dco.append(ba[i + 3])

    for l in range(NLAYERS):                     # encoder FFNs (LN(l,1) folded into W1)
        idx = _ffn_idx_enc(l)
        g, bl = lg[_ln_idx_enc(l, 1)], lb[_ln_idx_enc(l, 1)]
        w1p.append(fw(g, W1[idx])); b1p.append(fb(bl, W1[idx], b1[idx]))
    for l in range(NLAYERS):                     # decoder FFNs (LN(l,2) folded into W1)
        idx = _ffn_idx_dec(l)
        g, bl = lg[_ln_idx_dec(l, 2)], lb[_ln_idx_dec(l, 2)]
        w1p.append(fw(g, W1[idx])); b1p.append(fb(bl, W1[idx], b1[idx]))

    return {
        'w_eqkv': w_eqkv, 'b_eqkv': b_eqkv,
        'w_eo': jnp.stack(w_eo), 'b_eo': jnp.stack(b_eo),
        'w_dself': jnp.stack(w_dself), 'b_dself': jnp.stack(b_dself),
        'w_dq': jnp.stack(w_dq), 'b_dq': jnp.stack(b_dq),
        'w_dkv': w_dkv, 'b_dkv': b_dkv,
        'w_dco': jnp.stack(w_dco), 'b_dco': jnp.stack(b_dco),
        'w1': jnp.stack(w1p), 'b1': jnp.stack(b1p),
        'w2': params['W2_t'], 'b2': params['b2'],
        'lnf_g': lg[LN_DEC_FINAL][None, :], 'lnf_b': lb[LN_DEC_FINAL][None, :],
    }


# ===================== host-side wavefront (level) schedule =====================
def _build_schedule(tree_rows, num_leaves):
    num_parents = len(tree_rows)
    num_nodes = num_leaves + num_parents

    depth = [0] * num_nodes
    for p, row in enumerate(tree_rows):
        kids = [int(c) for c in row if int(c) > -1]
        assert kids, "parent with no children"
        depth[num_leaves + p] = 1 + max(depth[c] for c in kids)
    num_levels = max(depth[num_leaves:])
    groups = [[] for _ in range(num_levels)]
    for p in range(num_parents):
        groups[depth[num_leaves + p] - 1].append(p)

    maxw = max(len(g) for g in groups)
    maxw = max(8, -(-maxw // 8) * 8)             # level width padded to a sublane multiple
    nl_pad = -(-num_leaves // 8) * 8             # leaf region padded to a sublane multiple

    node_slot = list(range(num_leaves)) + [0] * num_parents
    for lev, g in enumerate(groups):
        for j, p in enumerate(g):
            node_slot[num_leaves + p] = nl_pad + lev * maxw + j

    sched = np.zeros((num_levels * 2 * maxw,), np.int32)        # flat 1-D (SMEM friendly)
    mask0 = np.full((num_levels * maxw,), NEG_INF, np.float32)
    mask1 = np.full((num_levels * maxw,), NEG_INF, np.float32)
    xe_perm = np.zeros((num_levels * maxw,), np.int32)
    xe_valid = np.zeros((num_levels * maxw,), np.float32)
    for lev, g in enumerate(groups):
        for j, p in enumerate(g):
            slot = lev * maxw + j
            c0, c1 = int(tree_rows[p][0]), int(tree_rows[p][1])
            if c0 > -1:
                sched[lev * 2 * maxw + j] = node_slot[c0]; mask0[slot] = 0.0
            if c1 > -1:
                sched[lev * 2 * maxw + maxw + j] = node_slot[c1]; mask1[slot] = 0.0
            xe_perm[slot] = p; xe_valid[slot] = 1.0

    root_row = node_slot[num_leaves + num_parents - 1]
    return dict(num_levels=num_levels, maxw=maxw, nl_pad=nl_pad, sched=sched,
                mask0=mask0, mask1=mask1, xe_perm=xe_perm, xe_valid=xe_valid,
                root_row=int(root_row))


# ================================ wrapper ================================
def bu_transformer_forward(tree, x_word, x_index, params):
    tree_rows = np.asarray(tree, dtype=np.int64).tolist()
    num_parents = len(tree_rows)
    num_nodes = int(x_word.shape[0])
    num_leaves = num_nodes - num_parents

    # Glue (embedding gather): xe[n] = sum_j x_word[n,j] * E_bu[:, x_index[n,j]]
    emb = jnp.take(params['E_bu'].T, x_index, axis=0)           # (N, L, HIDDEN)
    node_xe = jnp.einsum('nl,nlh->nh', x_word, emb)
    leaf_h = node_xe[:num_leaves]

    sch = _build_schedule(tree_rows, num_leaves)
    num_levels, maxw, nl_pad = sch['num_levels'], sch['maxw'], sch['nl_pad']

    # level-padded decoder queries and lane-broadcast additive key masks
    xe_pad = (node_xe[num_leaves + jnp.asarray(sch['xe_perm'])]
              * jnp.asarray(sch['xe_valid'])[:, None])
    m0 = jnp.asarray(np.repeat(sch['mask0'][:, None], HIDDEN, axis=1))
    m1 = jnp.asarray(np.repeat(sch['mask1'][:, None], HIDDEN, axis=1))

    # block-diagonal head-sum matrix (scores broadcast across each head's lanes), host-built
    hsum = jnp.asarray(
        (np.arange(HIDDEN)[:, None] // DK == np.arange(HIDDEN)[None, :] // DK)
        .astype(np.float32) / math.sqrt(DK))

    pk = _pack_params(params)

    kernel = functools.partial(
        _bu_transformer_kernel,
        num_leaves=num_leaves, nl_pad=nl_pad, maxw=maxw,
        num_levels=num_levels, root_row=sch['root_row'])

    vmem = pl.BlockSpec(memory_space=pltpu.MemorySpace.VMEM)    # whole array, no pipelining
    num_inputs = 25

    grid_spec = pltpu.PrefetchScalarGridSpec(
        num_scalar_prefetch=1,                                  # flat child schedule -> SMEM
        grid=(1,),                                              # single step; level loop in-kernel
        in_specs=[vmem] * num_inputs,
        out_specs=vmem,
        scratch_shapes=[
            pltpu.VMEM((nl_pad + num_levels * maxw, HIDDEN), jnp.float32),   # node_h table
            pltpu.VMEM((2 * maxw, HIDDEN), jnp.float32),                     # level child gather
        ],
    )

    out = pl.pallas_call(
        kernel,
        out_shape=jax.ShapeDtypeStruct((1, NCLASS), jnp.float32),
        grid_spec=grid_spec,
        compiler_params=pltpu.CompilerParams(dimension_semantics=("arbitrary",)),
    )(jnp.asarray(sch['sched'], dtype=jnp.int32),
      leaf_h, xe_pad, m0, m1, hsum,
      pk['w_eqkv'], pk['b_eqkv'], pk['w_eo'], pk['b_eo'],
      pk['w_dself'], pk['b_dself'], pk['w_dq'], pk['b_dq'],
      pk['w_dkv'], pk['b_dkv'], pk['w_dco'], pk['b_dco'],
      pk['w1'], pk['b1'], pk['w2'], pk['b2'],
      pk['lnf_g'], pk['lnf_b'],
      params['W_out_t'], params['b_out'])
    return out[0]


# ========================= pure-JAX reference (for checking) =========================
def reference_forward(tree_rows, x_word, x_index, params):
    num_parents = len(tree_rows)
    num_leaves = x_word.shape[0] - num_parents
    emb = jnp.take(params['E_bu'].T, x_index, axis=0)
    node_xe = jnp.einsum('nl,nlh->nh', x_word, emb)
    Wa, ba = params['W_attn_t'], params['b_attn']
    W1, b1, W2, b2 = params['W1_t'], params['b1'], params['W2_t'], params['b2']
    lg, lb = params['ln_g'], params['ln_b']

    def ln(x, i):
        m = jnp.mean(x, -1, keepdims=True)
        d = x - m
        std = jnp.sqrt(jnp.sum(d * d, -1, keepdims=True) / (x.shape[-1] - 1))
        return lg[i] * d / (std + LN_EPS) + lb[i]

    def mha(q_in, kv_in, base):
        lin = lambda x, i: x @ Wa[base + i] + ba[base + i]
        q, k, v = lin(q_in, 0), lin(kv_in, 1), lin(kv_in, 2)
        qh = q.reshape(-1, NHEAD, DK); kh = k.reshape(-1, NHEAD, DK); vh = v.reshape(-1, NHEAD, DK)
        s = jnp.einsum('qhd,khd->hqk', qh, kh) / math.sqrt(DK)
        a = jax.nn.softmax(s, -1)
        ctx = jnp.einsum('hqk,khd->qhd', a, vh).reshape(-1, HIDDEN)
        return lin(ctx, 3)

    def ffw(x, i):
        return jnp.maximum(x @ W1[i] + b1[i], 0.0) @ W2[i] + b2[i]

    def encoder(x):
        for l in range(NLAYERS):
            xn = ln(x, _ln_idx_enc(l, 0)); x = x + mha(xn, xn, _attn_idx_enc(l))
            xn = ln(x, _ln_idx_enc(l, 1)); x = x + ffw(xn, _ffn_idx_enc(l))
        return ln(x, LN_ENC_FINAL)

    def decoder(x, memory):
        for l in range(NLAYERS):
            xn = ln(x, _ln_idx_dec(l, 0)); x = x + mha(xn, xn, _attn_idx_dec_self(l))
            xn = ln(x, _ln_idx_dec(l, 1)); x = x + mha(xn, memory, _attn_idx_dec_src(l))
            xn = ln(x, _ln_idx_dec(l, 2)); x = x + ffw(xn, _ffn_idx_dec(l))
        return ln(x, LN_DEC_FINAL)

    node_h = node_xe[:num_leaves]
    root = None
    for p, row in enumerate(tree_rows):
        kids = [c for c in row if c > -1]
        child_h = node_h[jnp.array(kids)]
        memory = encoder(child_h)
        parent_h = decoder(node_xe[num_leaves + p][None, :], memory)
        node_h = jnp.concatenate([node_h, parent_h], axis=0)
        root = parent_h
    logits = jnp.sum(params['W_out'] * root, axis=1) + params['b_out'].reshape(-1)
    return jax.nn.softmax(logits)


# ==================================== main ====================================
if __name__ == "__main__":
    num_leaves, num_parents, L_WORDS = 4, 3, 5
    num_nodes = num_leaves + num_parents

    key = jax.random.PRNGKey(0)
    k_e, k_wo, k_wa, k_ba, k_w1, k_w2, k_xw, k_xi = jax.random.split(key, 8)

    params = {
        'E_bu':     0.1 * jax.random.normal(k_e,  (HIDDEN, WORD_DIM), jnp.float32),
        'W_out':    0.1 * jax.random.normal(k_wo, (NCLASS, HIDDEN), jnp.float32),
        'b_out':    jnp.zeros((1, NCLASS), jnp.float32),
        'W_attn_t': 0.1 * jax.random.normal(k_wa, (N_ATTN, HIDDEN, HIDDEN), jnp.float32),
        'b_attn':   0.01 * jax.random.normal(k_ba, (N_ATTN, HIDDEN), jnp.float32),
        'W1_t':     0.1 * jax.random.normal(k_w1, (N_FFN, HIDDEN, DFF), jnp.float32),
        'b1':       jnp.zeros((N_FFN, DFF), jnp.float32),
        'W2_t':     0.1 * jax.random.normal(k_w2, (N_FFN, DFF, HIDDEN), jnp.float32),
        'b2':       jnp.zeros((N_FFN, HIDDEN), jnp.float32),
        'ln_g':     jnp.ones((N_LN, HIDDEN), jnp.float32),
        'ln_b':     jnp.zeros((N_LN, HIDDEN), jnp.float32),
    }
    params['W_out_t'] = params['W_out'].T

    x_word = jax.random.uniform(k_xw, (num_nodes, L_WORDS), jnp.float32)
    x_index = jax.random.randint(k_xi, (num_nodes, L_WORDS), 0, WORD_DIM)

    # bottom-up tree: node4 <- [0,1], node5 <- [2] (one missing child), node6(root) <- [4,5]
    tree_rows = [[0, 1], [2, -1], [4, 5]]
    tree = jnp.array(tree_rows, dtype=jnp.int32)

    probs = bu_transformer_forward(tree, x_word, x_index, params)
    probs = jax.block_until_ready(probs)

    ref = reference_forward(tree_rows, x_word, x_index, params)
    assert bool(jnp.all(jnp.isfinite(probs)))
    assert abs(float(jnp.sum(probs)) - 1.0) < 1e-4
    assert float(jnp.max(jnp.abs(probs - ref))) < 5e-3, (probs, ref)
    print("KERNEL_OK")
</pallas_src>

<mosaic_0001>
module attributes {stable_mosaic.version = 11 : i64} {
  func.func @_bu_transformer_kernel(%arg0: i32, %arg1: memref<32xi32, #tpu.memory_space<smem>>, %arg2: memref<4x64xf32, #tpu.memory_space<vmem>>, %arg3: memref<16x64xf32, #tpu.memory_space<vmem>>, %arg4: memref<16x64xf32, #tpu.memory_space<vmem>>, %arg5: memref<16x64xf32, #tpu.memory_space<vmem>>, %arg6: memref<64x64xf32, #tpu.memory_space<vmem>>, %arg7: memref<2x64x384xf32, #tpu.memory_space<vmem>>, %arg8: memref<2x384xf32, #tpu.memory_space<vmem>>, %arg9: memref<2x64x64xf32, #tpu.memory_space<vmem>>, %arg10: memref<2x64xf32, #tpu.memory_space<vmem>>, %arg11: memref<2x64x64xf32, #tpu.memory_space<vmem>>, %arg12: memref<2x64xf32, #tpu.memory_space<vmem>>, %arg13: memref<2x64x64xf32, #tpu.memory_space<vmem>>, %arg14: memref<2x64xf32, #tpu.memory_space<vmem>>, %arg15: memref<2x64x256xf32, #tpu.memory_space<vmem>>, %arg16: memref<2x256xf32, #tpu.memory_space<vmem>>, %arg17: memref<2x64x64xf32, #tpu.memory_space<vmem>>, %arg18: memref<2x64xf32, #tpu.memory_space<vmem>>, %arg19: memref<4x64x128xf32, #tpu.memory_space<vmem>>, %arg20: memref<4x128xf32, #tpu.memory_space<vmem>>, %arg21: memref<4x128x64xf32, #tpu.memory_space<vmem>>, %arg22: memref<4x64xf32, #tpu.memory_space<vmem>>, %arg23: memref<1x64xf32, #tpu.memory_space<vmem>>, %arg24: memref<1x64xf32, #tpu.memory_space<vmem>>, %arg25: memref<64x4xf32, #tpu.memory_space<vmem>>, %arg26: memref<1x4xf32, #tpu.memory_space<vmem>>, %arg27: memref<1x4xf32, #tpu.memory_space<vmem>>, %arg28: memref<24x64xf32, #tpu.memory_space<vmem>>, %arg29: memref<16x64xf32, #tpu.memory_space<vmem>>) attributes {dimension_semantics = [#tpu.dimension_semantics<arbitrary>], iteration_bounds = array<i64: 1>, scalar_prefetch = 1 : i64, scratch_operands = 2 : i64, tpu.core_type = #tpu.core_type<tc>, window_params = [{pipeline_mode = #tpu.pipeline_mode<synchronous>, transform_indices = @transform_0, window_bounds = array<i64: 4, 64>}, {pipeline_mode = #tpu.pipeline_mode<synchronous>, transform_indices = @transform_1, window_bounds = array<i64: 16, 64>}, {pipeline_mode = #tpu.pipeline_mode<synchronous>, transform_indices = @transform_2, window_bounds = array<i64: 16, 64>}, {pipeline_mode = #tpu.pipeline_mode<synchronous>, transform_indices = @transform_3, window_bounds = array<i64: 16, 64>}, {pipeline_mode = #tpu.pipeline_mode<synchronous>, transform_indices = @transform_4, window_bounds = array<i64: 64, 64>}, {pipeline_mode = #tpu.pipeline_mode<synchronous>, transform_indices = @transform_5, window_bounds = array<i64: 2, 64, 384>}, {pipeline_mode = #tpu.pipeline_mode<synchronous>, transform_indices = @transform_6, window_bounds = array<i64: 2, 384>}, {pipeline_mode = #tpu.pipeline_mode<synchronous>, transform_indices = @transform_7, window_bounds = array<i64: 2, 64, 64>}, {pipeline_mode = #tpu.pipeline_mode<synchronous>, transform_indices = @transform_8, window_bounds = array<i64: 2, 64>}, {pipeline_mode = #tpu.pipeline_mode<synchronous>, transform_indices = @transform_9, window_bounds = array<i64: 2, 64, 64>}, {pipeline_mode = #tpu.pipeline_mode<synchronous>, transform_indices = @transform_10, window_bounds = array<i64: 2, 64>}, {pipeline_mode = #tpu.pipeline_mode<synchronous>, transform_indices = @transform_11, window_bounds = array<i64: 2, 64, 64>}, {pipeline_mode = #tpu.pipeline_mode<synchronous>, transform_indices = @transform_12, window_bounds = array<i64: 2, 64>}, {pipeline_mode = #tpu.pipeline_mode<synchronous>, transform_indices = @transform_13, window_bounds = array<i64: 2, 64, 256>}, {pipeline_mode = #tpu.pipeline_mode<synchronous>, transform_indices = @transform_14, window_bounds = array<i64: 2, 256>}, {pipeline_mode = #tpu.pipeline_mode<synchronous>, transform_indices = @transform_15, window_bounds = array<i64: 2, 64, 64>}, {pipeline_mode = #tpu.pipeline_mode<synchronous>, transform_indices = @transform_16, window_bounds = array<i64: 2, 64>}, {pipeline_mode = #tpu.pipeline_mode<synchronous>, transform_indices = @transform_17, window_bounds = array<i64: 4, 64, 128>}, {pipeline_mode = #tpu.pipeline_mode<synchronous>, transform_indices = @transform_18, window_bounds = array<i64: 4, 128>}, {pipeline_mode = #tpu.pipeline_mode<synchronous>, transform_indices = @transform_19, window_bounds = array<i64: 4, 128, 64>}, {pipeline_mode = #tpu.pipeline_mode<synchronous>, transform_indices = @transform_20, window_bounds = array<i64: 4, 64>}, {pipeline_mode = #tpu.pipeline_mode<synchronous>, transform_indices = @transform_21, window_bounds = array<i64: 1, 64>}, {pipeline_mode = #tpu.pipeline_mode<synchronous>, transform_indices = @transform_22, window_bounds = array<i64: 1, 64>}, {pipeline_mode = #tpu.pipeline_mode<synchronous>, transform_indices = @transform_23, window_bounds = array<i64: 64, 4>}, {pipeline_mode = #tpu.pipeline_mode<synchronous>, transform_indices = @transform_24, window_bounds = array<i64: 1, 4>}, {pipeline_mode = #tpu.pipeline_mode<synchronous>, transform_indices = @transform_25, window_bounds = array<i64: 1, 4>}]} {
    %c0 = arith.constant 0 : index
    %c0_0 = arith.constant 0 : index
    %0 = vector.load %arg2[%c0, %c0_0] : memref<4x64xf32, #tpu.memory_space<vmem>>, vector<4x64xf32>
    %c0_1 = arith.constant 0 : index
    %c0_2 = arith.constant 0 : index
    %1 = vector.load %arg28[%c0_1, %c0_2] : memref<24x64xf32, #tpu.memory_space<vmem>>, vector<4x64xf32>
    tpu.vector_store %arg28[%c0_1, %c0_2], %0 {strides = array<i32>} : memref<24x64xf32, #tpu.memory_space<vmem>>, vector<4x64xf32>,
    %c0_3 = arith.constant 0 : index
    %c0_4 = arith.constant 0 : index
    %2 = vector.load %arg6[%c0_3, %c0_4] : memref<64x64xf32, #tpu.memory_space<vmem>>, vector<64x64xf32>
    %c0_i32 = arith.constant 0 : i32
    %c2_i32 = arith.constant 2 : i32
    %3 = arith.addi %c0_i32, %c2_i32 : i32
    %c1_i32 = arith.constant 1 : i32
    scf.for %arg30 = %c0_i32 to %3 step %c1_i32  : i32 {
      %c1_i32_15 = arith.constant 1 : i32
      %19 = arith.muli %arg30, %c1_i32_15 : i32
      %c0_i32_16 = arith.constant 0 : i32
      %20 = arith.addi %c0_i32_16, %19 : i32
      %c8_i32 = arith.constant 8 : i32
      %21 = arith.muli %20, %c8_i32 : i32
      %22 = tpu.assume_multiple %21, 8 : i32
      %c16_i32 = arith.constant 16 : i32
      %23 = arith.muli %20, %c16_i32 : i32
      %c0_i32_17 = arith.constant 0 : i32
      %24 = arith.addi %23, %c0_i32_17 : i32
      %25 = arith.index_cast %24 : i32 to index
      %26 = memref.load %arg1[%25] : memref<32xi32, #tpu.memory_space<smem>>
      %c8_i32_18 = arith.constant 8 : i32
      %27 = arith.addi %23, %c8_i32_18 : i32
      %c0_i32_19 = arith.constant 0 : i32
      %28 = arith.addi %27, %c0_i32_19 : i32
      %29 = arith.index_cast %28 : i32 to index
      %30 = memref.load %arg1[%29] : memref<32xi32, #tpu.memory_space<smem>>
      %31 = arith.index_cast %26 : i32 to index
      %c0_20 = arith.constant 0 : index
      %32 = vector.load %arg28[%31, %c0_20] : memref<24x64xf32, #tpu.memory_space<vmem>>, vector<1x64xf32>
      %c0_21 = arith.constant 0 : index
      %c0_22 = arith.constant 0 : index
      %33 = vector.load %arg29[%c0_21, %c0_22] : memref<16x64xf32, #tpu.memory_space<vmem>>, vector<1x64xf32>
      tpu.vector_store %arg29[%c0_21, %c0_22], %32 {strides = array<i32>} : memref<16x64xf32, #tpu.memory_space<vmem>>, vector<1x64xf32>,
      %34 = arith.index_cast %30 : i32 to index
      %c0_23 = arith.constant 0 : index
      %35 = vector.load %arg28[%34, %c0_23] : memref<24x64xf32, #tpu.memory_space<vmem>>, vector<1x64xf32>
      %c8 = arith.constant 8 : index
      %c0_24 = arith.constant 0 : index
      %36 = vector.load %arg29[%c8, %c0_24] : memref<16x64xf32, #tpu.memory_space<vmem>>, vector<1x64xf32>
      tpu.vector_store %arg29[%c8, %c0_24], %35 {strides = array<i32>} : memref<16x64xf32, #tpu.memory_space<vmem>>, vector<1x64xf32>,
      %c1_i32_25 = arith.constant 1 : i32
      %37 = arith.addi %23, %c1_i32_25 : i32
      %38 = arith.index_cast %37 : i32 to index
      %39 = memref.load %arg1[%38] : memref<32xi32, #tpu.memory_space<smem>>
      %c8_i32_26 = arith.constant 8 : i32
      %40 = arith.addi %23, %c8_i32_26 : i32
      %c1_i32_27 = arith.constant 1 : i32
      %41 = arith.addi %40, %c1_i32_27 : i32
      %42 = arith.index_cast %41 : i32 to index
      %43 = memref.load %arg1[%42] : memref<32xi32, #tpu.memory_space<smem>>
      %44 = arith.index_cast %39 : i32 to index
      %c0_28 = arith.constant 0 : index
      %45 = vector.load %arg28[%44, %c0_28] : memref<24x64xf32, #tpu.memory_space<vmem>>, vector<1x64xf32>
      %c1 = arith.constant 1 : index
      %c0_29 = arith.constant 0 : index
      %46 = vector.load %arg29[%c1, %c0_29] : memref<16x64xf32, #tpu.memory_space<vmem>>, vector<1x64xf32>
      tpu.vector_store %arg29[%c1, %c0_29], %45 {strides = array<i32>} : memref<16x64xf32, #tpu.memory_space<vmem>>, vector<1x64xf32>,
      %47 = arith.index_cast %43 : i32 to index
      %c0_30 = arith.constant 0 : index
      %48 = vector.load %arg28[%47, %c0_30] : memref<24x64xf32, #tpu.memory_space<vmem>>, vector<1x64xf32>
      %c9 = arith.constant 9 : index
      %c0_31 = arith.constant 0 : index
      %49 = vector.load %arg29[%c9, %c0_31] : memref<16x64xf32, #tpu.memory_space<vmem>>, vector<1x64xf32>
      tpu.vector_store %arg29[%c9, %c0_31], %48 {strides = array<i32>} : memref<16x64xf32, #tpu.memory_space<vmem>>, vector<1x64xf32>,
      %c2_i32_32 = arith.constant 2 : i32
      %50 = arith.addi %23, %c2_i32_32 : i32
      %51 = arith.index_cast %50 : i32 to index
      %52 = memref.load %arg1[%51] : memref<32xi32, #tpu.memory_space<smem>>
      %c8_i32_33 = arith.constant 8 : i32
      %53 = arith.addi %23, %c8_i32_33 : i32
      %c2_i32_34 = arith.constant 2 : i32
      %54 = arith.addi %53, %c2_i32_34 : i32
      %55 = arith.index_cast %54 : i32 to index
      %56 = memref.load %arg1[%55] : memref<32xi32, #tpu.memory_space<smem>>
      %57 = arith.index_cast %52 : i32 to index
      %c0_35 = arith.constant 0 : index
      %58 = vector.load %arg28[%57, %c0_35] : memref<24x64xf32, #tpu.memory_space<vmem>>, vector<1x64xf32>
      %c2 = arith.constant 2 : index
      %c0_36 = arith.constant 0 : index
      %59 = vector.load %arg29[%c2, %c0_36] : memref<16x64xf32, #tpu.memory_space<vmem>>, vector<1x64xf32>
      tpu.vector_store %arg29[%c2, %c0_36], %58 {strides = array<i32>} : memref<16x64xf32, #tpu.memory_space<vmem>>, vector<1x64xf32>,
      %60 = arith.index_cast %56 : i32 to index
      %c0_37 = arith.constant 0 : index
      %61 = vector.load %arg28[%60, %c0_37] : memref<24x64xf32, #tpu.memory_space<vmem>>, vector<1x64xf32>
      %c10 = arith.constant 10 : index
      %c0_38 = arith.constant 0 : index
      %62 = vector.load %arg29[%c10, %c0_38] : memref<16x64xf32, #tpu.memory_space<vmem>>, vector<1x64xf32>
      tpu.vector_store %arg29[%c10, %c0_38], %61 {strides = array<i32>} : memref<16x64xf32, #tpu.memory_space<vmem>>, vector<1x64xf32>,
      %c3_i32 = arith.constant 3 : i32
      %63 = arith.addi %23, %c3_i32 : i32
      %64 = arith.index_cast %63 : i32 to index
      %65 = memref.load %arg1[%64] : memref<32xi32, #tpu.memory_space<smem>>
      %c8_i32_39 = arith.constant 8 : i32
      %66 = arith.addi %23, %c8_i32_39 : i32
      %c3_i32_40 = arith.constant 3 : i32
      %67 = arith.addi %66, %c3_i32_40 : i32
      %68 = arith.index_cast %67 : i32 to index
      %69 = memref.load %arg1[%68] : memref<32xi32, #tpu.memory_space<smem>>
      %70 = arith.index_cast %65 : i32 to index
      %c0_41 = arith.constant 0 : index
      %71 = vector.load %arg28[%70, %c0_41] : memref<24x64xf32, #tpu.memory_space<vmem>>, vector<1x64xf32>
      %c3 = arith.constant 3 : index
      %c0_42 = arith.constant 0 : index
      %72 = vector.load %arg29[%c3, %c0_42] : memref<16x64xf32, #tpu.memory_space<vmem>>, vector<1x64xf32>
      tpu.vector_store %arg29[%c3, %c0_42], %71 {strides = array<i32>} : memref<16x64xf32, #tpu.memory_space<vmem>>, vector<1x64xf32>,
      %73 = arith.index_cast %69 : i32 to index
      %c0_43 = arith.constant 0 : index
      %74 = vector.load %arg28[%73, %c0_43] : memref<24x64xf32, #tpu.memory_space<vmem>>, vector<1x64xf32>
      %c11 = arith.constant 11 : index
      %c0_44 = arith.constant 0 : index
      %75 = vector.load %arg29[%c11, %c0_44] : memref<16x64xf32, #tpu.memory_space<vmem>>, vector<1x64xf32>
      tpu.vector_store %arg29[%c11, %c0_44], %74 {strides = array<i32>} : memref<16x64xf32, #tpu.memory_space<vmem>>, vector<1x64xf32>,
      %c4_i32 = arith.constant 4 : i32
      %76 = arith.addi %23, %c4_i32 : i32
      %77 = arith.index_cast %76 : i32 to index
      %78 = memref.load %arg1[%77] : memref<32xi32, #tpu.memory_space<smem>>
      %c8_i32_45 = arith.constant 8 : i32
      %79 = arith.addi %23, %c8_i32_45 : i32
      %c4_i32_46 = arith.constant 4 : i32
      %80 = arith.addi %79, %c4_i32_46 : i32
      %81 = arith.index_cast %80 : i32 to index
      %82 = memref.load %arg1[%81] : memref<32xi32, #tpu.memory_space<smem>>
      %83 = arith.index_cast %78 : i32 to index
      %c0_47 = arith.constant 0 : index
      %84 = vector.load %arg28[%83, %c0_47] : memref<24x64xf32, #tpu.memory_space<vmem>>, vector<1x64xf32>
      %c4 = arith.constant 4 : index
      %c0_48 = arith.constant 0 : index
      %85 = vector.load %arg29[%c4, %c0_48] : memref<16x64xf32, #tpu.memory_space<vmem>>, vector<1x64xf32>
      tpu.vector_store %arg29[%c4, %c0_48], %84 {strides = array<i32>} : memref<16x64xf32, #tpu.memory_space<vmem>>, vector<1x64xf32>,
      %86 = arith.index_cast %82 : i32 to index
      %c0_49 = arith.constant 0 : index
      %87 = vector.load %arg28[%86, %c0_49] : memref<24x64xf32, #tpu.memory_space<vmem>>, vector<1x64xf32>
      %c12 = arith.constant 12 : index
      %c0_50 = arith.constant 0 : index
      %88 = vector.load %arg29[%c12, %c0_50] : memref<16x64xf32, #tpu.memory_space<vmem>>, vector<1x64xf32>
      tpu.vector_store %arg29[%c12, %c0_50], %87 {strides = array<i32>} : memref<16x64xf32, #tpu.memory_space<vmem>>, vector<1x64xf32>,
      %c5_i32 = arith.constant 5 : i32
      %89 = arith.addi %23, %c5_i32 : i32
      %90 = arith.index_cast %89 : i32 to index
      %91 = memref.load %arg1[%90] : memref<32xi32, #tpu.memory_space<smem>>
      %c8_i32_51 = arith.constant 8 : i32
      %92 = arith.addi %23, %c8_i32_51 : i32
      %c5_i32_52 = arith.constant 5 : i32
      %93 = arith.addi %92, %c5_i32_52 : i32
      %94 = arith.index_cast %93 : i32 to index
      %95 = memref.load %arg1[%94] : memref<32xi32, #tpu.memory_space<smem>>
      %96 = arith.index_cast %91 : i32 to index
      %c0_53 = arith.constant 0 : index
      %97 = vector.load %arg28[%96, %c0_53] : memref<24x64xf32, #tpu.memory_space<vmem>>, vector<1x64xf32>
      %c5 = arith.constant 5 : index
      %c0_54 = arith.constant 0 : index
      %98 = vector.load %arg29[%c5, %c0_54] : memref<16x64xf32, #tpu.memory_space<vmem>>, vector<1x64xf32>
      tpu.vector_store %arg29[%c5, %c0_54], %97 {strides = array<i32>} : memref<16x64xf32, #tpu.memory_space<vmem>>, vector<1x64xf32>,
      %99 = arith.index_cast %95 : i32 to index
      %c0_55 = arith.constant 0 : index
      %100 = vector.load %arg28[%99, %c0_55] : memref<24x64xf32, #tpu.memory_space<vmem>>, vector<1x64xf32>
      %c13 = arith.constant 13 : index
      %c0_56 = arith.constant 0 : index
      %101 = vector.load %arg29[%c13, %c0_56] : memref<16x64xf32, #tpu.memory_space<vmem>>, vector<1x64xf32>
      tpu.vector_store %arg29[%c13, %c0_56], %100 {strides = array<i32>} : memref<16x64xf32, #tpu.memory_space<vmem>>, vector<1x64xf32>,
      %c6_i32 = arith.constant 6 : i32
      %102 = arith.addi %23, %c6_i32 : i32
      %103 = arith.index_cast %102 : i32 to index
      %104 = memref.load %arg1[%103] : memref<32xi32, #tpu.memory_space<smem>>
      %c8_i32_57 = arith.constant 8 : i32
      %105 = arith.addi %23, %c8_i32_57 : i32
      %c6_i32_58 = arith.constant 6 : i32
      %106 = arith.addi %105, %c6_i32_58 : i32
      %107 = arith.index_cast %106 : i32 to index
      %108 = memref.load %arg1[%107] : memref<32xi32, #tpu.memory_space<smem>>
      %109 = arith.index_cast %104 : i32 to index
      %c0_59 = arith.constant 0 : index
      %110 = vector.load %arg28[%109, %c0_59] : memref<24x64xf32, #tpu.memory_space<vmem>>, vector<1x64xf32>
      %c6 = arith.constant 6 : index
      %c0_60 = arith.constant 0 : index
      %111 = vector.load %arg29[%c6, %c0_60] : memref<16x64xf32, #tpu.memory_space<vmem>>, vector<1x64xf32>
      tpu.vector_store %arg29[%c6, %c0_60], %110 {strides = array<i32>} : memref<16x64xf32, #tpu.memory_space<vmem>>, vector<1x64xf32>,
      %112 = arith.index_cast %108 : i32 to index
      %c0_61 = arith.constant 0 : index
      %113 = vector.load %arg28[%112, %c0_61] : memref<24x64xf32, #tpu.memory_space<vmem>>, vector<1x64xf32>
      %c14 = arith.constant 14 : index
      %c0_62 = arith.constant 0 : index
      %114 = vector.load %arg29[%c14, %c0_62] : memref<16x64xf32, #tpu.memory_space<vmem>>, vector<1x64xf32>
      tpu.vector_store %arg29[%c14, %c0_62], %113 {strides = array<i32>} : memref<16x64xf32, #tpu.memory_space<vmem>>, vector<1x64xf32>,
      %c7_i32 = arith.constant 7 : i32
      %115 = arith.addi %23, %c7_i32 : i32
      %116 = arith.index_cast %115 : i32 to index
      %117 = memref.load %arg1[%116] : memref<32xi32, #tpu.memory_space<smem>>
      %c8_i32_63 = arith.constant 8 : i32
      %118 = arith.addi %23, %c8_i32_63 : i32
      %c7_i32_64 = arith.constant 7 : i32
      %119 = arith.addi %118, %c7_i32_64 : i32
      %120 = arith.index_cast %119 : i32 to index
      %121 = memref.load %arg1[%120] : memref<32xi32, #tpu.memory_space<smem>>
      %122 = arith.index_cast %117 : i32 to index
      %c0_65 = arith.constant 0 : index
      %123 = vector.load %arg28[%122, %c0_65] : memref<24x64xf32, #tpu.memory_space<vmem>>, vector<1x64xf32>
      %c7 = arith.constant 7 : index
      %c0_66 = arith.constant 0 : index
      %124 = vector.load %arg29[%c7, %c0_66] : memref<16x64xf32, #tpu.memory_space<vmem>>, vector<1x64xf32>
      tpu.vector_store %arg29[%c7, %c0_66], %123 {strides = array<i32>} : memref<16x64xf32, #tpu.memory_space<vmem>>, vector<1x64xf32>,
      %125 = arith.index_cast %121 : i32 to index
      %c0_67 = arith.constant 0 : index
      %126 = vector.load %arg28[%125, %c0_67] : memref<24x64xf32, #tpu.memory_space<vmem>>, vector<1x64xf32>
      %c15 = arith.constant 15 : index
      %c0_68 = arith.constant 0 : index
      %127 = vector.load %arg29[%c15, %c0_68] : memref<16x64xf32, #tpu.memory_space<vmem>>, vector<1x64xf32>
      tpu.vector_store %arg29[%c15, %c0_68], %126 {strides = array<i32>} : memref<16x64xf32, #tpu.memory_space<vmem>>, vector<1x64xf32>,
      %c0_69 = arith.constant 0 : index
      %c0_70 = arith.constant 0 : index
      %128 = vector.load %arg29[%c0_69, %c0_70] : memref<16x64xf32, #tpu.memory_space<vmem>>, vector<16x64xf32>
      %129 = arith.index_cast %22 : i32 to index
      %c0_71 = arith.constant 0 : index
      %130 = vector.load %arg4[%129, %c0_71] : memref<16x64xf32, #tpu.memory_space<vmem>>, vector<8x64xf32>
      %131 = arith.index_cast %22 : i32 to index
      %c0_72 = arith.constant 0 : index
      %132 = vector.load %arg5[%131, %c0_72] : memref<16x64xf32, #tpu.memory_space<vmem>>, vector<8x64xf32>
      %cst_73 = arith.constant dense<0.000000e+00> : vector<16xf32>
      %133 = vector.multi_reduction <add>, %128, %cst_73 [1] : vector<16x64xf32> to vector<16xf32>
      %134 = vector.shape_cast %133 : vector<16xf32> to vector<16x1xf32>
      %cst_74 = arith.constant 6.400000e+01 : f32
      %135 = vector.broadcast %cst_74 : f32 to vector<16x1xf32>
      %136 = arith.divf %134, %135 : vector<16x1xf32>
      %137 = vector.broadcast %136 : vector<16x1xf32> to vector<16x64xf32>
      %138 = arith.subf %128, %137 : vector<16x64xf32>
      %139 = arith.mulf %138, %138 : vector<16x64xf32>
      %cst_75 = arith.constant dense<0.000000e+00> : vector<16xf32>
      %140 = vector.multi_reduction <add>, %139, %cst_75 [1] : vector<16x64xf32> to vector<16xf32>
      %141 = vector.shape_cast %140 : vector<16xf32> to vector<16x1xf32>
      %cst_76 = arith.constant 0.0158730168 : f32
      %142 = vector.broadcast %cst_76 : f32 to vector<16x1xf32>
      %143 = arith.mulf %141, %142 : vector<16x1xf32>
      %144 = math.sqrt %143 : vector<16x1xf32>
      %cst_77 = arith.constant 9.99999997E-7 : f32
      %145 = vector.broadcast %cst_77 : f32 to vector<16x1xf32>
      %146 = arith.addf %144, %145 : vector<16x1xf32>
      %147 = tpu.reciprocal %146 {approx = true} : vector<16x1xf32> -> vector<16x1xf32>
      %148 = vector.broadcast %147 : vector<16x1xf32> to vector<16x64xf32>
      %149 = arith.mulf %138, %148 : vector<16x64xf32>
      %c0_78 = arith.constant 0 : index
      %c0_79 = arith.constant 0 : index
      %c0_80 = arith.constant 0 : index
      %150 = vector.load %arg7[%c0_78, %c0_79, %c0_80] : memref<2x64x384xf32, #tpu.memory_space<vmem>>, vector<1x64x384xf32>
      %151 = vector.shape_cast %150 : vector<1x64x384xf32> to vector<64x384xf32>
      %cst_81 = arith.constant dense<0.000000e+00> : vector<16x384xf32>
      %152 = tpu.matmul %149, %151, %cst_81 {dimension_numbers = #tpu.dot_dimension_numbers<[1], [0], [0], [1], [0, 0, 1, 1], [], []>} : vector<16x64xf32>, vector<64x384xf32>, vector<16x384xf32> -> vector<16x384xf32>
      %c0_82 = arith.constant 0 : index
      %c0_83 = arith.constant 0 : index
      %153 = vector.load %arg8[%c0_82, %c0_83] : memref<2x384xf32, #tpu.memory_space<vmem>>, vector<1x384xf32>
      %154 = vector.broadcast %153 : vector<1x384xf32> to vector<16x384xf32>
      %155 = arith.addf %152, %154 : vector<16x384xf32>
      %156 = vector.extract_strided_slice %155 {offsets = [0, 0], sizes = [16, 64], strides = [1, 1]} : vector<16x384xf32> to vector<16x64xf32>
      %157 = vector.extract_strided_slice %155 {offsets = [0, 128], sizes = [16, 64], strides = [1, 1]} : vector<16x384xf32> to vector<16x64xf32>
      %158 = vector.extract_strided_slice %155 {offsets = [0, 256], sizes = [16, 64], strides = [1, 1]} : vector<16x384xf32> to vector<16x64xf32>
      %159 = vector.extract_strided_slice %156 {offsets = [0, 0], sizes = [8, 64], strides = [1, 1]} : vector<16x64xf32> to vector<8x64xf32>
      %160 = vector.extract_strided_slice %156 {offsets = [8, 0], sizes = [8, 64], strides = [1, 1]} : vector<16x64xf32> to vector<8x64xf32>
      %161 = vector.extract_strided_slice %157 {offsets = [0, 0], sizes = [8, 64], strides = [1, 1]} : vector<16x64xf32> to vector<8x64xf32>
      %162 = vector.extract_strided_slice %157 {offsets = [8, 0], sizes = [8, 64], strides = [1, 1]} : vector<16x64xf32> to vector<8x64xf32>
      %163 = vector.extract_strided_slice %158 {offsets = [0, 0], sizes = [8, 64], strides = [1, 1]} : vector<16x64xf32> to vector<8x64xf32>
      %164 = vector.extract_strided_slice %158 {offsets = [8, 0], sizes = [8, 64], strides = [1, 1]} : vector<16x64xf32> to vector<8x64xf32>
      %165 = arith.mulf %159, %161 : vector<8x64xf32>
      %166 = arith.mulf %159, %162 : vector<8x64xf32>
      %167 = arith.mulf %160, %161 : vector<8x64xf32>
      %168 = arith.mulf %160, %162 : vector<8x64xf32>
      %169 = tpu.concatenate %165, %166, %167, %168 in 0 : vector<8x64xf32>, vector<8x64xf32>, vector<8x64xf32>, vector<8x64xf32> -> vector<32x64xf32>
      %cst_84 = arith.constant dense<0.000000e+00> : vector<32x64xf32>
      %170 = tpu.matmul %169, %2, %cst_84 {dimension_numbers = #tpu.dot_dimension_numbers<[1], [0], [0], [1], [0, 0, 1, 1], [], []>} : vector<32x64xf32>, vector<64x64xf32>, vector<32x64xf32> -> vector<32x64xf32>
      %171 = vector.extract_strided_slice %170 {offsets = [0, 0], sizes = [8, 64], strides = [1, 1]} : vector<32x64xf32> to vector<8x64xf32>
      %172 = arith.addf %171, %130 : vector<8x64xf32>
      %173 = vector.extract_strided_slice %170 {offsets = [8, 0], sizes = [8, 64], strides = [1, 1]} : vector<32x64xf32> to vector<8x64xf32>
      %174 = arith.addf %173, %132 : vector<8x64xf32>
      %175 = arith.maximumf %172, %174 : vector<8x64xf32>
      %176 = arith.subf %172, %175 : vector<8x64xf32>
      %177 = math.exp %176 : vector<8x64xf32>
      %178 = arith.subf %174, %175 : vector<8x64xf32>
      %179 = math.exp %178 : vector<8x64xf32>
      %180 = arith.addf %177, %179 : vector<8x64xf32>
      %181 = tpu.reciprocal %180 {approx = true} : vector<8x64xf32> -> vector<8x64xf32>
      %182 = arith.mulf %177, %181 : vector<8x64xf32>
      %183 = arith.mulf %182, %163 : vector<8x64xf32>
      %184 = arith.mulf %179, %181 : vector<8x64xf32>
      %185 = arith.mulf %184, %164 : vector<8x64xf32>
      %186 = arith.addf %183, %185 : vector<8x64xf32>
      %187 = vector.extract_strided_slice %170 {offsets = [16, 0], sizes = [8, 64], strides = [1, 1]} : vector<32x64xf32> to vector<8x64xf32>
      %188 = arith.addf %187, %130 : vector<8x64xf32>
      %189 = vector.extract_strided_slice %170 {offsets = [24, 0], sizes = [8, 64], strides = [1, 1]} : vector<32x64xf32> to vector<8x64xf32>
      %190 = arith.addf %189, %132 : vector<8x64xf32>
      %191 = arith.maximumf %188, %190 : vector<8x64xf32>
      %192 = arith.subf %188, %191 : vector<8x64xf32>
      %193 = math.exp %192 : vector<8x64xf32>
      %194 = arith.subf %190, %191 : vector<8x64xf32>
      %195 = math.exp %194 : vector<8x64xf32>
      %196 = arith.addf %193, %195 : vector<8x64xf32>
      %197 = tpu.reciprocal %196 {approx = true} : vector<8x64xf32> -> vector<8x64xf32>
      %198 = arith.mulf %193, %197 : vector<8x64xf32>
      %199 = arith.mulf %198, %163 : vector<8x64xf32>
      %200 = arith.mulf %195, %197 : vector<8x64xf32>
      %201 = arith.mulf %200, %164 : vector<8x64xf32>
      %202 = arith.addf %199, %201 : vector<8x64xf32>
      %203 = tpu.concatenate %186, %202 in 0 : vector<8x64xf32>, vector<8x64xf32> -> vector<16x64xf32>
      %c0_85 = arith.constant 0 : index
      %c0_86 = arith.constant 0 : index
      %c0_87 = arith.constant 0 : index
      %204 = vector.load %arg9[%c0_85, %c0_86, %c0_87] : memref<2x64x64xf32, #tpu.memory_space<vmem>>, vector<1x64x64xf32>
      %205 = vector.shape_cast %204 : vector<1x64x64xf32> to vector<64x64xf32>
      %cst_88 = arith.constant dense<0.000000e+00> : vector<16x64xf32>
      %206 = tpu.matmul %203, %205, %cst_88 {dimension_numbers = #tpu.dot_dimension_numbers<[1], [0], [0], [1], [0, 0, 1, 1], [], []>} : vector<16x64xf32>, vector<64x64xf32>, vector<16x64xf32> -> vector<16x64xf32>
      %c0_89 = arith.constant 0 : index
      %c0_90 = arith.constant 0 : index
      %207 = vector.load %arg10[%c0_89, %c0_90] : memref<2x64xf32, #tpu.memory_space<vmem>>, vector<1x64xf32>
      %208 = vector.broadcast %207 : vector<1x64xf32> to vector<16x64xf32>
      %209 = arith.addf %206, %208 : vector<16x64xf32>
      %210 = arith.addf %128, %209 : vector<16x64xf32>
      %cst_91 = arith.constant dense<0.000000e+00> : vector<16xf32>
      %211 = vector.multi_reduction <add>, %210, %cst_91 [1] : vector<16x64xf32> to vector<16xf32>
      %212 = vector.shape_cast %211 : vector<16xf32> to vector<16x1xf32>
      %cst_92 = arith.constant 6.400000e+01 : f32
      %213 = vector.broadcast %cst_92 : f32 to vector<16x1xf32>
      %214 = arith.divf %212, %213 : vector<16x1xf32>
      %215 = vector.broadcast %214 : vector<16x1xf32> to vector<16x64xf32>
      %216 = arith.subf %210, %215 : vector<16x64xf32>
      %217 = arith.mulf %216, %216 : vector<16x64xf32>
      %cst_93 = arith.constant dense<0.000000e+00> : vector<16xf32>
      %218 = vector.multi_reduction <add>, %217, %cst_93 [1] : vector<16x64xf32> to vector<16xf32>
      %219 = vector.shape_cast %218 : vector<16xf32> to vector<16x1xf32>
      %cst_94 = arith.constant 0.0158730168 : f32
      %220 = vector.broadcast %cst_94 : f32 to vector<16x1xf32>
      %221 = arith.mulf %219, %220 : vector<16x1xf32>
      %222 = math.sqrt %221 : vector<16x1xf32>
      %cst_95 = arith.constant 9.99999997E-7 : f32
      %223 = vector.broadcast %cst_95 : f32 to vector<16x1xf32>
      %224 = arith.addf %222, %223 : vector<16x1xf32>
      %225 = tpu.reciprocal %224 {approx = true} : vector<16x1xf32> -> vector<16x1xf32>
      %226 = vector.broadcast %225 : vector<16x1xf32> to vector<16x64xf32>
      %227 = arith.mulf %216, %226 : vector<16x64xf32>
      %c0_96 = arith.constant 0 : index
      %c0_97 = arith.constant 0 : index
      %c0_98 = arith.constant 0 : index
      %228 = vector.load %arg19[%c0_96, %c0_97, %c0_98] : memref<4x64x128xf32, #tpu.memory_space<vmem>>, vector<1x64x128xf32>
      %229 = vector.shape_cast %228 : vector<1x64x128xf32> to vector<64x128xf32>
      %cst_99 = arith.constant dense<0.000000e+00> : vector<16x128xf32>
      %230 = tpu.matmul %227, %229, %cst_99 {dimension_numbers = #tpu.dot_dimension_numbers<[1], [0], [0], [1], [0, 0, 1, 1], [], []>} : vector<16x64xf32>, vector<64x128xf32>, vector<16x128xf32> -> vector<16x128xf32>
      %c0_100 = arith.constant 0 : index
      %c0_101 = arith.constant 0 : index
      %231 = vector.load %arg20[%c0_100, %c0_101] : memref<4x128xf32, #tpu.memory_space<vmem>>, vector<1x128xf32>
      %232 = vector.broadcast %231 : vector<1x128xf32> to vector<16x128xf32>
      %233 = arith.addf %230, %232 : vector<16x128xf32>
      %cst_102 = arith.constant 0.000000e+00 : f32
      %234 = vector.broadcast %cst_102 : f32 to vector<16x128xf32>
      %235 = arith.maximumf %233, %234 : vector<16x128xf32>
      %c0_103 = arith.constant 0 : index
      %c0_104 = arith.constant 0 : index
      %c0_105 = arith.constant 0 : index
      %236 = vector.load %arg21[%c0_103, %c0_104, %c0_105] : memref<4x128x64xf32, #tpu.memory_space<vmem>>, vector<1x128x64xf32>
      %237 = vector.shape_cast %236 : vector<1x128x64xf32> to vector<128x64xf32>
      %cst_106 = arith.constant dense<0.000000e+00> : vector<16x64xf32>
      %238 = tpu.matmul %235, %237, %cst_106 {dimension_numbers = #tpu.dot_dimension_numbers<[1], [0], [0], [1], [0, 0, 1, 1], [], []>} : vector<16x128xf32>, vector<128x64xf32>, vector<16x64xf32> -> vector<16x64xf32>
      %c0_107 = arith.constant 0 : index
      %c0_108 = arith.constant 0 : index
      %239 = vector.load %arg22[%c0_107, %c0_108] : memref<4x64xf32, #tpu.memory_space<vmem>>, vector<1x64xf32>
      %240 = vector.broadcast %239 : vector<1x64xf32> to vector<16x64xf32>
      %241 = arith.addf %238, %240 : vector<16x64xf32>
      %242 = arith.addf %210, %241 : vector<16x64xf32>
      %cst_109 = arith.constant dense<0.000000e+00> : vector<16xf32>
      %243 = vector.multi_reduction <add>, %242, %cst_109 [1] : vector<16x64xf32> to vector<16xf32>
      %244 = vector.shape_cast %243 : vector<16xf32> to vector<16x1xf32>
      %cst_110 = arith.constant 6.400000e+01 : f32
      %245 = vector.broadcast %cst_110 : f32 to vector<16x1xf32>
      %246 = arith.divf %244, %245 : vector<16x1xf32>
      %247 = vector.broadcast %246 : vector<16x1xf32> to vector<16x64xf32>
      %248 = arith.subf %242, %247 : vector<16x64xf32>
      %249 = arith.mulf %248, %248 : vector<16x64xf32>
      %cst_111 = arith.constant dense<0.000000e+00> : vector<16xf32>
      %250 = vector.multi_reduction <add>, %249, %cst_111 [1] : vector<16x64xf32> to vector<16xf32>
      %251 = vector.shape_cast %250 : vector<16xf32> to vector<16x1xf32>
      %cst_112 = arith.constant 0.0158730168 : f32
      %252 = vector.broadcast %cst_112 : f32 to vector<16x1xf32>
      %253 = arith.mulf %251, %252 : vector<16x1xf32>
      %254 = math.sqrt %253 : vector<16x1xf32>
      %cst_113 = arith.constant 9.99999997E-7 : f32
      %255 = vector.broadcast %cst_113 : f32 to vector<16x1xf32>
      %256 = arith.addf %254, %255 : vector<16x1xf32>
      %257 = tpu.reciprocal %256 {approx = true} : vector<16x1xf32> -> vector<16x1xf32>
      %258 = vector.broadcast %257 : vector<16x1xf32> to vector<16x64xf32>
      %259 = arith.mulf %248, %258 : vector<16x64xf32>
      %c1_114 = arith.constant 1 : index
      %c0_115 = arith.constant 0 : index
      %c0_116 = arith.constant 0 : index
      %260 = vector.load %arg7[%c1_114, %c0_115, %c0_116] : memref<2x64x384xf32, #tpu.memory_space<vmem>>, vector<1x64x384xf32>
      %261 = vector.shape_cast %260 : vector<1x64x384xf32> to vector<64x384xf32>
      %cst_117 = arith.constant dense<0.000000e+00> : vector<16x384xf32>
      %262 = tpu.matmul %259, %261, %cst_117 {dimension_numbers = #tpu.dot_dimension_numbers<[1], [0], [0], [1], [0, 0, 1, 1], [], []>} : vector<16x64xf32>, vector<64x384xf32>, vector<16x384xf32> -> vector<16x384xf32>
      %c1_118 = arith.constant 1 : index
      %c0_119 = arith.constant 0 : index
      %263 = vector.load %arg8[%c1_118, %c0_119] : memref<2x384xf32, #tpu.memory_space<vmem>>, vector<1x384xf32>
      %264 = vector.broadcast %263 : vector<1x384xf32> to vector<16x384xf32>
      %265 = arith.addf %262, %264 : vector<16x384xf32>
      %266 = vector.extract_strided_slice %265 {offsets = [0, 0], sizes = [16, 64], strides = [1, 1]} : vector<16x384xf32> to vector<16x64xf32>
      %267 = vector.extract_strided_slice %265 {offsets = [0, 128], sizes = [16, 64], strides = [1, 1]} : vector<16x384xf32> to vector<16x64xf32>
      %268 = vector.extract_strided_slice %265 {offsets = [0, 256], sizes = [16, 64], strides = [1, 1]} : vector<16x384xf32> to vector<16x64xf32>
      %269 = vector.extract_strided_slice %266 {offsets = [0, 0], sizes = [8, 64], strides = [1, 1]} : vector<16x64xf32> to vector<8x64xf32>
      %270 = vector.extract_strided_slice %266 {offsets = [8, 0], sizes = [8, 64], strides = [1, 1]} : vector<16x64xf32> to vector<8x64xf32>
      %271 = vector.extract_strided_slice %267 {offsets = [0, 0], sizes = [8, 64], strides = [1, 1]} : vector<16x64xf32> to vector<8x64xf32>
      %272 = vector.extract_strided_slice %267 {offsets = [8, 0], sizes = [8, 64], strides = [1, 1]} : vector<16x64xf32> to vector<8x64xf32>
      %273 = vector.extract_strided_slice %268 {offsets = [0, 0], sizes = [8, 64], strides = [1, 1]} : vector<16x64xf32> to vector<8x64xf32>
      %274 = vector.extract_strided_slice %268 {offsets = [8, 0], sizes = [8, 64], strides = [1, 1]} : vector<16x64xf32> to vector<8x64xf32>
      %275 = arith.mulf %269, %271 : vector<8x64xf32>
      %276 = arith.mulf %269, %272 : vector<8x64xf32>
      %277 = arith.mulf %270, %271 : vector<8x64xf32>
      %278 = arith.mulf %270, %272 : vector<8x64xf32>
      %279 = tpu.concatenate %275, %276, %277, %278 in 0 : vector<8x64xf32>, vector<8x64xf32>, vector<8x64xf32>, vector<8x64xf32> -> vector<32x64xf32>
      %cst_120 = arith.constant dense<0.000000e+00> : vector<32x64xf32>
      %280 = tpu.matmul %279, %2, %cst_120 {dimension_numbers = #tpu.dot_dimension_numbers<[1], [0], [0], [1], [0, 0, 1, 1], [], []>} : vector<32x64xf32>, vector<64x64xf32>, vector<32x64xf32> -> vector<32x64xf32>
      %281 = vector.extract_strided_slice %280 {offsets = [0, 0], sizes = [8, 64], strides = [1, 1]} : vector<32x64xf32> to vector<8x64xf32>
      %282 = arith.addf %281, %130 : vector<8x64xf32>
      %283 = vector.extract_strided_slice %280 {offsets = [8, 0], sizes = [8, 64], strides = [1, 1]} : vector<32x64xf32> to vector<8x64xf32>
      %284 = arith.addf %283, %132 : vector<8x64xf32>
      %285 = arith.maximumf %282, %284 : vector<8x64xf32>
      %286 = arith.subf %282, %285 : vector<8x64xf32>
      %287 = math.exp %286 : vector<8x64xf32>
      %288 = arith.subf %284, %285 : vector<8x64xf32>
      %289 = math.exp %288 : vector<8x64xf32>
      %290 = arith.addf %287, %289 : vector<8x64xf32>
      %291 = tpu.reciprocal %290 {approx = true} : vector<8x64xf32> -> vector<8x64xf32>
      %292 = arith.mulf %287, %291 : vector<8x64xf32>
      %293 = arith.mulf %292, %273 : vector<8x64xf32>
      %294 = arith.mulf %289, %291 : vector<8x64xf32>
      %295 = arith.mulf %294, %274 : vector<8x64xf32>
      %296 = arith.addf %293, %295 : vector<8x64xf32>
      %297 = vector.extract_strided_slice %280 {offsets = [16, 0], sizes = [8, 64], strides = [1, 1]} : vector<32x64xf32> to vector<8x64xf32>
      %298 = arith.addf %297, %130 : vector<8x64xf32>
      %299 = vector.extract_strided_slice %280 {offsets = [24, 0], sizes = [8, 64], strides = [1, 1]} : vector<32x64xf32> to vector<8x64xf32>
      %300 = arith.addf %299, %132 : vector<8x64xf32>
      %301 = arith.maximumf %298, %300 : vector<8x64xf32>
      %302 = arith.subf %298, %301 : vector<8x64xf32>
      %303 = math.exp %302 : vector<8x64xf32>
      %304 = arith.subf %300, %301 : vector<8x64xf32>
      %305 = math.exp %304 : vector<8x64xf32>
      %306 = arith.addf %303, %305 : vector<8x64xf32>
      %307 = tpu.reciprocal %306 {approx = true} : vector<8x64xf32> -> vector<8x64xf32>
      %308 = arith.mulf %303, %307 : vector<8x64xf32>
      %309 = arith.mulf %308, %273 : vector<8x64xf32>
      %310 = arith.mulf %305, %307 : vector<8x64xf32>
      %311 = arith.mulf %310, %274 : vector<8x64xf32>
      %312 = arith.addf %309, %311 : vector<8x64xf32>
      %313 = tpu.concatenate %296, %312 in 0 : vector<8x64xf32>, vector<8x64xf32> -> vector<16x64xf32>
      %c1_121 = arith.constant 1 : index
      %c0_122 = arith.constant 0 : index
      %c0_123 = arith.constant 0 : index
      %314 = vector.load %arg9[%c1_121, %c0_122, %c0_123] : memref<2x64x64xf32, #tpu.memory_space<vmem>>, vector<1x64x64xf32>
      %315 = vector.shape_cast %314 : vector<1x64x64xf32> to vector<64x64xf32>
      %cst_124 = arith.constant dense<0.000000e+00> : vector<16x64xf32>
      %316 = tpu.matmul %313, %315, %cst_124 {dimension_numbers = #tpu.dot_dimension_numbers<[1], [0], [0], [1], [0, 0, 1, 1], [], []>} : vector<16x64xf32>, vector<64x64xf32>, vector<16x64xf32> -> vector<16x64xf32>
      %c1_125 = arith.constant 1 : index
      %c0_126 = arith.constant 0 : index
      %317 = vector.load %arg10[%c1_125, %c0_126] : memref<2x64xf32, #tpu.memory_space<vmem>>, vector<1x64xf32>
      %318 = vector.broadcast %317 : vector<1x64xf32> to vector<16x64xf32>
      %319 = arith.addf %316, %318 : vector<16x64xf32>
      %320 = arith.addf %242, %319 : vector<16x64xf32>
      %cst_127 = arith.constant dense<0.000000e+00> : vector<16xf32>
      %321 = vector.multi_reduction <add>, %320, %cst_127 [1] : vector<16x64xf32> to vector<16xf32>
      %322 = vector.shape_cast %321 : vector<16xf32> to vector<16x1xf32>
      %cst_128 = arith.constant 6.400000e+01 : f32
      %323 = vector.broadcast %cst_128 : f32 to vector<16x1xf32>
      %324 = arith.divf %322, %323 : vector<16x1xf32>
      %325 = vector.broadcast %324 : vector<16x1xf32> to vector<16x64xf32>
      %326 = arith.subf %320, %325 : vector<16x64xf32>
      %327 = arith.mulf %326, %326 : vector<16x64xf32>
      %cst_129 = arith.constant dense<0.000000e+00> : vector<16xf32>
      %328 = vector.multi_reduction <add>, %327, %cst_129 [1] : vector<16x64xf32> to vector<16xf32>
      %329 = vector.shape_cast %328 : vector<16xf32> to vector<16x1xf32>
      %cst_130 = arith.constant 0.0158730168 : f32
      %330 = vector.broadcast %cst_130 : f32 to vector<16x1xf32>
      %331 = arith.mulf %329, %330 : vector<16x1xf32>
      %332 = math.sqrt %331 : vector<16x1xf32>
      %cst_131 = arith.constant 9.99999997E-7 : f32
      %333 = vector.broadcast %cst_131 : f32 to vector<16x1xf32>
      %334 = arith.addf %332, %333 : vector<16x1xf32>
      %335 = tpu.reciprocal %334 {approx = true} : vector<16x1xf32> -> vector<16x1xf32>
      %336 = vector.broadcast %335 : vector<16x1xf32> to vector<16x64xf32>
      %337 = arith.mulf %326, %336 : vector<16x64xf32>
      %c1_132 = arith.constant 1 : index
      %c0_133 = arith.constant 0 : index
      %c0_134 = arith.constant 0 : index
      %338 = vector.load %arg19[%c1_132, %c0_133, %c0_134] : memref<4x64x128xf32, #tpu.memory_space<vmem>>, vector<1x64x128xf32>
      %339 = vector.shape_cast %338 : vector<1x64x128xf32> to vector<64x128xf32>
      %cst_135 = arith.constant dense<0.000000e+00> : vector<16x128xf32>
      %340 = tpu.matmul %337, %339, %cst_135 {dimension_numbers = #tpu.dot_dimension_numbers<[1], [0], [0], [1], [0, 0, 1, 1], [], []>} : vector<16x64xf32>, vector<64x128xf32>, vector<16x128xf32> -> vector<16x128xf32>
      %c1_136 = arith.constant 1 : index
      %c0_137 = arith.constant 0 : index
      %341 = vector.load %arg20[%c1_136, %c0_137] : memref<4x128xf32, #tpu.memory_space<vmem>>, vector<1x128xf32>
      %342 = vector.broadcast %341 : vector<1x128xf32> to vector<16x128xf32>
      %343 = arith.addf %340, %342 : vector<16x128xf32>
      %cst_138 = arith.constant 0.000000e+00 : f32
      %344 = vector.broadcast %cst_138 : f32 to vector<16x128xf32>
      %345 = arith.maximumf %343, %344 : vector<16x128xf32>
      %c1_139 = arith.constant 1 : index
      %c0_140 = arith.constant 0 : index
      %c0_141 = arith.constant 0 : index
      %346 = vector.load %arg21[%c1_139, %c0_140, %c0_141] : memref<4x128x64xf32, #tpu.memory_space<vmem>>, vector<1x128x64xf32>
      %347 = vector.shape_cast %346 : vector<1x128x64xf32> to vector<128x64xf32>
      %cst_142 = arith.constant dense<0.000000e+00> : vector<16x64xf32>
      %348 = tpu.matmul %345, %347, %cst_142 {dimension_numbers = #tpu.dot_dimension_numbers<[1], [0], [0], [1], [0, 0, 1, 1], [], []>} : vector<16x128xf32>, vector<128x64xf32>, vector<16x64xf32> -> vector<16x64xf32>
      %c1_143 = arith.constant 1 : index
      %c0_144 = arith.constant 0 : index
      %349 = vector.load %arg22[%c1_143, %c0_144] : memref<4x64xf32, #tpu.memory_space<vmem>>, vector<1x64xf32>
      %350 = vector.broadcast %349 : vector<1x64xf32> to vector<16x64xf32>
      %351 = arith.addf %348, %350 : vector<16x64xf32>
      %352 = arith.addf %320, %351 : vector<16x64xf32>
      %cst_145 = arith.constant dense<0.000000e+00> : vector<16xf32>
      %353 = vector.multi_reduction <add>, %352, %cst_145 [1] : vector<16x64xf32> to vector<16xf32>
      %354 = vector.shape_cast %353 : vector<16xf32> to vector<16x1xf32>
      %cst_146 = arith.constant 6.400000e+01 : f32
      %355 = vector.broadcast %cst_146 : f32 to vector<16x1xf32>
      %356 = arith.divf %354, %355 : vector<16x1xf32>
      %357 = vector.broadcast %356 : vector<16x1xf32> to vector<16x64xf32>
      %358 = arith.subf %352, %357 : vector<16x64xf32>
      %359 = arith.mulf %358, %358 : vector<16x64xf32>
      %cst_147 = arith.constant dense<0.000000e+00> : vector<16xf32>
      %360 = vector.multi_reduction <add>, %359, %cst_147 [1] : vector<16x64xf32> to vector<16xf32>
      %361 = vector.shape_cast %360 : vector<16xf32> to vector<16x1xf32>
      %cst_148 = arith.constant 0.0158730168 : f32
      %362 = vector.broadcast %cst_148 : f32 to vector<16x1xf32>
      %363 = arith.mulf %361, %362 : vector<16x1xf32>
      %364 = math.sqrt %363 : vector<16x1xf32>
      %cst_149 = arith.constant 9.99999997E-7 : f32
      %365 = vector.broadcast %cst_149 : f32 to vector<16x1xf32>
      %366 = arith.addf %364, %365 : vector<16x1xf32>
      %367 = tpu.reciprocal %366 {approx = true} : vector<16x1xf32> -> vector<16x1xf32>
      %368 = vector.broadcast %367 : vector<16x1xf32> to vector<16x64xf32>
      %369 = arith.mulf %358, %368 : vector<16x64xf32>
      %370 = arith.index_cast %22 : i32 to index
      %c0_150 = arith.constant 0 : index
      %371 = vector.load %arg3[%370, %c0_150] : memref<16x64xf32, #tpu.memory_space<vmem>>, vector<8x64xf32>
      %cst_151 = arith.constant dense<0.000000e+00> : vector<8xf32>
      %372 = vector.multi_reduction <add>, %371, %cst_151 [1] : vector<8x64xf32> to vector<8xf32>
      %373 = vector.shape_cast %372 : vector<8xf32> to vector<8x1xf32>
      %cst_152 = arith.constant 6.400000e+01 : f32
      %374 = vector.broadcast %cst_152 : f32 to vector<8x1xf32>
      %375 = arith.divf %373, %374 : vector<8x1xf32>
      %376 = vector.broadcast %375 : vector<8x1xf32> to vector<8x64xf32>
      %377 = arith.subf %371, %376 : vector<8x64xf32>
      %378 = arith.mulf %377, %377 : vector<8x64xf32>
      %cst_153 = arith.constant dense<0.000000e+00> : vector<8xf32>
      %379 = vector.multi_reduction <add>, %378, %cst_153 [1] : vector<8x64xf32> to vector<8xf32>
      %380 = vector.shape_cast %379 : vector<8xf32> to vector<8x1xf32>
      %cst_154 = arith.constant 0.0158730168 : f32
      %381 = vector.broadcast %cst_154 : f32 to vector<8x1xf32>
      %382 = arith.mulf %380, %381 : vector<8x1xf32>
      %383 = math.sqrt %382 : vector<8x1xf32>
      %cst_155 = arith.constant 9.99999997E-7 : f32
      %384 = vector.broadcast %cst_155 : f32 to vector<8x1xf32>
      %385 = arith.addf %383, %384 : vector<8x1xf32>
      %386 = tpu.reciprocal %385 {approx = true} : vector<8x1xf32> -> vector<8x1xf32>
      %387 = vector.broadcast %386 : vector<8x1xf32> to vector<8x64xf32>
      %388 = arith.mulf %377, %387 : vector<8x64xf32>
      %c0_156 = arith.constant 0 : index
      %c0_157 = arith.constant 0 : index
      %c0_158 = arith.constant 0 : index
      %389 = vector.load %arg11[%c0_156, %c0_157, %c0_158] : memref<2x64x64xf32, #tpu.memory_space<vmem>>, vector<1x64x64xf32>
      %390 = vector.shape_cast %389 : vector<1x64x64xf32> to vector<64x64xf32>
      %cst_159 = arith.constant dense<0.000000e+00> : vector<8x64xf32>
      %391 = tpu.matmul %388, %390, %cst_159 {dimension_numbers = #tpu.dot_dimension_numbers<[1], [0], [0], [1], [0, 0, 1, 1], [], []>} : vector<8x64xf32>, vector<64x64xf32>, vector<8x64xf32> -> vector<8x64xf32>
      %c0_160 = arith.constant 0 : index
      %c0_161 = arith.constant 0 : index
      %392 = vector.load %arg12[%c0_160, %c0_161] : memref<2x64xf32, #tpu.memory_space<vmem>>, vector<1x64xf32>
      %393 = vector.broadcast %392 : vector<1x64xf32> to vector<8x64xf32>
      %394 = arith.addf %391, %393 : vector<8x64xf32>
      %395 = arith.addf %371, %394 : vector<8x64xf32>
      %cst_162 = arith.constant dense<0.000000e+00> : vector<8xf32>
      %396 = vector.multi_reduction <add>, %395, %cst_162 [1] : vector<8x64xf32> to vector<8xf32>
      %397 = vector.shape_cast %396 : vector<8xf32> to vector<8x1xf32>
      %cst_163 = arith.constant 6.400000e+01 : f32
      %398 = vector.broadcast %cst_163 : f32 to vector<8x1xf32>
      %399 = arith.divf %397, %398 : vector<8x1xf32>
      %400 = vector.broadcast %399 : vector<8x1xf32> to vector<8x64xf32>
      %401 = arith.subf %395, %400 : vector<8x64xf32>
      %402 = arith.mulf %401, %401 : vector<8x64xf32>
      %cst_164 = arith.constant dense<0.000000e+00> : vector<8xf32>
      %403 = vector.multi_reduction <add>, %402, %cst_164 [1] : vector<8x64xf32> to vector<8xf32>
      %404 = vector.shape_cast %403 : vector<8xf32> to vector<8x1xf32>
      %cst_165 = arith.constant 0.0158730168 : f32
      %405 = vector.broadcast %cst_165 : f32 to vector<8x1xf32>
      %406 = arith.mulf %404, %405 : vector<8x1xf32>
      %407 = math.sqrt %406 : vector<8x1xf32>
      %cst_166 = arith.constant 9.99999997E-7 : f32
      %408 = vector.broadcast %cst_166 : f32 to vector<8x1xf32>
      %409 = arith.addf %407, %408 : vector<8x1xf32>
      %410 = tpu.reciprocal %409 {approx = true} : vector<8x1xf32> -> vector<8x1xf32>
      %411 = vector.broadcast %410 : vector<8x1xf32> to vector<8x64xf32>
      %412 = arith.mulf %401, %411 : vector<8x64xf32>
      %c0_167 = arith.constant 0 : index
      %c0_168 = arith.constant 0 : index
      %c0_169 = arith.constant 0 : index
      %413 = vector.load %arg13[%c0_167, %c0_168, %c0_169] : memref<2x64x64xf32, #tpu.memory_space<vmem>>, vector<1x64x64xf32>
      %414 = vector.shape_cast %413 : vector<1x64x64xf32> to vector<64x64xf32>
      %cst_170 = arith.constant dense<0.000000e+00> : vector<8x64xf32>
      %415 = tpu.matmul %412, %414, %cst_170 {dimension_numbers = #tpu.dot_dimension_numbers<[1], [0], [0], [1], [0, 0, 1, 1], [], []>} : vector<8x64xf32>, vector<64x64xf32>, vector<8x64xf32> -> vector<8x64xf32>
      %c0_171 = arith.constant 0 : index
      %c0_172 = arith.constant 0 : index
      %416 = vector.load %arg14[%c0_171, %c0_172] : memref<2x64xf32, #tpu.memory_space<vmem>>, vector<1x64xf32>
      %417 = vector.broadcast %416 : vector<1x64xf32> to vector<8x64xf32>
      %418 = arith.addf %415, %417 : vector<8x64xf32>
      %c0_173 = arith.constant 0 : index
      %c0_174 = arith.constant 0 : index
      %c0_175 = arith.constant 0 : index
      %419 = vector.load %arg15[%c0_173, %c0_174, %c0_175] : memref<2x64x256xf32, #tpu.memory_space<vmem>>, vector<1x64x256xf32>
      %420 = vector.shape_cast %419 : vector<1x64x256xf32> to vector<64x256xf32>
      %cst_176 = arith.constant dense<0.000000e+00> : vector<16x256xf32>
      %421 = tpu.matmul %369, %420, %cst_176 {dimension_numbers = #tpu.dot_dimension_numbers<[1], [0], [0], [1], [0, 0, 1, 1], [], []>} : vector<16x64xf32>, vector<64x256xf32>, vector<16x256xf32> -> vector<16x256xf32>
      %c0_177 = arith.constant 0 : index
      %c0_178 = arith.constant 0 : index
      %422 = vector.load %arg16[%c0_177, %c0_178] : memref<2x256xf32, #tpu.memory_space<vmem>>, vector<1x256xf32>
      %423 = vector.broadcast %422 : vector<1x256xf32> to vector<16x256xf32>
      %424 = arith.addf %421, %423 : vector<16x256xf32>
      %425 = vector.extract_strided_slice %424 {offsets = [0, 0], sizes = [16, 64], strides = [1, 1]} : vector<16x256xf32> to vector<16x64xf32>
      %426 = vector.extract_strided_slice %424 {offsets = [0, 128], sizes = [16, 64], strides = [1, 1]} : vector<16x256xf32> to vector<16x64xf32>
      %427 = vector.extract_strided_slice %425 {offsets = [0, 0], sizes = [8, 64], strides = [1, 1]} : vector<16x64xf32> to vector<8x64xf32>
      %428 = vector.extract_strided_slice %425 {offsets = [8, 0], sizes = [8, 64], strides = [1, 1]} : vector<16x64xf32> to vector<8x64xf32>
      %429 = vector.extract_strided_slice %426 {offsets = [0, 0], sizes = [8, 64], strides = [1, 1]} : vector<16x64xf32> to vector<8x64xf32>
      %430 = vector.extract_strided_slice %426 {offsets = [8, 0], sizes = [8, 64], strides = [1, 1]} : vector<16x64xf32> to vector<8x64xf32>
      %431 = arith.mulf %418, %427 : vector<8x64xf32>
      %432 = arith.mulf %418, %428 : vector<8x64xf32>
      %433 = tpu.concatenate %431, %432 in 0 : vector<8x64xf32>, vector<8x64xf32> -> vector<16x64xf32>
      %cst_179 = arith.constant dense<0.000000e+00> : vector<16x64xf32>
      %434 = tpu.matmul %433, %2, %cst_179 {dimension_numbers = #tpu.dot_dimension_numbers<[1], [0], [0], [1], [0, 0, 1, 1], [], []>} : vector<16x64xf32>, vector<64x64xf32>, vector<16x64xf32> -> vector<16x64xf32>
      %435 = vector.extract_strided_slice %434 {offsets = [0, 0], sizes = [8, 64], strides = [1, 1]} : vector<16x64xf32> to vector<8x64xf32>
      %436 = arith.addf %435, %130 : vector<8x64xf32>
      %437 = vector.extract_strided_slice %434 {offsets = [8, 0], sizes = [8, 64], strides = [1, 1]} : vector<16x64xf32> to vector<8x64xf32>
      %438 = arith.addf %437, %132 : vector<8x64xf32>
      %439 = arith.maximumf %436, %438 : vector<8x64xf32>
      %440 = arith.subf %436, %439 : vector<8x64xf32>
      %441 = math.exp %440 : vector<8x64xf32>
      %442 = arith.subf %438, %439 : vector<8x64xf32>
      %443 = math.exp %442 : vector<8x64xf32>
      %444 = arith.addf %441, %443 : vector<8x64xf32>
      %445 = tpu.reciprocal %444 {approx = true} : vector<8x64xf32> -> vector<8x64xf32>
      %446 = arith.mulf %441, %445 : vector<8x64xf32>
      %447 = arith.mulf %446, %429 : vector<8x64xf32>
      %448 = arith.mulf %443, %445 : vector<8x64xf32>
      %449 = arith.mulf %448, %430 : vector<8x64xf32>
      %450 = arith.addf %447, %449 : vector<8x64xf32>
      %c0_180 = arith.constant 0 : index
      %c0_181 = arith.constant 0 : index
      %c0_182 = arith.constant 0 : index
      %451 = vector.load %arg17[%c0_180, %c0_181, %c0_182] : memref<2x64x64xf32, #tpu.memory_space<vmem>>, vector<1x64x64xf32>
      %452 = vector.shape_cast %451 : vector<1x64x64xf32> to vector<64x64xf32>
      %cst_183 = arith.constant dense<0.000000e+00> : vector<8x64xf32>
      %453 = tpu.matmul %450, %452, %cst_183 {dimension_numbers = #tpu.dot_dimension_numbers<[1], [0], [0], [1], [0, 0, 1, 1], [], []>} : vector<8x64xf32>, vector<64x64xf32>, vector<8x64xf32> -> vector<8x64xf32>
      %c0_184 = arith.constant 0 : index
      %c0_185 = arith.constant 0 : index
      %454 = vector.load %arg18[%c0_184, %c0_185] : memref<2x64xf32, #tpu.memory_space<vmem>>, vector<1x64xf32>
      %455 = vector.broadcast %454 : vector<1x64xf32> to vector<8x64xf32>
      %456 = arith.addf %453, %455 : vector<8x64xf32>
      %457 = arith.addf %395, %456 : vector<8x64xf32>
      %cst_186 = arith.constant dense<0.000000e+00> : vector<8xf32>
      %458 = vector.multi_reduction <add>, %457, %cst_186 [1] : vector<8x64xf32> to vector<8xf32>
      %459 = vector.shape_cast %458 : vector<8xf32> to vector<8x1xf32>
      %cst_187 = arith.constant 6.400000e+01 : f32
      %460 = vector.broadcast %cst_187 : f32 to vector<8x1xf32>
      %461 = arith.divf %459, %460 : vector<8x1xf32>
      %462 = vector.broadcast %461 : vector<8x1xf32> to vector<8x64xf32>
      %463 = arith.subf %457, %462 : vector<8x64xf32>
      %464 = arith.mulf %463, %463 : vector<8x64xf32>
      %cst_188 = arith.constant dense<0.000000e+00> : vector<8xf32>
      %465 = vector.multi_reduction <add>, %464, %cst_188 [1] : vector<8x64xf32> to vector<8xf32>
      %466 = vector.shape_cast %465 : vector<8xf32> to vector<8x1xf32>
      %cst_189 = arith.constant 0.0158730168 : f32
      %467 = vector.broadcast %cst_189 : f32 to vector<8x1xf32>
      %468 = arith.mulf %466, %467 : vector<8x1xf32>
      %469 = math.sqrt %468 : vector<8x1xf32>
      %cst_190 = arith.constant 9.99999997E-7 : f32
      %470 = vector.broadcast %cst_190 : f32 to vector<8x1xf32>
      %471 = arith.addf %469, %470 : vector<8x1xf32>
      %472 = tpu.reciprocal %471 {approx = true} : vector<8x1xf32> -> vector<8x1xf32>
      %473 = vector.broadcast %472 : vector<8x1xf32> to vector<8x64xf32>
      %474 = arith.mulf %463, %473 : vector<8x64xf32>
      %c2_191 = arith.constant 2 : index
      %c0_192 = arith.constant 0 : index
      %c0_193 = arith.constant 0 : index
      %475 = vector.load %arg19[%c2_191, %c0_192, %c0_193] : memref<4x64x128xf32, #tpu.memory_space<vmem>>, vector<1x64x128xf32>
      %476 = vector.shape_cast %475 : vector<1x64x128xf32> to vector<64x128xf32>
      %cst_194 = arith.constant dense<0.000000e+00> : vector<8x128xf32>
      %477 = tpu.matmul %474, %476, %cst_194 {dimension_numbers = #tpu.dot_dimension_numbers<[1], [0], [0], [1], [0, 0, 1, 1], [], []>} : vector<8x64xf32>, vector<64x128xf32>, vector<8x128xf32> -> vector<8x128xf32>
      %c2_195 = arith.constant 2 : index
      %c0_196 = arith.constant 0 : index
      %478 = vector.load %arg20[%c2_195, %c0_196] : memref<4x128xf32, #tpu.memory_space<vmem>>, vector<1x128xf32>
      %479 = vector.broadcast %478 : vector<1x128xf32> to vector<8x128xf32>
      %480 = arith.addf %477, %479 : vector<8x128xf32>
      %cst_197 = arith.constant 0.000000e+00 : f32
      %481 = vector.broadcast %cst_197 : f32 to vector<8x128xf32>
      %482 = arith.maximumf %480, %481 : vector<8x128xf32>
      %c2_198 = arith.constant 2 : index
      %c0_199 = arith.constant 0 : index
      %c0_200 = arith.constant 0 : index
      %483 = vector.load %arg21[%c2_198, %c0_199, %c0_200] : memref<4x128x64xf32, #tpu.memory_space<vmem>>, vector<1x128x64xf32>
      %484 = vector.shape_cast %483 : vector<1x128x64xf32> to vector<128x64xf32>
      %cst_201 = arith.constant dense<0.000000e+00> : vector<8x64xf32>
      %485 = tpu.matmul %482, %484, %cst_201 {dimension_numbers = #tpu.dot_dimension_numbers<[1], [0], [0], [1], [0, 0, 1, 1], [], []>} : vector<8x128xf32>, vector<128x64xf32>, vector<8x64xf32> -> vector<8x64xf32>
      %c2_202 = arith.constant 2 : index
      %c0_203 = arith.constant 0 : index
      %486 = vector.load %arg22[%c2_202, %c0_203] : memref<4x64xf32, #tpu.memory_space<vmem>>, vector<1x64xf32>
      %487 = vector.broadcast %486 : vector<1x64xf32> to vector<8x64xf32>
      %488 = arith.addf %485, %487 : vector<8x64xf32>
      %489 = arith.addf %457, %488 : vector<8x64xf32>
      %cst_204 = arith.constant dense<0.000000e+00> : vector<8xf32>
      %490 = vector.multi_reduction <add>, %489, %cst_204 [1] : vector<8x64xf32> to vector<8xf32>
      %491 = vector.shape_cast %490 : vector<8xf32> to vector<8x1xf32>
      %cst_205 = arith.constant 6.400000e+01 : f32
      %492 = vector.broadcast %cst_205 : f32 to vector<8x1xf32>
      %493 = arith.divf %491, %492 : vector<8x1xf32>
      %494 = vector.broadcast %493 : vector<8x1xf32> to vector<8x64xf32>
      %495 = arith.subf %489, %494 : vector<8x64xf32>
      %496 = arith.mulf %495, %495 : vector<8x64xf32>
      %cst_206 = arith.constant dense<0.000000e+00> : vector<8xf32>
      %497 = vector.multi_reduction <add>, %496, %cst_206 [1] : vector<8x64xf32> to vector<8xf32>
      %498 = vector.shape_cast %497 : vector<8xf32> to vector<8x1xf32>
      %cst_207 = arith.constant 0.0158730168 : f32
      %499 = vector.broadcast %cst_207 : f32 to vector<8x1xf32>
      %500 = arith.mulf %498, %499 : vector<8x1xf32>
      %501 = math.sqrt %500 : vector<8x1xf32>
      %cst_208 = arith.constant 9.99999997E-7 : f32
      %502 = vector.broadcast %cst_208 : f32 to vector<8x1xf32>
      %503 = arith.addf %501, %502 : vector<8x1xf32>
      %504 = tpu.reciprocal %503 {approx = true} : vector<8x1xf32> -> vector<8x1xf32>
      %505 = vector.broadcast %504 : vector<8x1xf32> to vector<8x64xf32>
      %506 = arith.mulf %495, %505 : vector<8x64xf32>
      %c1_209 = arith.constant 1 : index
      %c0_210 = arith.constant 0 : index
      %c0_211 = arith.constant 0 : index
      %507 = vector.load %arg11[%c1_209, %c0_210, %c0_211] : memref<2x64x64xf32, #tpu.memory_space<vmem>>, vector<1x64x64xf32>
      %508 = vector.shape_cast %507 : vector<1x64x64xf32> to vector<64x64xf32>
      %cst_212 = arith.constant dense<0.000000e+00> : vector<8x64xf32>
      %509 = tpu.matmul %506, %508, %cst_212 {dimension_numbers = #tpu.dot_dimension_numbers<[1], [0], [0], [1], [0, 0, 1, 1], [], []>} : vector<8x64xf32>, vector<64x64xf32>, vector<8x64xf32> -> vector<8x64xf32>
      %c1_213 = arith.constant 1 : index
      %c0_214 = arith.constant 0 : index
      %510 = vector.load %arg12[%c1_213, %c0_214] : memref<2x64xf32, #tpu.memory_space<vmem>>, vector<1x64xf32>
      %511 = vector.broadcast %510 : vector<1x64xf32> to vector<8x64xf32>
      %512 = arith.addf %509, %511 : vector<8x64xf32>
      %513 = arith.addf %489, %512 : vector<8x64xf32>
      %cst_215 = arith.constant dense<0.000000e+00> : vector<8xf32>
      %514 = vector.multi_reduction <add>, %513, %cst_215 [1] : vector<8x64xf32> to vector<8xf32>
      %515 = vector.shape_cast %514 : vector<8xf32> to vector<8x1xf32>
      %cst_216 = arith.constant 6.400000e+01 : f32
      %516 = vector.broadcast %cst_216 : f32 to vector<8x1xf32>
      %517 = arith.divf %515, %516 : vector<8x1xf32>
      %518 = vector.broadcast %517 : vector<8x1xf32> to vector<8x64xf32>
      %519 = arith.subf %513, %518 : vector<8x64xf32>
      %520 = arith.mulf %519, %519 : vector<8x64xf32>
      %cst_217 = arith.constant dense<0.000000e+00> : vector<8xf32>
      %521 = vector.multi_reduction <add>, %520, %cst_217 [1] : vector<8x64xf32> to vector<8xf32>
      %522 = vector.shape_cast %521 : vector<8xf32> to vector<8x1xf32>
      %cst_218 = arith.constant 0.0158730168 : f32
      %523 = vector.broadcast %cst_218 : f32 to vector<8x1xf32>
      %524 = arith.mulf %522, %523 : vector<8x1xf32>
      %525 = math.sqrt %524 : vector<8x1xf32>
      %cst_219 = arith.constant 9.99999997E-7 : f32
      %526 = vector.broadcast %cst_219 : f32 to vector<8x1xf32>
      %527 = arith.addf %525, %526 : vector<8x1xf32>
      %528 = tpu.reciprocal %527 {approx = true} : vector<8x1xf32> -> vector<8x1xf32>
      %529 = vector.broadcast %528 : vector<8x1xf32> to vector<8x64xf32>
      %530 = arith.mulf %519, %529 : vector<8x64xf32>
      %c1_220 = arith.constant 1 : index
      %c0_221 = arith.constant 0 : index
      %c0_222 = arith.constant 0 : index
      %531 = vector.load %arg13[%c1_220, %c0_221, %c0_222] : memref<2x64x64xf32, #tpu.memory_space<vmem>>, vector<1x64x64xf32>
      %532 = vector.shape_cast %531 : vector<1x64x64xf32> to vector<64x64xf32>
      %cst_223 = arith.constant dense<0.000000e+00> : vector<8x64xf32>
      %533 = tpu.matmul %530, %532, %cst_223 {dimension_numbers = #tpu.dot_dimension_numbers<[1], [0], [0], [1], [0, 0, 1, 1], [], []>} : vector<8x64xf32>, vector<64x64xf32>, vector<8x64xf32> -> vector<8x64xf32>
      %c1_224 = arith.constant 1 : index
      %c0_225 = arith.constant 0 : index
      %534 = vector.load %arg14[%c1_224, %c0_225] : memref<2x64xf32, #tpu.memory_space<vmem>>, vector<1x64xf32>
      %535 = vector.broadcast %534 : vector<1x64xf32> to vector<8x64xf32>
      %536 = arith.addf %533, %535 : vector<8x64xf32>
      %c1_226 = arith.constant 1 : index
      %c0_227 = arith.constant 0 : index
      %c0_228 = arith.constant 0 : index
      %537 = vector.load %arg15[%c1_226, %c0_227, %c0_228] : memref<2x64x256xf32, #tpu.memory_space<vmem>>, vector<1x64x256xf32>
      %538 = vector.shape_cast %537 : vector<1x64x256xf32> to vector<64x256xf32>
      %cst_229 = arith.constant dense<0.000000e+00> : vector<16x256xf32>
      %539 = tpu.matmul %369, %538, %cst_229 {dimension_numbers = #tpu.dot_dimension_numbers<[1], [0], [0], [1], [0, 0, 1, 1], [], []>} : vector<16x64xf32>, vector<64x256xf32>, vector<16x256xf32> -> vector<16x256xf32>
      %c1_230 = arith.constant 1 : index
      %c0_231 = arith.constant 0 : index
      %540 = vector.load %arg16[%c1_230, %c0_231] : memref<2x256xf32, #tpu.memory_space<vmem>>, vector<1x256xf32>
      %541 = vector.broadcast %540 : vector<1x256xf32> to vector<16x256xf32>
      %542 = arith.addf %539, %541 : vector<16x256xf32>
      %543 = vector.extract_strided_slice %542 {offsets = [0, 0], sizes = [16, 64], strides = [1, 1]} : vector<16x256xf32> to vector<16x64xf32>
      %544 = vector.extract_strided_slice %542 {offsets = [0, 128], sizes = [16, 64], strides = [1, 1]} : vector<16x256xf32> to vector<16x64xf32>
      %545 = vector.extract_strided_slice %543 {offsets = [0, 0], sizes = [8, 64], strides = [1, 1]} : vector<16x64xf32> to vector<8x64xf32>
      %546 = vector.extract_strided_slice %543 {offsets = [8, 0], sizes = [8, 64], strides = [1, 1]} : vector<16x64xf32> to vector<8x64xf32>
      %547 = vector.extract_strided_slice %544 {offsets = [0, 0], sizes = [8, 64], strides = [1, 1]} : vector<16x64xf32> to vector<8x64xf32>
      %548 = vector.extract_strided_slice %544 {offsets = [8, 0], sizes = [8, 64], strides = [1, 1]} : vector<16x64xf32> to vector<8x64xf32>
      %549 = arith.mulf %536, %545 : vector<8x64xf32>
      %550 = arith.mulf %536, %546 : vector<8x64xf32>
      %551 = tpu.concatenate %549, %550 in 0 : vector<8x64xf32>, vector<8x64xf32> -> vector<16x64xf32>
      %cst_232 = arith.constant dense<0.000000e+00> : vector<16x64xf32>
      %552 = tpu.matmul %551, %2, %cst_232 {dimension_numbers = #tpu.dot_dimension_numbers<[1], [0], [0], [1], [0, 0, 1, 1], [], []>} : vector<16x64xf32>, vector<64x64xf32>, vector<16x64xf32> -> vector<16x64xf32>
      %553 = vector.extract_strided_slice %552 {offsets = [0, 0], sizes = [8, 64], strides = [1, 1]} : vector<16x64xf32> to vector<8x64xf32>
      %554 = arith.addf %553, %130 : vector<8x64xf32>
      %555 = vector.extract_strided_slice %552 {offsets = [8, 0], sizes = [8, 64], strides = [1, 1]} : vector<16x64xf32> to vector<8x64xf32>
      %556 = arith.addf %555, %132 : vector<8x64xf32>
      %557 = arith.maximumf %554, %556 : vector<8x64xf32>
      %558 = arith.subf %554, %557 : vector<8x64xf32>
      %559 = math.exp %558 : vector<8x64xf32>
      %560 = arith.subf %556, %557 : vector<8x64xf32>
      %561 = math.exp %560 : vector<8x64xf32>
      %562 = arith.addf %559, %561 : vector<8x64xf32>
      %563 = tpu.reciprocal %562 {approx = true} : vector<8x64xf32> -> vector<8x64xf32>
      %564 = arith.mulf %559, %563 : vector<8x64xf32>
      %565 = arith.mulf %564, %547 : vector<8x64xf32>
      %566 = arith.mulf %561, %563 : vector<8x64xf32>
      %567 = arith.mulf %566, %548 : vector<8x64xf32>
      %568 = arith.addf %565, %567 : vector<8x64xf32>
      %c1_233 = arith.constant 1 : index
      %c0_234 = arith.constant 0 : index
      %c0_235 = arith.constant 0 : index
      %569 = vector.load %arg17[%c1_233, %c0_234, %c0_235] : memref<2x64x64xf32, #tpu.memory_space<vmem>>, vector<1x64x64xf32>
      %570 = vector.shape_cast %569 : vector<1x64x64xf32> to vector<64x64xf32>
      %cst_236 = arith.constant dense<0.000000e+00> : vector<8x64xf32>
      %571 = tpu.matmul %568, %570, %cst_236 {dimension_numbers = #tpu.dot_dimension_numbers<[1], [0], [0], [1], [0, 0, 1, 1], [], []>} : vector<8x64xf32>, vector<64x64xf32>, vector<8x64xf32> -> vector<8x64xf32>
      %c1_237 = arith.constant 1 : index
      %c0_238 = arith.constant 0 : index
      %572 = vector.load %arg18[%c1_237, %c0_238] : memref<2x64xf32, #tpu.memory_space<vmem>>, vector<1x64xf32>
      %573 = vector.broadcast %572 : vector<1x64xf32> to vector<8x64xf32>
      %574 = arith.addf %571, %573 : vector<8x64xf32>
      %575 = arith.addf %513, %574 : vector<8x64xf32>
      %cst_239 = arith.constant dense<0.000000e+00> : vector<8xf32>
      %576 = vector.multi_reduction <add>, %575, %cst_239 [1] : vector<8x64xf32> to vector<8xf32>
      %577 = vector.shape_cast %576 : vector<8xf32> to vector<8x1xf32>
      %cst_240 = arith.constant 6.400000e+01 : f32
      %578 = vector.broadcast %cst_240 : f32 to vector<8x1xf32>
      %579 = arith.divf %577, %578 : vector<8x1xf32>
      %580 = vector.broadcast %579 : vector<8x1xf32> to vector<8x64xf32>
      %581 = arith.subf %575, %580 : vector<8x64xf32>
      %582 = arith.mulf %581, %581 : vector<8x64xf32>
      %cst_241 = arith.constant dense<0.000000e+00> : vector<8xf32>
      %583 = vector.multi_reduction <add>, %582, %cst_241 [1] : vector<8x64xf32> to vector<8xf32>
      %584 = vector.shape_cast %583 : vector<8xf32> to vector<8x1xf32>
      %cst_242 = arith.constant 0.0158730168 : f32
      %585 = vector.broadcast %cst_242 : f32 to vector<8x1xf32>
      %586 = arith.mulf %584, %585 : vector<8x1xf32>
      %587 = math.sqrt %586 : vector<8x1xf32>
      %cst_243 = arith.constant 9.99999997E-7 : f32
      %588 = vector.broadcast %cst_243 : f32 to vector<8x1xf32>
      %589 = arith.addf %587, %588 : vector<8x1xf32>
      %590 = tpu.reciprocal %589 {approx = true} : vector<8x1xf32> -> vector<8x1xf32>
      %591 = vector.broadcast %590 : vector<8x1xf32> to vector<8x64xf32>
      %592 = arith.mulf %581, %591 : vector<8x64xf32>
      %c3_244 = arith.constant 3 : index
      %c0_245 = arith.constant 0 : index
      %c0_246 = arith.constant 0 : index
      %593 = vector.load %arg19[%c3_244, %c0_245, %c0_246] : memref<4x64x128xf32, #tpu.memory_space<vmem>>, vector<1x64x128xf32>
      %594 = vector.shape_cast %593 : vector<1x64x128xf32> to vector<64x128xf32>
      %cst_247 = arith.constant dense<0.000000e+00> : vector<8x128xf32>
      %595 = tpu.matmul %592, %594, %cst_247 {dimension_numbers = #tpu.dot_dimension_numbers<[1], [0], [0], [1], [0, 0, 1, 1], [], []>} : vector<8x64xf32>, vector<64x128xf32>, vector<8x128xf32> -> vector<8x128xf32>
      %c3_248 = arith.constant 3 : index
      %c0_249 = arith.constant 0 : index
      %596 = vector.load %arg20[%c3_248, %c0_249] : memref<4x128xf32, #tpu.memory_space<vmem>>, vector<1x128xf32>
      %597 = vector.broadcast %596 : vector<1x128xf32> to vector<8x128xf32>
      %598 = arith.addf %595, %597 : vector<8x128xf32>
      %cst_250 = arith.constant 0.000000e+00 : f32
      %599 = vector.broadcast %cst_250 : f32 to vector<8x128xf32>
      %600 = arith.maximumf %598, %599 : vector<8x128xf32>
      %c3_251 = arith.constant 3 : index
      %c0_252 = arith.constant 0 : index
      %c0_253 = arith.constant 0 : index
      %601 = vector.load %arg21[%c3_251, %c0_252, %c0_253] : memref<4x128x64xf32, #tpu.memory_space<vmem>>, vector<1x128x64xf32>
      %602 = vector.shape_cast %601 : vector<1x128x64xf32> to vector<128x64xf32>
      %cst_254 = arith.constant dense<0.000000e+00> : vector<8x64xf32>
      %603 = tpu.matmul %600, %602, %cst_254 {dimension_numbers = #tpu.dot_dimension_numbers<[1], [0], [0], [1], [0, 0, 1, 1], [], []>} : vector<8x128xf32>, vector<128x64xf32>, vector<8x64xf32> -> vector<8x64xf32>
      %c3_255 = arith.constant 3 : index
      %c0_256 = arith.constant 0 : index
      %604 = vector.load %arg22[%c3_255, %c0_256] : memref<4x64xf32, #tpu.memory_space<vmem>>, vector<1x64xf32>
      %605 = vector.broadcast %604 : vector<1x64xf32> to vector<8x64xf32>
      %606 = arith.addf %603, %605 : vector<8x64xf32>
      %607 = arith.addf %575, %606 : vector<8x64xf32>
      %c0_257 = arith.constant 0 : index
      %c0_258 = arith.constant 0 : index
      %608 = vector.load %arg23[%c0_257, %c0_258] : memref<1x64xf32, #tpu.memory_space<vmem>>, vector<1x64xf32>
      %cst_259 = arith.constant dense<0.000000e+00> : vector<8xf32>
      %609 = vector.multi_reduction <add>, %607, %cst_259 [1] : vector<8x64xf32> to vector<8xf32>
      %610 = vector.shape_cast %609 : vector<8xf32> to vector<8x1xf32>
      %cst_260 = arith.constant 6.400000e+01 : f32
      %611 = vector.broadcast %cst_260 : f32 to vector<8x1xf32>
      %612 = arith.divf %610, %611 : vector<8x1xf32>
      %613 = vector.broadcast %612 : vector<8x1xf32> to vector<8x64xf32>
      %614 = arith.subf %607, %613 : vector<8x64xf32>
      %615 = arith.mulf %614, %614 : vector<8x64xf32>
      %cst_261 = arith.constant dense<0.000000e+00> : vector<8xf32>
      %616 = vector.multi_reduction <add>, %615, %cst_261 [1] : vector<8x64xf32> to vector<8xf32>
      %617 = vector.shape_cast %616 : vector<8xf32> to vector<8x1xf32>
      %cst_262 = arith.constant 0.0158730168 : f32
      %618 = vector.broadcast %cst_262 : f32 to vector<8x1xf32>
      %619 = arith.mulf %617, %618 : vector<8x1xf32>
      %620 = math.sqrt %619 : vector<8x1xf32>
      %cst_263 = arith.constant 9.99999997E-7 : f32
      %621 = vector.broadcast %cst_263 : f32 to vector<8x1xf32>
      %622 = arith.addf %620, %621 : vector<8x1xf32>
      %623 = tpu.reciprocal %622 {approx = true} : vector<8x1xf32> -> vector<8x1xf32>
      %624 = vector.broadcast %623 : vector<8x1xf32> to vector<8x64xf32>
      %625 = arith.mulf %614, %624 : vector<8x64xf32>
      %626 = vector.broadcast %608 : vector<1x64xf32> to vector<8x64xf32>
      %627 = arith.mulf %626, %625 : vector<8x64xf32>
      %c0_264 = arith.constant 0 : index
      %c0_265 = arith.constant 0 : index
      %628 = vector.load %arg24[%c0_264, %c0_265] : memref<1x64xf32, #tpu.memory_space<vmem>>, vector<1x64xf32>
      %629 = vector.broadcast %628 : vector<1x64xf32> to vector<8x64xf32>
      %630 = arith.addf %627, %629 : vector<8x64xf32>
      %c8_i32_266 = arith.constant 8 : i32
      %631 = arith.muli %20, %c8_i32_266 : i32
      %c8_i32_267 = arith.constant 8 : i32
      %632 = arith.addi %c8_i32_267, %631 : i32
      %633 = tpu.assume_multiple %632, 8 : i32
      %634 = arith.index_cast %633 : i32 to index
      %c0_268 = arith.constant 0 : index
      %635 = vector.load %arg28[%634, %c0_268] : memref<24x64xf32, #tpu.memory_space<vmem>>, vector<8x64xf32>
      tpu.vector_store %arg28[%634, %c0_268], %630 {strides = array<i32>} : memref<24x64xf32, #tpu.memory_space<vmem>>, vector<8x64xf32>,
    }
    %c2_i32_5 = arith.constant 2 : i32
    %c16 = arith.constant 16 : index
    %c0_6 = arith.constant 0 : index
    %4 = vector.load %arg28[%c16, %c0_6] : memref<24x64xf32, #tpu.memory_space<vmem>>, vector<1x64xf32>
    %c0_7 = arith.constant 0 : index
    %c0_8 = arith.constant 0 : index
    %5 = vector.load %arg25[%c0_7, %c0_8] : memref<64x4xf32, #tpu.memory_space<vmem>>, vector<64x4xf32>
    %cst = arith.constant dense<0.000000e+00> : vector<1x4xf32>
    %6 = tpu.matmul %4, %5, %cst {dimension_numbers = #tpu.dot_dimension_numbers<[1], [0], [0], [1], [0, 0, 1, 1], [], []>} : vector<1x64xf32>, vector<64x4xf32>, vector<1x4xf32> -> vector<1x4xf32>
    %c0_9 = arith.constant 0 : index
    %c0_10 = arith.constant 0 : index
    %7 = vector.load %arg26[%c0_9, %c0_10] : memref<1x4xf32, #tpu.memory_space<vmem>>, vector<1x4xf32>
    %8 = arith.addf %6, %7 : vector<1x4xf32>
    %cst_11 = arith.constant dense<0xFF800000> : vector<1xf32>
    %9 = vector.multi_reduction <maximumf>, %8, %cst_11 [1] : vector<1x4xf32> to vector<1xf32>
    %10 = vector.shape_cast %9 : vector<1xf32> to vector<1x1xf32>
    %11 = vector.broadcast %10 : vector<1x1xf32> to vector<1x4xf32>
    %12 = arith.subf %8, %11 : vector<1x4xf32>
    %13 = math.exp %12 : vector<1x4xf32>
    %cst_12 = arith.constant dense<0.000000e+00> : vector<1xf32>
    %14 = vector.multi_reduction <add>, %13, %cst_12 [1] : vector<1x4xf32> to vector<1xf32>
    %15 = vector.shape_cast %14 : vector<1xf32> to vector<1x1xf32>
    %16 = vector.broadcast %15 : vector<1x1xf32> to vector<1x4xf32>
    %17 = arith.divf %13, %16 : vector<1x4xf32>
    %c0_13 = arith.constant 0 : index
    %c0_14 = arith.constant 0 : index
    %18 = vector.load %arg27[%c0_13, %c0_14] : memref<1x4xf32, #tpu.memory_space<vmem>>, vector<1x4xf32>
    tpu.vector_store %arg27[%c0_13, %c0_14], %17 {strides = array<i32>} : memref<1x4xf32, #tpu.memory_space<vmem>>, vector<1x4xf32>,
    return
  }
  func.func @transform_0(%arg0: i32, %arg1: memref<32xi32, #tpu.memory_space<smem>>) -> (i32, i32) {
    %c0_i32 = arith.constant 0 : i32
    %c0_i32_0 = arith.constant 0 : i32
    %c0_i32_1 = arith.constant 0 : i32
    return %c0_i32, %c0_i32_0 : i32, i32
  }
  func.func @transform_1(%arg0: i32, %arg1: memref<32xi32, #tpu.memory_space<smem>>) -> (i32, i32) {
    %c0_i32 = arith.constant 0 : i32
    %c0_i32_0 = arith.constant 0 : i32
    %c0_i32_1 = arith.constant 0 : i32
    return %c0_i32, %c0_i32_0 : i32, i32
  }
  func.func @transform_2(%arg0: i32, %arg1: memref<32xi32, #tpu.memory_space<smem>>) -> (i32, i32) {
    %c0_i32 = arith.constant 0 : i32
    %c0_i32_0 = arith.constant 0 : i32
    %c0_i32_1 = arith.constant 0 : i32
    return %c0_i32, %c0_i32_0 : i32, i32
  }
  func.func @transform_3(%arg0: i32, %arg1: memref<32xi32, #tpu.memory_space<smem>>) -> (i32, i32) {
    %c0_i32 = arith.constant 0 : i32
    %c0_i32_0 = arith.constant 0 : i32
    %c0_i32_1 = arith.constant 0 : i32
    return %c0_i32, %c0_i32_0 : i32, i32
  }
  func.func @transform_4(%arg0: i32, %arg1: memref<32xi32, #tpu.memory_space<smem>>) -> (i32, i32) {
    %c0_i32 = arith.constant 0 : i32
    %c0_i32_0 = arith.constant 0 : i32
    %c0_i32_1 = arith.constant 0 : i32
    return %c0_i32, %c0_i32_0 : i32, i32
  }
  func.func @transform_5(%arg0: i32, %arg1: memref<32xi32, #tpu.memory_space<smem>>) -> (i32, i32, i32) {
    %c0_i32 = arith.constant 0 : i32
    %c0_i32_0 = arith.constant 0 : i32
    %c0_i32_1 = arith.constant 0 : i32
    %c0_i32_2 = arith.constant 0 : i32
    return %c0_i32, %c0_i32_0, %c0_i32_1 : i32, i32, i32
  }
  func.func @transform_6(%arg0: i32, %arg1: memref<32xi32, #tpu.memory_space<smem>>) -> (i32, i32) {
    %c0_i32 = arith.constant 0 : i32
    %c0_i32_0 = arith.constant 0 : i32
    %c0_i32_1 = arith.constant 0 : i32
    return %c0_i32, %c0_i32_0 : i32, i32
  }
  func.func @transform_7(%arg0: i32, %arg1: memref<32xi32, #tpu.memory_space<smem>>) -> (i32, i32, i32) {
    %c0_i32 = arith.constant 0 : i32
    %c0_i32_0 = arith.constant 0 : i32
    %c0_i32_1 = arith.constant 0 : i32
    %c0_i32_2 = arith.constant 0 : i32
    return %c0_i32, %c0_i32_0, %c0_i32_1 : i32, i32, i32
  }
  func.func @transform_8(%arg0: i32, %arg1: memref<32xi32, #tpu.memory_space<smem>>) -> (i32, i32) {
    %c0_i32 = arith.constant 0 : i32
    %c0_i32_0 = arith.constant 0 : i32
    %c0_i32_1 = arith.constant 0 : i32
    return %c0_i32, %c0_i32_0 : i32, i32
  }
  func.func @transform_9(%arg0: i32, %arg1: memref<32xi32, #tpu.memory_space<smem>>) -> (i32, i32, i32) {
    %c0_i32 = arith.constant 0 : i32
    %c0_i32_0 = arith.constant 0 : i32
    %c0_i32_1 = arith.constant 0 : i32
    %c0_i32_2 = arith.constant 0 : i32
    return %c0_i32, %c0_i32_0, %c0_i32_1 : i32, i32, i32
  }
  func.func @transform_10(%arg0: i32, %arg1: memref<32xi32, #tpu.memory_space<smem>>) -> (i32, i32) {
    %c0_i32 = arith.constant 0 : i32
    %c0_i32_0 = arith.constant 0 : i32
    %c0_i32_1 = arith.constant 0 : i32
    return %c0_i32, %c0_i32_0 : i32, i32
  }
  func.func @transform_11(%arg0: i32, %arg1: memref<32xi32, #tpu.memory_space<smem>>) -> (i32, i32, i32) {
    %c0_i32 = arith.constant 0 : i32
    %c0_i32_0 = arith.constant 0 : i32
    %c0_i32_1 = arith.constant 0 : i32
    %c0_i32_2 = arith.constant 0 : i32
    return %c0_i32, %c0_i32_0, %c0_i32_1 : i32, i32, i32
  }
  func.func @transform_12(%arg0: i32, %arg1: memref<32xi32, #tpu.memory_space<smem>>) -> (i32, i32) {
    %c0_i32 = arith.constant 0 : i32
    %c0_i32_0 = arith.constant 0 : i32
    %c0_i32_1 = arith.constant 0 : i32
    return %c0_i32, %c0_i32_0 : i32, i32
  }
  func.func @transform_13(%arg0: i32, %arg1: memref<32xi32, #tpu.memory_space<smem>>) -> (i32, i32, i32) {
    %c0_i32 = arith.constant 0 : i32
    %c0_i32_0 = arith.constant 0 : i32
    %c0_i32_1 = arith.constant 0 : i32
    %c0_i32_2 = arith.constant 0 : i32
    return %c0_i32, %c0_i32_0, %c0_i32_1 : i32, i32, i32
  }
  func.func @transform_14(%arg0: i32, %arg1: memref<32xi32, #tpu.memory_space<smem>>) -> (i32, i32) {
    %c0_i32 = arith.constant 0 : i32
    %c0_i32_0 = arith.constant 0 : i32
    %c0_i32_1 = arith.constant 0 : i32
    return %c0_i32, %c0_i32_0 : i32, i32
  }
  func.func @transform_15(%arg0: i32, %arg1: memref<32xi32, #tpu.memory_space<smem>>) -> (i32, i32, i32) {
    %c0_i32 = arith.constant 0 : i32
    %c0_i32_0 = arith.constant 0 : i32
    %c0_i32_1 = arith.constant 0 : i32
    %c0_i32_2 = arith.constant 0 : i32
    return %c0_i32, %c0_i32_0, %c0_i32_1 : i32, i32, i32
  }
  func.func @transform_16(%arg0: i32, %arg1: memref<32xi32, #tpu.memory_space<smem>>) -> (i32, i32) {
    %c0_i32 = arith.constant 0 : i32
    %c0_i32_0 = arith.constant 0 : i32
    %c0_i32_1 = arith.constant 0 : i32
    return %c0_i32, %c0_i32_0 : i32, i32
  }
  func.func @transform_17(%arg0: i32, %arg1: memref<32xi32, #tpu.memory_space<smem>>) -> (i32, i32, i32) {
    %c0_i32 = arith.constant 0 : i32
    %c0_i32_0 = arith.constant 0 : i32
    %c0_i32_1 = arith.constant 0 : i32
    %c0_i32_2 = arith.constant 0 : i32
    return %c0_i32, %c0_i32_0, %c0_i32_1 : i32, i32, i32
  }
  func.func @transform_18(%arg0: i32, %arg1: memref<32xi32, #tpu.memory_space<smem>>) -> (i32, i32) {
    %c0_i32 = arith.constant 0 : i32
    %c0_i32_0 = arith.constant 0 : i32
    %c0_i32_1 = arith.constant 0 : i32
    return %c0_i32, %c0_i32_0 : i32, i32
  }
  func.func @transform_19(%arg0: i32, %arg1: memref<32xi32, #tpu.memory_space<smem>>) -> (i32, i32, i32) {
    %c0_i32 = arith.constant 0 : i32
    %c0_i32_0 = arith.constant 0 : i32
    %c0_i32_1 = arith.constant 0 : i32
    %c0_i32_2 = arith.constant 0 : i32
    return %c0_i32, %c0_i32_0, %c0_i32_1 : i32, i32, i32
  }
  func.func @transform_20(%arg0: i32, %arg1: memref<32xi32, #tpu.memory_space<smem>>) -> (i32, i32) {
    %c0_i32 = arith.constant 0 : i32
    %c0_i32_0 = arith.constant 0 : i32
    %c0_i32_1 = arith.constant 0 : i32
    return %c0_i32, %c0_i32_0 : i32, i32
  }
  func.func @transform_21(%arg0: i32, %arg1: memref<32xi32, #tpu.memory_space<smem>>) -> (i32, i32) {
    %c0_i32 = arith.constant 0 : i32
    %c0_i32_0 = arith.constant 0 : i32
    %c0_i32_1 = arith.constant 0 : i32
    return %c0_i32, %c0_i32_0 : i32, i32
  }
  func.func @transform_22(%arg0: i32, %arg1: memref<32xi32, #tpu.memory_space<smem>>) -> (i32, i32) {
    %c0_i32 = arith.constant 0 : i32
    %c0_i32_0 = arith.constant 0 : i32
    %c0_i32_1 = arith.constant 0 : i32
    return %c0_i32, %c0_i32_0 : i32, i32
  }
  func.func @transform_23(%arg0: i32, %arg1: memref<32xi32, #tpu.memory_space<smem>>) -> (i32, i32) {
    %c0_i32 = arith.constant 0 : i32
    %c0_i32_0 = arith.constant 0 : i32
    %c0_i32_1 = arith.constant 0 : i32
    return %c0_i32, %c0_i32_0 : i32, i32
  }
  func.func @transform_24(%arg0: i32, %arg1: memref<32xi32, #tpu.memory_space<smem>>) -> (i32, i32) {
    %c0_i32 = arith.constant 0 : i32
    %c0_i32_0 = arith.constant 0 : i32
    %c0_i32_1 = arith.constant 0 : i32
    return %c0_i32, %c0_i32_0 : i32, i32
  }
  func.func @transform_25(%arg0: i32, %arg1: memref<32xi32, #tpu.memory_space<smem>>) -> (i32, i32) {
    %c0_i32 = arith.constant 0 : i32
    %c0_i32_0 = arith.constant 0 : i32
    %c0_i32_1 = arith.constant 0 : i32
    return %c0_i32, %c0_i32_0 : i32, i32
  }
}

</mosaic_0001>

<bundles_post_ra>
// kernel: tpu_custom_call.1
= control target key start
LH: loop header
LB: loop body
LE: loop exit
PB: predicated region body
PF: predicated region fallthrough
CT: control target
= control target key end

     0   :  { %s6812_s0 = inlined_call_operand.vmem [shape: s32[32], index: 0, kind: input, shape index: {}]   ;;  %s6813_s1 = inlined_call_operand.hbm [shape: f32[4,64], index: 1, kind: input, shape index: {}]   ;;  %s6814_s2 = inlined_call_operand.hbm [shape: f32[16,64], index: 2, kind: input, shape index: {}]   ;;  %s6815_s3 = inlined_call_operand.hbm [shape: f32[16,64], index: 3, kind: input, shape index: {}]   ;;  %s6816_s4 = inlined_call_operand.hbm [shape: f32[16,64], index: 4, kind: input, shape index: {}]   ;;  %s6817_s5 = inlined_call_operand.hbm [shape: f32[64,64], index: 5, kind: input, shape index: {}]   ;;  %s6818_s6 = inlined_call_operand.vmem [shape: f32[2,64,384], index: 6, kind: input, shape index: {}]   ;;  %s6819_s7 = inlined_call_operand.vmem [shape: f32[2,384], index: 7, kind: input, shape index: {}]   ;;  %s6820_s8 = inlined_call_operand.hbm [shape: f32[2,64,64], index: 8, kind: input, shape index: {}]   ;;  %s6821_s9 = inlined_call_operand.hbm [shape: f32[2,64], index: 9, kind: input, shape index: {}]   ;;  %s6822_s10 = inlined_call_operand.hbm [shape: f32[2,64,64], index: 10, kind: input, shape index: {}]   ;;  %s6823_s11 = inlined_call_operand.hbm [shape: f32[2,64], index: 11, kind: input, shape index: {}]   ;;  %s6824_s12 = inlined_call_operand.hbm [shape: f32[2,64,64], index: 12, kind: input, shape index: {}]   ;;  %s6825_s13 = inlined_call_operand.hbm [shape: f32[2,64], index: 13, kind: input, shape index: {}]   ;;  %s6826_s14 = inlined_call_operand.vmem [shape: f32[2,64,256], index: 14, kind: input, shape index: {}]   ;;  %s6827_s15 = inlined_call_operand.hbm [shape: f32[2,256], index: 15, kind: input, shape index: {}]   ;;  %s6828_s16 = inlined_call_operand.hbm [shape: f32[2,64,64], index: 16, kind: input, shape index: {}]   ;;  %s6829_s17 = inlined_call_operand.hbm [shape: f32[2,64], index: 17, kind: input, shape index: {}]   ;;  %s6830_s18 = inlined_call_operand.vmem [shape: f32[4,64,128], index: 18, kind: input, shape index: {}]   ;;  %s6831_s19 = inlined_call_operand.hbm [shape: f32[4,128], index: 19, kind: input, shape index: {}]   ;;  %s6832_s20 = inlined_call_operand.vmem [shape: f32[4,128,64], index: 20, kind: input, shape index: {}]   ;;  %s6833_s21 = inlined_call_operand.vmem [shape: f32[4,64], index: 21, kind: input, shape index: {}]   ;;  %s6834_s22 = inlined_call_operand.vmem [shape: f32[1,64], index: 22, kind: input, shape index: {}]   ;;  %s6835_s23 = inlined_call_operand.vmem [shape: f32[1,64], index: 23, kind: input, shape index: {}]   ;;  %s6836_s24 = inlined_call_operand.vmem [shape: f32[64,4], index: 24, kind: input, shape index: {}]   ;;  %s6837_s25 = inlined_call_operand.vmem [shape: f32[1,4], index: 25, kind: input, shape index: {}]   ;;  %s6838_s26 = inlined_call_operand.hbm [shape: f32[1,4], index: 26, kind: output, shape index: {}]  }
   0x1   :  { %6851 = sst [smem:[#allocation41_spill]] %s6812_s0 }
   0x2   :  { %6852 = sst [smem:[#allocation42_spill]] %s6813_s1 }
   0x3   :  { %6853 = sst [smem:[#allocation43_spill]] %s6814_s2 }
   0x4   :  { %6854 = sst [smem:[#allocation44_spill]] %s6815_s3 }
   0x5   :  { %6855 = sst [smem:[#allocation45_spill]] %s6816_s4 }
   0x6   :  { %6856 = sst [smem:[#allocation46_spill]] %s6817_s5 }
   0x7   :  { %6857 = sst [smem:[#allocation47_spill]] %s6818_s6 }
   0x8   :  { %6858 = sst [smem:[#allocation48_spill]] %s6819_s7  ;;  %s6865_s7 = sld [smem:[#allocation41_spill]] }
   0x9   :  { %6859 = sst [smem:[#allocation49_spill]] %s6820_s8 }
   0xa   :  { %6860 = sst [smem:[#allocation50_spill]] %s6821_s9 }
   0xb   :  { %6861 = sst [smem:[#allocation51_spill]] %s6822_s10 }
   0xc   :  { %6862 = sst [smem:[#allocation52_spill]] %s6826_s14 }
   0xd   :  { %6863 = sst [smem:[#allocation53_spill]] %s6837_s25 }
   0xe   :  { %6864 = sst [smem:[#allocation54_spill]] %s6838_s26  ;;  %s31_s14 = sshll.u32 %s6865_s7, 4  ;;  %s32_s14 = int_to_ptr.vmem [resolvable:$true] %s31_s14 }
   0xf   :  { %s4969_s28 = scalar_lea.vmem %s32_s14, 16  ;;  %p4974_p1 = scmp.lt.s32.totalorder %s32_s14, %s32_s14 }
  0x10   :  { %p4970_p0 = scmp.ne.s32.totalorder %s32_s14, %s4969_s28  ;;  %p4975_p2 = scmp.lt.s32.totalorder %s4969_s28, %s4969_s28 }
  0x12   :  { %p4976_p3 = por %p4975_p2, %p4974_p1 }
  0x14   :  { %p4977_p4 = pnand %p4976_p3, %p4970_p0 }
  0x16   :  { %4980 = shalt.err (!%p4977_p4)  }
  0x17   :  { %s5361_s8 = smov [#allocation5]  }
  0x18   :  { %34 = dma.vmem_to_smem %s32_s14, 16, %s5361_s8, [#allocation4] }
  0x19   :  { %5337 = dma.done.wait [#allocation4], 16 }
  0x1a   :  { %5338 = vsyncadd [#allocation4], 4294967280 }
  0x1b   :  { %36 = sfence }
  0x1c   :  { %37 = vsyncpa [#allocation7], 0 }
  0x1d   :  { %38 = vsyncpa [#allocation10], 0 }
  0x1e   :  { %39 = vsyncpa [#allocation13], 0 }
  0x1f   :  { %40 = vsyncpa [#allocation16], 0 }
  0x20   :  { %41 = vsyncpa [#allocation19], 0 }
  0x21   :  { %42 = vsyncpa [#allocation22], 0 }
  0x22   :  { %43 = vsyncpa [#allocation25], 0 }
  0x23   :  { %44 = vsyncpa [#allocation28], 0 }
  0x24   :  { %45 = vsyncpa [#allocation8], 0  ;;  %s5362_s4 = smov [#allocation9]   ;;  %s6866_s30 = sld [smem:[#allocation43_spill]] }
  0x25   :  { %s61_s29 = sshll.u32 %s5362_s4, 4  ;;  %s62_s29 = int_to_ptr.vmem [resolvable:$true] %s61_s29 }
  0x2a   :  { %s4981_s2 = scalar_lea.hbm %s6866_s30, 256 }
  0x2b   :  { %p4982_p5 = scmp.ne.s32.totalorder %s6866_s30, %s4981_s2  ;;  %p4985_p6 = scmp.lt.u32.totalorder %s4981_s2, %s6866_s30 }
  0x2d   :  { %p4987_p7 = pnand %p4985_p6, %p4982_p5 }
  0x2f   :  { %4990 = shalt.err (!%p4987_p7)
}
  0x30   :  { %s4991_s1 = scalar_lea.vmem %s62_s29, 256  ;;  %p4996_p9 = scmp.lt.s32.totalorder %s62_s29, %s62_s29 }
  0x31   :  { %p4992_p8 = scmp.ne.s32.totalorder %s62_s29, %s4991_s1  ;;  %p4997_p10 = scmp.lt.s32.totalorder %s4991_s1, %s4991_s1 }
  0x33   :  { %p4998_p11 = por %p4997_p10, %p4996_p9 }
  0x35   :  { %p4999_p12 = pnand %p4998_p11, %p4992_p8 }
  0x37   :  { %5002 = shalt.err (!%p4999_p12)
}
  0x38   :  { %s5363_s27 = smov 128   ;;  %s5364_s3 = smov 8  }
  0x39   :  { %67 = dma.hbm_to_vmem [thread:$0]  %s6866_s30, 256, %s62_s29, [#allocation10], %s5363_s27, %s5363_s27, %s5364_s3  }
  0x3a   :  { %s5365_s8 = smov [#allocation12]   ;;  %s5366_s0 = smov [#allocation15]  }
  0x3b   :  { %s85_s4 = sshll.u32 %s5365_s8, 4  ;;  %s113_s9 = sshll.u32 %s5366_s0, 4  ;;  %s86_s4 = int_to_ptr.vmem [resolvable:$true] %s85_s4  ;;  %s114_s9 = int_to_ptr.vmem [resolvable:$true] %s113_s9 }
  0x3c   :  { %s6867_s5 = sld [smem:[#allocation45_spill]] }
  0x42   :  { %s5003_s10 = scalar_lea.hbm %s6867_s5, 256 }
  0x43   :  { %p5004_p13 = scmp.ne.s32.totalorder %s6867_s5, %s5003_s10  ;;  %p5007_p0 = scmp.lt.u32.totalorder %s5003_s10, %s6867_s5 }
  0x45   :  { %p5009_p1 = pnand %p5007_p0, %p5004_p13 }
  0x47   :  { %5012 = shalt.err (!%p5009_p1)
}
  0x48   :  { %s5013_s29 = scalar_lea.vmem %s86_s4, 256  ;;  %p5018_p3 = scmp.lt.s32.totalorder %s86_s4, %s86_s4 }
  0x49   :  { %p5014_p2 = scmp.ne.s32.totalorder %s86_s4, %s5013_s29  ;;  %p5019_p4 = scmp.lt.s32.totalorder %s5013_s29, %s5013_s29 }
  0x4b   :  { %p5020_p5 = por %p5019_p4, %p5018_p3 }
  0x4d   :  { %p5021_p6 = pnand %p5020_p5, %p5014_p2 }
  0x4f   :  { %5024 = shalt.err (!%p5021_p6)
}
  0x50   :  { %91 = dma.hbm_to_vmem [thread:$0]  %s6867_s5, 256, %s86_s4, [#allocation13], %s5363_s27, %s5363_s27, %s5364_s3  }
  0x51   :  { %s6868_s26 = sld [smem:[#allocation49_spill]] }
  0x57   :  { %s5025_s8 = scalar_lea.hbm %s6868_s26, 2048 }
  0x58   :  { %p5026_p7 = scmp.ne.s32.totalorder %s6868_s26, %s5025_s8  ;;  %p5029_p8 = scmp.lt.u32.totalorder %s5025_s8, %s6868_s26 }
  0x5a   :  { %p5031_p9 = pnand %p5029_p8, %p5026_p7 }
  0x5c   :  { %5034 = shalt.err (!%p5031_p9)
}
  0x5d   :  { %s5035_s6 = scalar_lea.vmem %s114_s9, 2048  ;;  %p5040_p11 = scmp.lt.s32.totalorder %s114_s9, %s114_s9 }
  0x5e   :  { %p5036_p10 = scmp.ne.s32.totalorder %s114_s9, %s5035_s6  ;;  %p5041_p12 = scmp.lt.s32.totalorder %s5035_s6, %s5035_s6 }
  0x60   :  { %p5042_p13 = por %p5041_p12, %p5040_p11 }
  0x62   :  { %p5043_p0 = pnand %p5042_p13, %p5036_p10 }
  0x64   :  { %5046 = shalt.err (!%p5043_p0)
}
  0x65   :  { %119 = dma.hbm_to_vmem [thread:$0]  %s6868_s26, 2048, %s114_s9, [#allocation16], %s5363_s27, %s5363_s27, %s5364_s3  }
  0x66   :  { %s5367_s1 = smov [#allocation18]   ;;  %s5368_s30 = smov [#allocation21]  }
  0x67   :  { %s135_s29 = sshll.u32 %s5367_s1, 4  ;;  %s157_s7 = sshll.u32 %s5368_s30, 4  ;;  %s136_s29 = int_to_ptr.vmem [resolvable:$true] %s135_s29  ;;  %s158_s7 = int_to_ptr.vmem [resolvable:$true] %s157_s7 }
  0x68   :  { %s6869_s8 = sld [smem:[#allocation51_spill]] }
  0x6e   :  { %s5047_s0 = scalar_lea.hbm %s6869_s8, 2048 }
  0x6f   :  { %p5048_p1 = scmp.ne.s32.totalorder %s6869_s8, %s5047_s0  ;;  %p5051_p2 = scmp.lt.u32.totalorder %s5047_s0, %s6869_s8 }
  0x71   :  { %p5053_p3 = pnand %p5051_p2, %p5048_p1 }
  0x73   :  { %5056 = shalt.err (!%p5053_p3)
}
  0x74   :  { %s5057_s9 = scalar_lea.vmem %s136_s29, 2048  ;;  %p5062_p5 = scmp.lt.s32.totalorder %s136_s29, %s136_s29 }
  0x75   :  { %p5058_p4 = scmp.ne.s32.totalorder %s136_s29, %s5057_s9  ;;  %p5063_p6 = scmp.lt.s32.totalorder %s5057_s9, %s5057_s9 }
  0x77   :  { %p5064_p7 = por %p5063_p6, %p5062_p5 }
  0x79   :  { %p5065_p8 = pnand %p5064_p7, %p5058_p4 }
  0x7b   :  { %5068 = shalt.err (!%p5065_p8)
}
  0x7c   :  { %141 = dma.hbm_to_vmem [thread:$0]  %s6869_s8, 2048, %s136_s29, [#allocation19], %s5363_s27, %s5363_s27, %s5364_s3  }
  0x7d   :  { %s5069_s30 = scalar_lea.hbm %s6824_s12, 2048 }
  0x7e   :  { %p5070_p9 = scmp.ne.s32.totalorder %s6824_s12, %s5069_s30  ;;  %p5073_p10 = scmp.lt.u32.totalorder %s5069_s30, %s6824_s12 }
  0x80   :  { %p5075_p11 = pnand %p5073_p10, %p5070_p9 }
  0x82   :  { %5078 = shalt.err (!%p5075_p11)
}
  0x83   :  { %s5079_s14 = scalar_lea.vmem %s158_s7, 2048  ;;  %p5084_p13 = scmp.lt.s32.totalorder %s158_s7, %s158_s7 }
  0x84   :  { %p5080_p12 = scmp.ne.s32.totalorder %s158_s7, %s5079_s14  ;;  %p5085_p0 = scmp.lt.s32.totalorder %s5079_s14, %s5079_s14 }
  0x86   :  { %p5086_p1 = por %p5085_p0, %p5084_p13 }
  0x88   :  { %p5087_p2 = pnand %p5086_p1, %p5080_p12 }
  0x8a   :  { %5090 = shalt.err (!%p5087_p2)
}
  0x8b   :  { %163 = dma.hbm_to_vmem [thread:$0]  %s6824_s12, 2048, %s158_s7, [#allocation22], %s5363_s27, %s5363_s27, %s5364_s3  }
  0x8c   :  { %s5369_s10 = smov [#allocation24]   ;;  %s5370_s9 = smov [#allocation27]  }
  0x8d   :  { %s182_s6 = sshll.u32 %s5369_s10, 4  ;;  %s204_s26 = sshll.u32 %s5370_s9, 4  ;;  %s183_s6 = int_to_ptr.vmem [resolvable:$true] %s182_s6  ;;  %s205_s26 = int_to_ptr.vmem [resolvable:$true] %s204_s26 }
  0x8e   :  { %s5091_s1 = scalar_lea.hbm %s6827_s15, 64 }
  0x8f   :  { %p5092_p3 = scmp.ne.s32.totalorder %s6827_s15, %s5091_s1  ;;  %p5095_p4 = scmp.lt.u32.totalorder %s5091_s1, %s6827_s15 }
  0x91   :  { %p5097_p5 = pnand %p5095_p4, %p5092_p3 }
  0x93   :  { %5100 = shalt.err (!%p5097_p5)
}
  0x94   :  { %s5101_s12 = scalar_lea.vmem %s183_s6, 64  ;;  %p5106_p7 = scmp.lt.s32.totalorder %s183_s6, %s183_s6 }
  0x95   :  { %p5102_p6 = scmp.ne.s32.totalorder %s183_s6, %s5101_s12  ;;  %p5107_p8 = scmp.lt.s32.totalorder %s5101_s12, %s5101_s12 }
  0x97   :  { %p5108_p9 = por %p5107_p8, %p5106_p7 }
  0x99   :  { %p5109_p10 = pnand %p5108_p9, %p5102_p6 }
  0x9b   :  { %5112 = shalt.err (!%p5109_p10)
}
  0x9c   :  { %185 = dma.hbm_to_vmem [thread:$0]  %s6827_s15, 64, %s183_s6, [#allocation25]  }
  0x9d   :  { %s5113_s8 = scalar_lea.hbm %s6829_s17, 32 }
  0x9e   :  { %p5114_p11 = scmp.ne.s32.totalorder %s6829_s17, %s5113_s8  ;;  %p5117_p12 = scmp.lt.u32.totalorder %s5113_s8, %s6829_s17 }
  0xa0   :  { %p5119_p13 = pnand %p5117_p12, %p5114_p11 }
  0xa2   :  { %5122 = shalt.err (!%p5119_p13)
}
  0xa3   :  { %s5123_s1 = scalar_lea.vmem %s205_s26, 32  ;;  %p5128_p1 = scmp.lt.s32.totalorder %s205_s26, %s205_s26 }
  0xa4   :  { %p5124_p0 = scmp.ne.s32.totalorder %s205_s26, %s5123_s1  ;;  %p5129_p2 = scmp.lt.s32.totalorder %s5123_s1, %s5123_s1 }
  0xa6   :  { %p5130_p3 = por %p5129_p2, %p5128_p1 }
  0xa8   :  { %p5131_p4 = pnand %p5130_p3, %p5124_p0 }
  0xaa   :  { %5134 = shalt.err (!%p5131_p4)
}
  0xab   :  { %207 = dma.hbm_to_vmem [thread:$0]  %s6829_s17, 32, %s205_s26, [#allocation28]  }
  0xac   :  { %s5371_s30 = smov [#allocation6]   ;;  %s5372_s25 = smov [#allocation11]  }
  0xad   :  { %s52_s28 = sshll.u32 %s5371_s30, 4  ;;  %s73_s0 = sshll.u32 %s5372_s25, 4  ;;  %s53_s28 = int_to_ptr.vmem [resolvable:$true] %s52_s28  ;;  %s74_s0 = int_to_ptr.vmem [resolvable:$true] %s73_s0 }
  0xae   :  { %s6870_s2 = sld [smem:[#allocation42_spill]] }
  0xb4   :  { %s5135_s14 = scalar_lea.hbm %s6870_s2, 64 }
  0xb5   :  { %p5136_p5 = scmp.ne.s32.totalorder %s6870_s2, %s5135_s14  ;;  %p5139_p6 = scmp.lt.u32.totalorder %s5135_s14, %s6870_s2 }
  0xb7   :  { %p5141_p7 = pnand %p5139_p6, %p5136_p5 }
  0xb9   :  { %5144 = shalt.err (!%p5141_p7)
}
  0xba   :  { %s5145_s17 = scalar_lea.vmem %s53_s28, 64  ;;  %p5150_p9 = scmp.lt.s32.totalorder %s53_s28, %s53_s28 }
  0xbb   :  { %p5146_p8 = scmp.ne.s32.totalorder %s53_s28, %s5145_s17  ;;  %p5151_p10 = scmp.lt.s32.totalorder %s5145_s17, %s5145_s17 }
  0xbd   :  { %p5152_p11 = por %p5151_p10, %p5150_p9 }
  0xbf   :  { %p5153_p12 = pnand %p5152_p11, %p5146_p8 }
  0xc1   :  { %5156 = shalt.err (!%p5153_p12)
}
  0xc2   :  { %55 = dma.hbm_to_vmem [thread:$0]  %s6870_s2, 64, %s53_s28, [#allocation7]  }
  0xc3   :  { %s6871_s15 = sld [smem:[#allocation44_spill]] }
  0xc9   :  { %s5157_s6 = scalar_lea.hbm %s6871_s15, 256 }
  0xca   :  { %p5158_p13 = scmp.ne.s32.totalorder %s6871_s15, %s5157_s6  ;;  %p5161_p0 = scmp.lt.u32.totalorder %s5157_s6, %s6871_s15 }
  0xcc   :  { %p5163_p1 = pnand %p5161_p0, %p5158_p13 }
  0xce   :  { %5166 = shalt.err (!%p5163_p1)
}
  0xcf   :  { %s5167_s14 = scalar_lea.vmem %s74_s0, 256  ;;  %p5172_p3 = scmp.lt.s32.totalorder %s74_s0, %s74_s0 }
  0xd0   :  { %p5168_p2 = scmp.ne.s32.totalorder %s74_s0, %s5167_s14  ;;  %p5173_p4 = scmp.lt.s32.totalorder %s5167_s14, %s5167_s14 }
  0xd2   :  { %p5174_p5 = por %p5173_p4, %p5172_p3 }
  0xd4   :  { %p5175_p6 = pnand %p5174_p5, %p5168_p2 }
  0xd6   :  { %5178 = shalt.err (!%p5175_p6)
}
  0xd7   :  { %79 = dma.hbm_to_vmem [thread:$0]  %s6871_s15, 256, %s74_s0, [#allocation10], %s5363_s27, %s5363_s27, %s5364_s3  }
  0xd8   :  { %s5373_s29 = smov [#allocation14]   ;;  %s5374_s10 = smov [#allocation17]  }
  0xd9   :  { %s97_s8 = sshll.u32 %s5373_s29, 4  ;;  %s126_s9 = sshll.u32 %s5374_s10, 4  ;;  %s98_s8 = int_to_ptr.vmem [resolvable:$true] %s97_s8  ;;  %s127_s9 = int_to_ptr.vmem [resolvable:$true] %s126_s9 }
  0xda   :  { %s6872_s4 = sld [smem:[#allocation46_spill]] }
  0xe0   :  { %s5179_s5 = scalar_lea.hbm %s6872_s4, 1024 }
  0xe1   :  { %p5180_p7 = scmp.ne.s32.totalorder %s6872_s4, %s5179_s5  ;;  %p5183_p8 = scmp.lt.u32.totalorder %s5179_s5, %s6872_s4 }
  0xe3   :  { %p5185_p9 = pnand %p5183_p8, %p5180_p7 }
  0xe5   :  { %5188 = shalt.err (!%p5185_p9)
}
  0xe6   :  { %s5189_s0 = scalar_lea.vmem %s98_s8, 1024  ;;  %p5194_p11 = scmp.lt.s32.totalorder %s98_s8, %s98_s8 }
  0xe7   :  { %p5190_p10 = scmp.ne.s32.totalorder %s98_s8, %s5189_s0  ;;  %p5195_p12 = scmp.lt.s32.totalorder %s5189_s0, %s5189_s0 }
  0xe9   :  { %p5196_p13 = por %p5195_p12, %p5194_p11 }
  0xeb   :  { %p5197_p0 = pnand %p5196_p13, %p5190_p10 }
  0xed   :  { %5200 = shalt.err (!%p5197_p0)
}
  0xee   :  { %103 = dma.hbm_to_vmem [thread:$0]  %s6872_s4, 1024, %s98_s8, [#allocation13], %s5363_s27, %s5363_s27, %s5364_s3  }
  0xef   :  { %s6873_s28 = sld [smem:[#allocation50_spill]] }
  0xf5   :  { %s5201_s2 = scalar_lea.hbm %s6873_s28, 32 }
  0xf6   :  { %p5202_p1 = scmp.ne.s32.totalorder %s6873_s28, %s5201_s2  ;;  %p5205_p2 = scmp.lt.u32.totalorder %s5201_s2, %s6873_s28 }
  0xf8   :  { %p5207_p3 = pnand %p5205_p2, %p5202_p1 }
  0xfa   :  { %5210 = shalt.err (!%p5207_p3)
}
  0xfb   :  { %s5211_s5 = scalar_lea.vmem %s127_s9, 32  ;;  %p5216_p5 = scmp.lt.s32.totalorder %s127_s9, %s127_s9 }
  0xfc   :  { %p5212_p4 = scmp.ne.s32.totalorder %s127_s9, %s5211_s5  ;;  %p5217_p6 = scmp.lt.s32.totalorder %s5211_s5, %s5211_s5 }
  0xfe   :  { %p5218_p7 = por %p5217_p6, %p5216_p5 }
 0x100   :  { %p5219_p8 = pnand %p5218_p7, %p5212_p4 }
 0x102   :  { %5222 = shalt.err (!%p5219_p8)
}
 0x103   :  { %129 = dma.hbm_to_vmem [thread:$0]  %s6873_s28, 32, %s127_s9, [#allocation16]  }
 0x104   :  { %s5375_s1 = smov [#allocation20]   ;;  %s5376_s30 = smov [#allocation23]  }
 0x105   :  { %s148_s6 = sshll.u32 %s5375_s1, 4  ;;  %s170_s25 = sshll.u32 %s5376_s30, 4  ;;  %s149_s6 = int_to_ptr.vmem [resolvable:$true] %s148_s6  ;;  %s171_s25 = int_to_ptr.vmem [resolvable:$true] %s170_s25 }
 0x106   :  { %s5223_s12 = scalar_lea.hbm %s6823_s11, 32 }
 0x107   :  { %p5224_p9 = scmp.ne.s32.totalorder %s6823_s11, %s5223_s12  ;;  %p5227_p10 = scmp.lt.u32.totalorder %s5223_s12, %s6823_s11 }
 0x109   :  { %p5229_p11 = pnand %p5227_p10, %p5224_p9 }
 0x10b   :  { %5232 = shalt.err (!%p5229_p11)
}
 0x10c   :  { %s5233_s9 = scalar_lea.vmem %s149_s6, 32  ;;  %p5238_p13 = scmp.lt.s32.totalorder %s149_s6, %s149_s6 }
 0x10d   :  { %p5234_p12 = scmp.ne.s32.totalorder %s149_s6, %s5233_s9  ;;  %p5239_p0 = scmp.lt.s32.totalorder %s5233_s9, %s5233_s9 }
 0x10f   :  { %p5240_p1 = por %p5239_p0, %p5238_p13 }
 0x111   :  { %p5241_p2 = pnand %p5240_p1, %p5234_p12 }
 0x113   :  { %5244 = shalt.err (!%p5241_p2)
}
 0x114   :  { %151 = dma.hbm_to_vmem [thread:$0]  %s6823_s11, 32, %s149_s6, [#allocation19]  }
 0x115   :  { %s5245_s5 = scalar_lea.hbm %s6825_s13, 32 }
 0x116   :  { %p5246_p3 = scmp.ne.s32.totalorder %s6825_s13, %s5245_s5  ;;  %p5249_p4 = scmp.lt.u32.totalorder %s5245_s5, %s6825_s13 }
 0x118   :  { %p5251_p5 = pnand %p5249_p4, %p5246_p3 }
 0x11a   :  { %5254 = shalt.err (!%p5251_p5)
}
 0x11b   :  { %s5255_s0 = scalar_lea.vmem %s171_s25, 32  ;;  %p5260_p7 = scmp.lt.s32.totalorder %s171_s25, %s171_s25 }
 0x11c   :  { %p5256_p6 = scmp.ne.s32.totalorder %s171_s25, %s5255_s0  ;;  %p5261_p8 = scmp.lt.s32.totalorder %s5255_s0, %s5255_s0 }
 0x11e   :  { %p5262_p9 = por %p5261_p8, %p5260_p7 }
 0x120   :  { %p5263_p10 = pnand %p5262_p9, %p5256_p6 }
 0x122   :  { %5266 = shalt.err (!%p5263_p10)
}
 0x123   :  { %173 = dma.hbm_to_vmem [thread:$0]  %s6825_s13, 32, %s171_s25, [#allocation22]  }
 0x124   :  { %s5377_s15 = smov [#allocation26]   ;;  %s5378_s7 = smov [#allocation29]  }
 0x125   :  { %s191_s12 = sshll.u32 %s5377_s15, 4  ;;  %s216_s14 = sshll.u32 %s5378_s7, 4  ;;  %s192_s12 = int_to_ptr.vmem [resolvable:$true] %s191_s12  ;;  %s217_s14 = int_to_ptr.vmem [resolvable:$true] %s216_s14 }
 0x126   :  { %s5267_s9 = scalar_lea.hbm %s6828_s16, 2048 }
 0x127   :  { %p5268_p11 = scmp.ne.s32.totalorder %s6828_s16, %s5267_s9  ;;  %p5271_p12 = scmp.lt.u32.totalorder %s5267_s9, %s6828_s16 }
 0x129   :  { %p5273_p13 = pnand %p5271_p12, %p5268_p11 }
 0x12b   :  { %5276 = shalt.err (!%p5273_p13)
}
 0x12c   :  { %s5277_s13 = scalar_lea.vmem %s192_s12, 2048  ;;  %p5282_p1 = scmp.lt.s32.totalorder %s192_s12, %s192_s12 }
 0x12d   :  { %p5278_p0 = scmp.ne.s32.totalorder %s192_s12, %s5277_s13  ;;  %p5283_p2 = scmp.lt.s32.totalorder %s5277_s13, %s5277_s13 }
 0x12f   :  { %p5284_p3 = por %p5283_p2, %p5282_p1 }
 0x131   :  { %p5285_p4 = pnand %p5284_p3, %p5278_p0 }
 0x133   :  { %5288 = shalt.err (!%p5285_p4)
}
 0x134   :  { %197 = dma.hbm_to_vmem [thread:$0]  %s6828_s16, 2048, %s192_s12, [#allocation25], %s5363_s27, %s5363_s27, %s5364_s3  }
 0x135   :  { %s5289_s1 = scalar_lea.hbm %s6831_s19, 64 }
 0x136   :  { %p5290_p5 = scmp.ne.s32.totalorder %s6831_s19, %s5289_s1  ;;  %p5293_p6 = scmp.lt.u32.totalorder %s5289_s1, %s6831_s19 }
 0x138   :  { %p5295_p7 = pnand %p5293_p6, %p5290_p5 }
 0x13a   :  { %5298 = shalt.err (!%p5295_p7)
}
 0x13b   :  { %s5299_s15 = scalar_lea.vmem %s217_s14, 64  ;;  %p5304_p9 = scmp.lt.s32.totalorder %s217_s14, %s217_s14 }
 0x13c   :  { %p5300_p8 = scmp.ne.s32.totalorder %s217_s14, %s5299_s15  ;;  %p5305_p10 = scmp.lt.s32.totalorder %s5299_s15, %s5299_s15 }
 0x13e   :  { %p5306_p11 = por %p5305_p10, %p5304_p9 }
 0x140   :  { %p5307_p12 = pnand %p5306_p11, %p5300_p8 }
 0x142   :  { %5310 = shalt.err (!%p5307_p12)
}
 0x143   :  { %219 = dma.hbm_to_vmem [thread:$0]  %s6831_s19, 64, %s217_s14, [#allocation28]  }
 0x144   :  { %5339 = dma.done.wait [#allocation7], 64  }
 0x145   :  { %5340 = vsyncadd [#allocation7], 4294967232 }
 0x146   :  { %5341 = dma.done.wait [#allocation10], 512  }
 0x147   :  { %5342 = vsyncadd [#allocation10], 4294966784 }
 0x148   :  { %5343 = dma.done.wait [#allocation13], 1280  }
 0x149   :  { %5344 = vsyncadd [#allocation13], 4294966016 }
 0x14a   :  { %5345 = dma.done.wait [#allocation16], 2080  }
 0x14b   :  { %5346 = vsyncadd [#allocation16], 4294965216 }
 0x14c   :  { %5347 = dma.done.wait [#allocation19], 2080  }
 0x14d   :  { %5348 = vsyncadd [#allocation19], 4294965216 }
 0x14e   :  { %5349 = dma.done.wait [#allocation22], 2080  }
 0x14f   :  { %5350 = vsyncadd [#allocation22], 4294965216 }
 0x150   :  { %5351 = dma.done.wait [#allocation25], 2112  }
 0x151   :  { %5352 = vsyncadd [#allocation25], 4294965184 }
 0x152   :  { %5353 = dma.done.wait [#allocation28], 96  }
 0x153   :  { %5354 = vsyncadd [#allocation28], 4294967200  ;;  %v5728_v0 = vld [vmem:[#allocation14] sm:$0xff]  ;;  %v5730_v1 = vld [vmem:[#allocation14 + $0x8] sm:$0xff]  ;;  %vm278_vm0 = vcmask 519168   ;;  %s5744_s19 = smov 0  }
 0x154   :  { %v5732_v2 = vld [vmem:[#allocation14 + $0x10] sm:$0xff]  ;;  %v5734_v3 = vld [vmem:[#allocation14 + $0x18] sm:$0xff]  ;;  %v5736_v4 = vld [vmem:[#allocation14 + $0x20] sm:$0xff] }
 0x155   :  { %v5738_v5 = vld [vmem:[#allocation14 + $0x28] sm:$0xff]  ;;  %v5740_v6 = vld [vmem:[#allocation14 + $0x30] sm:$0xff]  ;;  %v5742_v7 = vld [vmem:[#allocation14 + $0x38] sm:$0xff] }
 0x156   :  { %v277_v8 = vld [vmem:[#allocation6] sm:$0xf] }
 0x157   :  { %279 = vst.msk [vmem:[#allocation2] sm:$0xf] %vm278_vm0, %v277_v8 }
 0x158 LB: > { %s5750_s3 = sshll.u32 %s5359_s19, 4  ;;  %vm301_vm1 = vcmask 516096   ;;  %vm382_vm2 = vcmask 523264   ;;  %v5379_v58 = vmov 0.0   ;;  %s5359_s19 = sphi %s5744_s19, %s293_s19  }
 0x159   : > { %s296_s12 = sld [smem:[#allocation5 + %s5750_s3]]  ;;  %s306_s7 = sadd.s32 1, %s5750_s3  ;;  %535 = vmatprep.mubr.f32.mxu1 %v5379_v58 }
 0x15a   : > { %s307_s14 = sld [smem:[#allocation5 + %s306_s7]]  ;;  %s316_s2 = sadd.s32 2, %s5750_s3 }
 0x15b   : > { %s317_s29 = sld [smem:[#allocation5 + %s316_s2]]  ;;  %s326_s9 = sadd.s32 3, %s5750_s3 }
 0x15c   : > { %s327_s28 = sld [smem:[#allocation5 + %s326_s9]]  ;;  %s336_s10 = sadd.s32 4, %s5750_s3 }
 0x15d   : > { %s337_s17 = sld [smem:[#allocation5 + %s336_s10]]  ;;  %s346_s26 = sadd.s32 5, %s5750_s3 }
 0x15e   : > { %s347_s13 = sld [smem:[#allocation5 + %s346_s26]]  ;;  %s356_s25 = sadd.s32 6, %s5750_s3 }
 0x15f   : > { %s357_s5 = sld [smem:[#allocation5 + %s356_s25]]  ;;  %s299_s8 = scalar_lea.vmem [#allocation2], %s296_s12 }
 0x160   : > { %v300_v9 = vld [vmem:[%s299_s8] sm:$0x1]  ;;  %s366_s4 = sadd.s32 7, %s5750_s3  ;;  %s310_s1 = scalar_lea.vmem [#allocation2], %s307_s14 }
 0x161   : > { %302 = vst.msk [vmem:[#allocation3] sm:$0x1] %vm301_vm1, %v300_v9  ;;  %v311_v10 = vld [vmem:[%s310_s1] sm:$0x1]  ;;  %s367_s30 = sld [smem:[#allocation5 + %s366_s4]]  ;;  %s320_s0 = scalar_lea.vmem [#allocation2], %s317_s29 }
 0x162   : > { %312 = vst.msk [vmem:[#allocation3 + $0x1] sm:$0x1] %vm301_vm1, %v311_v10  ;;  %v321_v11 = vld [vmem:[%s320_s0] sm:$0x1]  ;;  %s297_s11 = sadd.s32 8, %s5750_s3  ;;  %s330_s6 = scalar_lea.vmem [#allocation2], %s327_s28 }
 0x163   : > { %322 = vst.msk [vmem:[#allocation3 + $0x2] sm:$0x1] %vm301_vm1, %v321_v11  ;;  %v331_v12 = vld [vmem:[%s330_s6] sm:$0x1]  ;;  %s298_s15 = sld [smem:[#allocation5 + %s297_s11]]  ;;  %s340_s16 = scalar_lea.vmem [#allocation2], %s337_s17  ;;  %v5861_v11 = vpack.c.bf16 %v5730_v1, %v5728_v0 }
 0x164   : > { %332 = vst.msk [vmem:[#allocation3 + $0x3] sm:$0x1] %vm301_vm1, %v331_v12  ;;  %v341_v13 = vld [vmem:[%s340_s16] sm:$0x1]  ;;  %s308_s27 = sadd.s32 9, %s5750_s3  ;;  %s350_s12 = scalar_lea.vmem [#allocation2], %s347_s13  ;;  %v5865_v12 = vpack.c.bf16 %v5734_v3, %v5732_v2 }
 0x165   : > { %342 = vst.msk [vmem:[#allocation3 + $0x4] sm:$0x1] %vm301_vm1, %v341_v13  ;;  %v351_v14 = vld [vmem:[%s350_s12] sm:$0x1]  ;;  %s309_s7 = sld [smem:[#allocation5 + %s308_s27]]  ;;  %s360_s14 = scalar_lea.vmem [#allocation2], %s357_s5  ;;  %4415 = vmatprep.subr.bf16.mxu0 %v5861_v11 }
 0x166   : > { %352 = vst.msk [vmem:[#allocation3 + $0x5] sm:$0x1] %vm301_vm1, %v351_v14  ;;  %v361_v15 = vld [vmem:[%s360_s14] sm:$0x1]  ;;  %s318_s2 = sadd.s32 10, %s5750_s3  ;;  %s328_s29 = sadd.s32 11, %s5750_s3  ;;  %4417 = vmatpush3.bf16.msra.mxu0 %v5861_v11 }
 0x167   : > { %362 = vst.msk [vmem:[#allocation3 + $0x6] sm:$0x1] %vm301_vm1, %v361_v15  ;;  %s319_s9 = sld [smem:[#allocation5 + %s318_s2]]  ;;  %s370_s28 = scalar_lea.vmem [#allocation2], %s367_s30  ;;  %4419 = vmatprep.subr.bf16.mxu0 %v5865_v12 }
 0x168   : > { %v371_v16 = vld [vmem:[%s370_s28] sm:$0x1]  ;;  %s329_s10 = sld [smem:[#allocation5 + %s328_s29]]  ;;  %s338_s17 = sadd.s32 12, %s5750_s3 }
 0x169   : > { %372 = vst.msk [vmem:[#allocation3 + $0x7] sm:$0x1] %vm301_vm1, %v371_v16  ;;  %s339_s26 = sld [smem:[#allocation5 + %s338_s17]]  ;;  %s303_s13 = scalar_lea.vmem [#allocation2], %s298_s15 }
 0x16a   : > { %v304_v17 = vld [vmem:[%s303_s13] sm:$0x1]  ;;  %s348_s25 = sadd.s32 13, %s5750_s3  ;;  %s358_s8 = sadd.s32 14, %s5750_s3  ;;  %4421 = vmatpush3.bf16.msra.mxu0 %v5865_v12 }
 0x16b   : > { %305 = vst.msk [vmem:[#allocation3 + $0x8] sm:$0x1] %vm301_vm1, %v304_v17  ;;  %s349_s5 = sld [smem:[#allocation5 + %s348_s25]]  ;;  %s313_s4 = scalar_lea.vmem [#allocation2], %s309_s7 }
 0x16c   : > { %v314_v18 = vld [vmem:[%s313_s4] sm:$0x1]  ;;  %s359_s1 = sld [smem:[#allocation5 + %s358_s8]]  ;;  %s368_s0 = sadd.s32 15, %s5750_s3 }
 0x16d   : > { %315 = vst.msk [vmem:[#allocation3 + $0x9] sm:$0x1] %vm301_vm1, %v314_v18  ;;  %s369_s30 = sld [smem:[#allocation5 + %s368_s0]]  ;;  %s323_s11 = scalar_lea.vmem [#allocation2], %s319_s9 }
 0x16e   : > { %v324_v19 = vld [vmem:[%s323_s11] sm:$0x1]  ;;  %s333_s6 = scalar_lea.vmem [#allocation2], %s329_s10  ;;  %s6874_s14 = sld [smem:[#allocation47_spill]] }
 0x16f   : > { %325 = vst.msk [vmem:[#allocation3 + $0xa] sm:$0x1] %vm301_vm1, %v324_v19  ;;  %v334_v20 = vld [vmem:[%s333_s6] sm:$0x1]  ;;  %s343_s15 = scalar_lea.vmem [#allocation2], %s339_s26  ;;  %s6875_s9 = sld [smem:[#allocation48_spill]] }
 0x170   : > { %v5779_v21 = vld [vmem:[#allocation3] sm:$0xff]  ;;  %335 = vst.msk [vmem:[#allocation3 + $0xb] sm:$0x1] %vm301_vm1, %v334_v20  ;;  %v344_v22 = vld [vmem:[%s343_s15] sm:$0x1]  ;;  %s5934_s28 = sshll.u32 %s5359_s19, 3 }
 0x171   : > { %v383_v23 = vsel %vm382_vm2, %v5779_v21, 0.0  ;;  %345 = vst.msk [vmem:[#allocation3 + $0xc] sm:$0x1] %vm301_vm1, %v344_v22  ;;  %s353_s3 = scalar_lea.vmem [#allocation2], %s349_s5  ;;  %s380_s10 = scalar_lea.vmem [#allocation12], %s5934_s28 }
 0x172   : > { %384 = vadd.xlane.f32.xlu0 %v383_v23  ;;  %v354_v24 = vld [vmem:[%s353_s3] sm:$0x1]  ;;  %s363_s16 = scalar_lea.vmem [#allocation2], %s359_s1  ;;  %s378_s17 = scalar_lea.vmem [#allocation11], %s5934_s28 }
 0x173   : > { %355 = vst.msk [vmem:[#allocation3 + $0xd] sm:$0x1] %vm301_vm1, %v354_v24  ;;  %v364_v25 = vld [vmem:[%s363_s16] sm:$0x1]  ;;  %s373_s27 = scalar_lea.vmem [#allocation2], %s369_s30  ;;  %s1833_s4 = scalar_lea.vmem [#allocation9], %s5934_s28 }
 0x174   : > { %365 = vst.msk [vmem:[#allocation3 + $0xe] sm:$0x1] %vm301_vm1, %v364_v25  ;;  %v374_v26 = vld [vmem:[%s373_s27] sm:$0x1]  ;;  %v425_v39 = vld [vmem:[%s6874_s14 + $0x8] sm:$0xff]  ;;  %v427_v43 = vld [vmem:[%s6874_s14 + $0x18] sm:$0xff] }
 0x175   : > { %375 = vst.msk [vmem:[#allocation3 + $0xf] sm:$0x1] %vm301_vm1, %v374_v26  ;;  %v428_v40 = vld [vmem:[%s6874_s14 + $0x20] sm:$0xff]  ;;  %v431_v45 = vld [vmem:[%s6874_s14 + $0x38] sm:$0xff]  ;;  %v434_v46 = vld [vmem:[%s6874_s14 + $0x50] sm:$0xff]  ;;  %s6876_s13 = sld [smem:[#allocation52_spill]] }
 0x176   : > { %v4382_v41 = vpack.c.bf16 %v428_v40, %v425_v39  ;;  %v424_v42 = vld [vmem:[%s6874_s14] sm:$0xff]  ;;  %v4386_v47 = vpack.c.bf16 %v434_v46, %v431_v45  ;;  %v430_v48 = vld [vmem:[%s6874_s14 + $0x30] sm:$0xff]  ;;  %v433_v49 = vld [vmem:[%s6874_s14 + $0x48] sm:$0xff]  ;;  %v5898_v45 = vpack.c.bf16 %v5738_v5, %v5736_v4  ;;  %v5904_v46 = vpack.c.bf16 %v5742_v7, %v5740_v6  ;;  %s3437_s6 = scalar_lea.vmem [#allocation2], %s5934_s28  ;;  %s293_s19 = sadd.s32 1, %s5359_s19  }
 0x177   : > { %v4384_v44 = vpack.c.bf16 %v427_v43, %v424_v42  ;;  %v4388_v50 = vpack.c.bf16 %v433_v49, %v430_v48  ;;  %v437_v51 = vld [vmem:[%s6874_s14 + $0x68] sm:$0xff]  ;;  %v440_v52 = vld [vmem:[%s6874_s14 + $0x80] sm:$0xff]  ;;  %v439_v55 = vld [vmem:[%s6874_s14 + $0x78] sm:$0xff]  ;;  %p290_p13 = scmp.ge.s32.totalorder %s293_s19, 2  }
 0x178   : > { %4383 = vmatprep.subr.bf16.mxu1 %v4382_v41  ;;  %v436_v53 = vld [vmem:[%s6874_s14 + $0x60] sm:$0xff]  ;;  %v4390_v54 = vpack.c.bf16 %v440_v52, %v437_v51  ;;  %v443_v56 = vld [vmem:[%s6874_s14 + $0x98] sm:$0xff]  ;;  %v446_v57 = vld [vmem:[%s6874_s14 + $0xb0] sm:$0xff]  ;;  %4423 = vmatprep.subr.bf16.mxu0 %v5898_v45  ;;  %v5384_v0 = vmov (%p290_p13), 0.0   ;;  %s6877_s2 = sld [smem:[#allocation53_spill]] (%p290_p13) }
 0x179   : > { %4385 = vmatpush1.bf16.msra.mxu1 %v4384_v44  ;;  %v4392_v59 = vpack.c.bf16 %v439_v55, %v436_v53  ;;  %v4394_v60 = vpack.c.bf16 %v446_v57, %v443_v56  ;;  %v442_v61 = vld [vmem:[%s6874_s14 + $0x90] sm:$0xff]  ;;  %v445_v62 = vld [vmem:[%s6874_s14 + $0xa8] sm:$0xff]  ;;  %v447_v41 = vld [vmem:[%s6874_s14 + $0xb8] sm:$0xff]  ;;  %4425 = vmatpush3.bf16.msra.mxu0 %v5898_v45 }
 0x17a   : > { %4387 = vmatprep.subr.bf16.mxu1 %v4386_v47  ;;  %v426_v63 = vld [vmem:[%s6874_s14 + $0x10] sm:$0xff]  ;;  %v429_v8 = vld [vmem:[%s6874_s14 + $0x28] sm:$0xff]  ;;  %v4396_v9 = vpack.c.bf16 %v445_v62, %v442_v61  ;;  %4427 = vmatprep.subr.bf16.mxu0 %v5904_v46  ;;  %v5916_v49 = vld [vmem:[%s6875_s9] ss:$2 sm:$0x7] }
 0x17b   : > { %v4398_v10 = vpack.c.bf16 %v429_v8, %v426_v63  ;;  %v441_v39 = vld [vmem:[%s6874_s14 + $0x88] sm:$0xff]  ;;  %v3300_v2 = vld [vmem:[%s6836_s24 + $0x20] sm:$0xff] (%p290_p13)  ;;  %v3302_v5 = vld [vmem:[%s6836_s24 + $0x30] sm:$0xff] (%p290_p13) }
 0x17c   : > { %v5788_v27 = vld [vmem:[#allocation3 + $0x8] sm:$0xff]  ;;  %v3301_v3 = vld [vmem:[%s6836_s24 + $0x28] sm:$0xff] (%p290_p13)  ;;  %v3303_v6 = vld [vmem:[%s6836_s24 + $0x38] sm:$0xff] (%p290_p13) }
 0x17d   : > { %v386_v28 = vsel %vm382_vm2, %v5788_v27, 0.0  ;;  %4389 = vmatpush1.bf16.msra.mxu1 %v4388_v50  ;;  %4429 = vmatpush3.bf16.msra.mxu0 %v5904_v46  ;;  %v4821_v4 = vpack.c.bf16 (%p290_p13), %v3301_v3, %v3300_v2  ;;  %v4824_v7 = vpack.c.bf16 (%p290_p13), %v3303_v6, %v3302_v5 }
 0x17e   : > { %387 = vadd.xlane.f32.xlu0 %v386_v28  ;;  %4391 = vmatprep.subr.bf16.mxu1 %v4390_v54 }
 0x181   : > { %4393 = vmatpush1.bf16.msra.mxu1 %v4392_v59 }
 0x182   : > { %4395 = vmatprep.subr.bf16.mxu1 %v4394_v60 }
 0x185   : > { %4397 = vmatpush1.bf16.msra.mxu1 %v4396_v9 }
 0x186   : > { %4399 = vmatprep.subr.bf16.mxu1 %v4398_v10 }
 0x1ff   : > { %v385_v29 = vpop.xlane.xlu0 %384 }
 0x200   : > { %v390_v30 = vmul.f32 0.015625, %v385_v29  ;;  %v432_v29 = vld [vmem:[%s6874_s14 + $0x40] sm:$0xff] }
 0x202   : > { %v5793_v31 = vsub.f32 %v5779_v21, %v390_v30  ;;  %v435_v30 = vld [vmem:[%s6874_s14 + $0x58] sm:$0xff] }
 0x204   : > { %v394_v32 = vmul.f32 %v5793_v31, %v5793_v31 }
 0x206   : > { %v396_v33 = vsel %vm382_vm2, %v394_v32, 0.0 }
 0x207   : > { %397 = vadd.xlane.f32.xlu1 %v396_v33 }
 0x20b   : > { %v388_v34 = vpop.xlane.xlu0 %387 }
 0x20c   : > { %v391_v35 = vmul.f32 0.015625, %v388_v34 }
 0x20e   : > { %v5799_v36 = vsub.f32 %v5788_v27, %v391_v35 }
 0x210   : > { %v395_v37 = vmul.f32 %v5799_v36, %v5799_v36 }
 0x212   : > { %v399_v38 = vsel %vm382_vm2, %v395_v37, 0.0  ;;  %v4402_v37 = vpack.c.bf16 %v435_v30, %v432_v29  ;;  %v5944_v29 = vld [vmem:[%s378_s17] sm:$0xff] }
 0x213   : > { %400 = vadd.xlane.f32.xlu1 %v399_v38  ;;  %v438_v38 = vld [vmem:[%s6874_s14 + $0x70] sm:$0xff] }
 0x214   : > { %v4406_v40 = vpack.c.bf16 %v441_v39, %v438_v38 }
 0x294   : > { %v398_v13 = vpop.xlane.xlu1 %397 }
 0x295   : > { %v402_v14 = vmul.f32 0.015873017, %v398_v13 }
 0x297   : > { %4859 = vrsqrt.f32 %v402_v14  ;;  %vm406_vm3 = vcmp.eq.f32.partialorder %v402_v14, inf  ;;  %v409_v19 = vand.u32 2147483648, %v402_v14  ;;  %vm408_vm4 = vcmp.eq.f32.partialorder %v402_v14, 0.0 }
 0x2a0   : > { %v401_v15 = vpop.xlane.xlu1 %400 }
 0x2a1   : > { %v4860_v16 = vpop.eup %4859  ;;  %v403_v17 = vmul.f32 0.015873017, %v401_v15  ;;  %v757_v15 = vld [vmem:[#allocation15 + $0x8] sm:$0xff] }
 0x2a2   : > { %v405_v18 = vmul.f32 %v4860_v16, %v402_v14 }
 0x2a3   : > { %4861 = vrsqrt.f32 %v403_v17  ;;  %vm413_vm5 = vcmp.eq.f32.partialorder %v403_v17, inf  ;;  %v416_v26 = vand.u32 2147483648, %v403_v17  ;;  %vm415_vm6 = vcmp.eq.f32.partialorder %v403_v17, 0.0 }
 0x2a4   : > { %v407_v20 = vsel %vm406_vm3, %v402_v14, %v405_v18  ;;  %v756_v14 = vld [vmem:[#allocation15] sm:$0xff]  ;;  %v759_v18 = vld [vmem:[#allocation15 + $0x18] sm:$0xff] }
 0x2a5   : > { %v410_v22 = vsel %vm408_vm4, %v409_v19, %v407_v20  ;;  %v4430_v16 = vpack.c.bf16 %v757_v15, %v756_v14  ;;  %v760_v20 = vld [vmem:[#allocation15 + $0x20] sm:$0xff]  ;;  %vm5381_vm4 = vmmov 0  }
 0x2a6   : > { %v418_v23 = vadd.f32 1e-06, %v410_v22  ;;  %v761_v22 = vld [vmem:[#allocation15 + $0x28] sm:$0xff] }
 0x2a8   : > { %4863 = vrcp.f32 %v418_v23  ;;  %v4438_v23 = vpack.c.bf16 %v761_v22, %v760_v20 }
 0x2ad   : > { %v4862_v24 = vpop.eup %4861 }
 0x2ae   : > { %v412_v25 = vmul.f32 %v4862_v24, %v403_v17  ;;  %v762_v24 = vld [vmem:[#allocation15 + $0x30] sm:$0xff] }
 0x2b0   : > { %v414_v28 = vsel %vm413_vm5, %v403_v17, %v412_v25  ;;  %v758_v17 = vld [vmem:[#allocation15 + $0x10] sm:$0xff]  ;;  %v763_v25 = vld [vmem:[#allocation15 + $0x38] sm:$0xff] }
 0x2b1   : > { %v417_v32 = vsel %vm415_vm6, %v416_v26, %v414_v28  ;;  %v4434_v19 = vpack.c.bf16 %v759_v18, %v758_v17  ;;  %v4442_v26 = vpack.c.bf16 %v763_v25, %v762_v24  ;;  %v5939_v28 = vld [vmem:[%s380_s10] sm:$0xff] }
 0x2b2   : > { %v4864_v33 = vpop.eup %4863  ;;  %v419_v34 = vadd.f32 1e-06, %v417_v32 }
 0x2b3   : > { %v422_v35 = vmul.f32 %v4864_v33, %v5793_v31  ;;  %v444_v31 = vld [vmem:[%s6874_s14 + $0xa0] sm:$0xff] }
 0x2b4   : > { %4865 = vrcp.f32 %v419_v34  ;;  %v4410_v42 = vpack.c.bf16 %v447_v41, %v444_v31 }
 0x2b5   : > { %3446 = vmatmul.mubr.msk.f32.vlgmr.msra.gmra.mrb[0].mxu1 %vm382_vm2, %v422_v35 }
 0x2b6   : > { %4401 = vmatpush3.bf16.msra.mxu1 %v4398_v10  ;;  %541 = vmatprep.mubr.f32.mxu1 %v5379_v58 }
 0x2b7   : > { %4403 = vmatprep.subr.bf16.mxu1 %v4402_v37 }
 0x2ba   : > { %4405 = vmatpush3.bf16.msra.mxu1 %v4402_v37 }
 0x2bb   : > { %4407 = vmatprep.subr.bf16.mxu1 %v4406_v40 }
 0x2be   : > { %v4866_v43 = vpop.eup %4865  ;;  %4409 = vmatpush3.bf16.msra.mxu1 %v4406_v40 }
 0x2bf   : > { %v423_v44 = vmul.f32 %v4866_v43, %v5799_v36  ;;  %4411 = vmatprep.subr.bf16.mxu1 %v4410_v42  ;;  %v450_v36 = vlaneseq }
 0x2c1   : > { %3447 = vmatmul.mubr.msk.f32.gmra.mrb[2].mxu1 %vm382_vm2, %v423_v44  ;;  %v5908_v47 = vshrl.u32 %v450_v36, 7 }
 0x2c2   : > { %3891 = vmatprep.mubr.msk.f32.mxu1 %vm382_vm2, %v422_v35  ;;  %4413 = vmatpush3.bf16.msra.mxu1 %v4410_v42 }
 0x2c3   : > { %v5911_v48 = vsub.s32 0, %v5908_v47  ;;  %v5919_v50 = vsub.s32 1, %v5908_v47  ;;  %4431 = vmatprep.subr.bf16.mxu1 %v4430_v16 }
 0x2c5   : > { %3892 = vmatmul.mubr.msk.f32.vlgmr.msra.gmra.mrb[4].mxu1 %vm382_vm2, %v423_v44  ;;  %v453_v51 = vrot.slane %v5916_v49, %v5911_v48  ;;  %v457_v52 = vrot.slane %v5916_v49, %v5919_v50 }
 0x2c6   : > { %4433 = vmatpush3.bf16.msra.mxu1 %v4430_v16 }
 0x2c7   : > { %4435 = vmatprep.subr.bf16.mxu1 %v4434_v19 }
 0x2ca   : > { %4437 = vmatpush3.bf16.msra.mxu1 %v4434_v19 }
 0x2cb   : > { %4439 = vmatprep.subr.bf16.mxu1 %v4438_v23 }
 0x2ce   : > { %4441 = vmatpush3.bf16.msra.mxu1 %v4438_v23 }
 0x2cf   : > { %4443 = vmatprep.subr.bf16.mxu1 %v4442_v26 }
 0x2d2   : > { %4445 = vmatpush3.bf16.msra.mxu1 %v4442_v26 }
 0x388   : > { %v537_v53 = vpop.f32.mrb[0].mxu1 }
 0x389   : > { %v538_v54 = vadd.f32 %v537_v53, %v453_v51  ;;  %v539_v55 = vpop.f32.mrb[1].mxu1 }
 0x38a   : > { %v540_v56 = vadd.f32 %v539_v55, %v457_v52 }
 0x38c   : > { %v623_v57 = vmul.f32 %v540_v56, %v538_v54 }
 0x38e   : > { %3910 = vmatprep.mubr.msk.f32.mxu0 %vm382_vm2, %v623_v57 }
 0x394   : > { %v543_v59 = vpop.f32.mrb[2].mxu1 }
 0x395   : > { %v544_v60 = vadd.f32 %v543_v59, %v453_v51  ;;  %v545_v61 = vpop.f32.mrb[3].mxu1 }
 0x396   : > { %v546_v62 = vadd.f32 %v545_v61, %v457_v52  ;;  %v460_v61 = vsub.s32 2, %v5908_v47  ;;  %v3494_v47 = vld [vmem:[#allocation17 + $0x1] ss:$0 sm:$0xff] }
 0x397   : > { %v625_v63 = vmul.f32 %v544_v60, %v540_v56 }
 0x398   : > { %v624_v8 = vmul.f32 %v546_v62, %v538_v54  ;;  %v626_v9 = vmul.f32 %v546_v62, %v544_v60  ;;  %v5926_v10 = vpop.f32.mrb[4].mxu1  ;;  %v461_v62 = vrot.slane %v5916_v49, %v460_v61  ;;  %v3454_v49 = vld [vmem:[#allocation17] ss:$0 sm:$0xff] }
 0x399   : > { %v5928_v13 = vpop.f32.mrb[5].mxu1 }
 0x39a   : > { %3911 = vmatmul.mubr.msk.f32.vlgmr.msra.gmra.mrb[0].mxu0 %vm382_vm2, %v624_v8  ;;  %v620_v8 = vadd.f32 %v5926_v10, %v461_v62 }
 0x39b   : > { %3913 = vmatprep.mubr.msk.f32.mxu0 %vm382_vm2, %v625_v63 }
 0x39e   : > { %3914 = vmatmul.mubr.msk.f32.gmra.mrb[2].mxu0 %vm382_vm2, %v626_v9  ;;  %v615_v9 = vadd.f32 %v5928_v13, %v461_v62 }
 0x46d   : > { %v3912_v30 = vpop.f32.mrb[0].mxu0 }
 0x46e   : > { %v725_v32 = vadd.f32 %v3912_v30, %v5939_v28  ;;  %v705_v33 = vpop.f32.mrb[1].mxu0 }
 0x46f   : > { %v724_v34 = vadd.f32 %v705_v33, %v5944_v29 }
 0x471   : > { %v726_v35 = vmax.f32 %v724_v34, %v725_v32  ;;  %v3915_v37 = vpop.f32.mrb[2].mxu0 }
 0x472   : > { %v741_v38 = vadd.f32 %v3915_v37, %v5939_v28  ;;  %v715_v39 = vpop.f32.mrb[3].mxu0 }
 0x473   : > { %v727_v40 = vsub.f32 %v724_v34, %v726_v35  ;;  %v730_v31 = vsub.f32 %v725_v32, %v726_v35  ;;  %v740_v41 = vadd.f32 %v715_v39, %v5944_v29 }
 0x475   : > { %v728_v42 = vmul.f32 1.442695, %v727_v40  ;;  %v731_v43 = vmul.f32 1.442695, %v730_v31  ;;  %v742_v44 = vmax.f32 %v740_v41, %v741_v38 }
 0x477   : > { %4867 = vpow2.f32 %v728_v42  ;;  %v743_v36 = vsub.f32 %v740_v41, %v742_v44  ;;  %v746_v51 = vsub.f32 %v741_v38, %v742_v44  ;;  %v892_v44 = vld [vmem:[%s6830_s18] sm:$0xff] }
 0x478   : > { %4869 = vpow2.f32 %v731_v43 }
 0x479   : > { %v744_v52 = vmul.f32 1.442695, %v743_v36  ;;  %v747_v53 = vmul.f32 1.442695, %v746_v51  ;;  %v893_v36 = vld [vmem:[%s6830_s18 + $0x8] sm:$0xff] }
 0x47a   : > { %v4446_v51 = vpack.c.bf16 %v893_v36, %v892_v44 }
 0x47b   : > { %4871 = vpow2.f32 %v744_v52  ;;  %v894_v52 = vld [vmem:[%s6830_s18 + $0x10] sm:$0xff] }
 0x47c   : > { %4873 = vpow2.f32 %v747_v53  ;;  %4447 = vmatprep.subr.bf16.mxu0 %v4446_v51  ;;  %v895_v53 = vld [vmem:[%s6830_s18 + $0x18] sm:$0xff] }
 0x47d   : > { %4449 = vmatpush3.bf16.msra.mxu0 %v4446_v51 }
 0x481   : > { %v4868_v54 = vpop.eup %4867 }
 0x482   : > { %v4870_v55 = vpop.eup %4869 }
 0x483   : > { %v733_v56 = vadd.f32 %v4870_v55, %v4868_v54 }
 0x485   : > { %v4872_v57 = vpop.eup %4871  ;;  %4875 = vrcp.f32 %v733_v56  ;;  %v897_v56 = vld [vmem:[%s6830_s18 + $0x28] sm:$0xff] }
 0x486   : > { %v4874_v59 = vpop.eup %4873 }
 0x487   : > { %v749_v60 = vadd.f32 %v4874_v59, %v4872_v57 }
 0x489   : > { %4877 = vrcp.f32 %v749_v60  ;;  %v899_v60 = vld [vmem:[%s6830_s18 + $0x38] sm:$0xff] }
 0x48f   : > { %v4876_v63 = vpop.eup %4875 }
 0x490   : > { %v735_v14 = vmul.f32 %v4876_v63, %v4868_v54  ;;  %v737_v15 = vmul.f32 %v4876_v63, %v4870_v55  ;;  %v896_v54 = vld [vmem:[%s6830_s18 + $0x20] sm:$0xff]  ;;  %v4450_v55 = vpack.c.bf16 %v895_v53, %v894_v52 }
 0x491   : > { %v988_v63 = vld [vmem:[%s6832_s20] sm:$0xff] }
 0x492   : > { %v736_v16 = vmul.f32 %v735_v14, %v615_v9  ;;  %v738_v17 = vmul.f32 %v737_v15, %v620_v8  ;;  %4451 = vmatprep.subr.bf16.mxu0 %v4450_v55  ;;  %v991_v15 = vld [vmem:[%s6832_s20 + $0x18] sm:$0xff] }
 0x493   : > { %v4878_v18 = vpop.eup %4877  ;;  %4453 = vmatpush3.bf16.msra.mxu0 %v4450_v55 }
 0x494   : > { %v751_v19 = vmul.f32 %v4878_v18, %v4872_v57  ;;  %v739_v20 = vadd.f32 %v738_v17, %v736_v16  ;;  %v753_v22 = vmul.f32 %v4878_v18, %v4874_v59  ;;  %v4454_v57 = vpack.c.bf16 %v897_v56, %v896_v54  ;;  %v898_v59 = vld [vmem:[%s6830_s18 + $0x30] sm:$0xff]  ;;  %v992_v17 = vld [vmem:[%s6832_s20 + $0x20] sm:$0xff]  ;;  %v993_v18 = vld [vmem:[%s6832_s20 + $0x28] sm:$0xff] }
 0x495   : > { %v4458_v62 = vpack.c.bf16 %v899_v60, %v898_v59 }
 0x496   : > { %3932 = vmatprep.mubr.msk.f32.mxu1 %vm382_vm2, %v739_v20  ;;  %v752_v23 = vmul.f32 %v751_v19, %v615_v9  ;;  %v754_v24 = vmul.f32 %v753_v22, %v620_v8  ;;  %4455 = vmatprep.subr.bf16.mxu0 %v4454_v57  ;;  %v989_v8 = vld [vmem:[%s6832_s20 + $0x8] sm:$0xff]  ;;  %v990_v9 = vld [vmem:[%s6832_s20 + $0x10] sm:$0xff]  ;;  %v4470_v19 = vpack.c.bf16 %v993_v18, %v992_v17  ;;  %v995_v22 = vld [vmem:[%s6832_s20 + $0x38] sm:$0xff] }
 0x497   : > { %4457 = vmatpush3.bf16.msra.mxu0 %v4454_v57  ;;  %v4462_v14 = vpack.c.bf16 %v989_v8, %v988_v63  ;;  %v4466_v16 = vpack.c.bf16 %v991_v15, %v990_v9  ;;  %v994_v20 = vld [vmem:[%s6832_s20 + $0x30] sm:$0xff]  ;;  %v1003_v8 = vld [vmem:[%s6832_s20 + $0x78] sm:$0xff] }
 0x498   : > { %v755_v25 = vadd.f32 %v754_v24, %v752_v23  ;;  %4459 = vmatprep.subr.bf16.mxu0 %v4458_v62  ;;  %v4474_v23 = vpack.c.bf16 %v995_v22, %v994_v20  ;;  %v996_v24 = vld [vmem:[%s6832_s20 + $0x40] sm:$0xff]  ;;  %v1002_v63 = vld [vmem:[%s6832_s20 + $0x70] sm:$0xff] }
 0x499   : > { %4463 = vmatprep.subr.bf16.mxu1 %v4462_v14  ;;  %v4490_v9 = vpack.c.bf16 %v1003_v8, %v1002_v63  ;;  %v3476_v63 = vld [vmem:[%s6874_s14 + $0x138] sm:$0xff] }
 0x49a   : > { %3933 = vmatmul.mubr.msk.f32.vlgmr.msra.gmra.mrb[6].mxu1 %vm382_vm2, %v755_v25  ;;  %v997_v25 = vld [vmem:[%s6832_s20 + $0x48] sm:$0xff]  ;;  %v3480_v8 = vld [vmem:[%s6874_s14 + $0x158] sm:$0xff] }
 0x49b   : > { %4461 = vmatpush3.bf16.msra.mxu0 %v4458_v62  ;;  %4465 = vmatpush3.bf16.msra.mxu1 %v4462_v14 }
 0x49c   : > { %4467 = vmatprep.subr.bf16.mxu1 %v4466_v16 }
 0x49f   : > { %4469 = vmatpush3.bf16.msra.mxu1 %v4466_v16 }
 0x4a0   : > { %4471 = vmatprep.subr.bf16.mxu1 %v4470_v19 }
 0x4a3   : > { %4473 = vmatpush3.bf16.msra.mxu1 %v4470_v19  ;;  %v3460_v19 = vld [vmem:[%s6833_s21] ss:$0 sm:$0xff] }
 0x4a4   : > { %4475 = vmatprep.subr.bf16.mxu1 %v4474_v23 }
 0x4a7   : > { %4477 = vmatpush3.bf16.msra.mxu1 %v4474_v23 }
 0x56d   : > { %v3934_v26 = vpop.f32.mrb[6].mxu1 }
 0x56e   : > { %v847_v10 = vadd.f32 %v3934_v26, %v3454_v49  ;;  %v841_v30 = vpop.f32.mrb[7].mxu1  ;;  %v998_v26 = vld [vmem:[%s6832_s20 + $0x50] sm:$0xff] }
 0x56f   : > { %v842_v13 = vadd.f32 %v3454_v49, %v841_v30  ;;  %v4478_v49 = vpack.c.bf16 %v997_v25, %v996_v24 }
 0x570   : > { %v5959_v32 = vadd.f32 %v847_v10, %v5788_v27  ;;  %v999_v10 = vld [vmem:[%s6832_s20 + $0x58] sm:$0xff] }
 0x571   : > { %v5962_v33 = vadd.f32 %v842_v13, %v5779_v21  ;;  %4479 = vmatprep.subr.bf16.mxu1 %v4478_v49  ;;  %v4482_v30 = vpack.c.bf16 %v999_v10, %v998_v26  ;;  %v1000_v13 = vld [vmem:[%s6832_s20 + $0x60] sm:$0xff] }
 0x572   : > { %v855_v34 = vsel %vm382_vm2, %v5959_v32, 0.0  ;;  %4481 = vmatpush3.bf16.msra.mxu1 %v4478_v49 }
 0x573   : > { %856 = vadd.xlane.f32.xlu1 %v855_v34  ;;  %v852_v35 = vsel %vm382_vm2, %v5962_v33, 0.0  ;;  %v1001_v34 = vld [vmem:[%s6832_s20 + $0x68] sm:$0xff]  ;;  %4483 = vmatprep.subr.bf16.mxu1 %v4482_v30 }
 0x574   : > { %853 = vadd.xlane.f32.xlu0 %v852_v35  ;;  %v4486_v35 = vpack.c.bf16 %v1001_v34, %v1000_v13 }
 0x576   : > { %4485 = vmatpush3.bf16.msra.mxu1 %v4482_v30 }
 0x577   : > { %4487 = vmatprep.subr.bf16.mxu1 %v4486_v35 }
 0x57a   : > { %4489 = vmatpush3.bf16.msra.mxu1 %v4486_v35 }
 0x57b   : > { %4491 = vmatprep.subr.bf16.mxu1 %v4490_v9 }
 0x57e   : > { %4493 = vmatpush3.bf16.msra.mxu1 %v4490_v9  ;;  %v3483_v9 = vld [vmem:[%s6874_s14 + $0x170] sm:$0xff] }
 0x57f   : > { %4527 = vmatprep.subr.bf16.mxu1 %v5861_v11 }
 0x600   : > { %v857_v37 = vpop.xlane.xlu1 %856 }
 0x601   : > { %v859_v38 = vmul.f32 0.015625, %v857_v37  ;;  %v854_v39 = vpop.xlane.xlu0 %853 }
 0x602   : > { %v858_v40 = vmul.f32 0.015625, %v854_v39 }
 0x603   : > { %v5969_v31 = vsub.f32 %v5959_v32, %v859_v38 }
 0x604   : > { %v5972_v27 = vsub.f32 %v5962_v33, %v858_v40 }
 0x605   : > { %v863_v21 = vmul.f32 %v5969_v31, %v5969_v31 }
 0x606   : > { %v862_v41 = vmul.f32 %v5972_v27, %v5972_v27 }
 0x607   : > { %v867_v42 = vsel %vm382_vm2, %v863_v21, 0.0 }
 0x608   : > { %868 = vadd.xlane.f32.xlu1 %v867_v42  ;;  %v864_v43 = vsel %vm382_vm2, %v862_v41, 0.0 }
 0x609   : > { %865 = vadd.xlane.f32.xlu0 %v864_v43 }
 0x695   : > { %v869_v37 = vpop.xlane.xlu1 %868 }
 0x696   : > { %v871_v38 = vmul.f32 0.015873017, %v869_v37  ;;  %v866_v39 = vpop.xlane.xlu0 %865 }
 0x697   : > { %v870_v40 = vmul.f32 0.015873017, %v866_v39 }
 0x698   : > { %4879 = vrsqrt.f32 %v871_v38  ;;  %vm881_vm7 = vcmp.eq.f32.partialorder %v871_v38, inf  ;;  %v884_v43 = vand.u32 2147483648, %v871_v38  ;;  %vm883_vm8 = vcmp.eq.f32.partialorder %v871_v38, 0.0 }
 0x699   : > { %4881 = vrsqrt.f32 %v870_v40  ;;  %vm874_vm9 = vcmp.eq.f32.partialorder %v870_v40, inf  ;;  %v877_v51 = vand.u32 2147483648, %v870_v40  ;;  %vm876_vm10 = vcmp.eq.f32.partialorder %v870_v40, 0.0 }
 0x6a2   : > { %v4880_v21 = vpop.eup %4879 }
 0x6a3   : > { %v4882_v41 = vpop.eup %4881  ;;  %v880_v42 = vmul.f32 %v4880_v21, %v871_v38  ;;  %v3462_v21 = vld [vmem:[%s6874_s14 + $0xc8] sm:$0xff] }
 0x6a4   : > { %v873_v44 = vmul.f32 %v4882_v41, %v870_v40  ;;  %v3465_v41 = vld [vmem:[%s6874_s14 + $0xe0] sm:$0xff] }
 0x6a5   : > { %v882_v36 = vsel %vm881_vm7, %v871_v38, %v880_v42  ;;  %v4494_v42 = vpack.c.bf16 %v3465_v41, %v3462_v21 }
 0x6a6   : > { %v885_v52 = vsel %vm883_vm8, %v884_v43, %v882_v36  ;;  %v875_v53 = vsel %vm874_vm9, %v870_v40, %v873_v44  ;;  %v3461_v43 = vld [vmem:[%s6874_s14 + $0xc0] sm:$0xff]  ;;  %v3464_v44 = vld [vmem:[%s6874_s14 + $0xd8] sm:$0xff] }
 0x6a7   : > { %v887_v54 = vadd.f32 1e-06, %v885_v52  ;;  %v878_v55 = vsel %vm876_vm10, %v877_v51, %v875_v53  ;;  %v4496_v36 = vpack.c.bf16 %v3464_v44, %v3461_v43  ;;  %4495 = vmatprep.subr.bf16.mxu0 %v4494_v42  ;;  %v3468_v51 = vld [vmem:[%s6874_s14 + $0xf8] sm:$0xff]  ;;  %v3471_v52 = vld [vmem:[%s6874_s14 + $0x110] sm:$0xff]  ;;  %v3469_v42 = vld [vmem:[%s6874_s14 + $0x100] sm:$0xff] }
 0x6a8   : > { %v886_v56 = vadd.f32 1e-06, %v878_v55  ;;  %v4498_v53 = vpack.c.bf16 %v3471_v52, %v3468_v51  ;;  %v3470_v55 = vld [vmem:[%s6874_s14 + $0x108] sm:$0xff]  ;;  %v3472_v43 = vld [vmem:[%s6874_s14 + $0x118] sm:$0xff] }
 0x6a9   : > { %4883 = vrcp.f32 %v887_v54  ;;  %v3467_v54 = vld [vmem:[%s6874_s14 + $0xf0] sm:$0xff]  ;;  %v4514_v51 = vpack.c.bf16 %v3472_v43, %v3469_v42 }
 0x6aa   : > { %4885 = vrcp.f32 %v886_v56  ;;  %v4500_v56 = vpack.c.bf16 %v3470_v55, %v3467_v54  ;;  %v3478_v54 = vld [vmem:[%s6874_s14 + $0x148] sm:$0xff] }
 0x6b3   : > { %v4884_v57 = vpop.eup %4883 }
 0x6b4   : > { %v4886_v59 = vpop.eup %4885  ;;  %v891_v62 = vmul.f32 %v4884_v57, %v5969_v31  ;;  %v3457_v31 = vld [vmem:[#allocation29] ss:$0 sm:$0xff] }
 0x6b5   : > { %v890_v60 = vmul.f32 %v4886_v59, %v5972_v27  ;;  %v3474_v57 = vld [vmem:[%s6874_s14 + $0x128] sm:$0xff]  ;;  %v3477_v59 = vld [vmem:[%s6874_s14 + $0x140] sm:$0xff] }
 0x6b7   : > { %3951 = vmatprep.mubr.msk.f32.mxu0 %vm382_vm2, %v890_v60  ;;  %v3473_v60 = vld [vmem:[%s6874_s14 + $0x120] sm:$0xff] }
 0x6b8   : > { %3952 = vmatmul.mubr.msk.f32.vlgmr.msra.gmra.mrb[4].mxu0 %vm382_vm2, %v891_v62  ;;  %v4502_v62 = vpack.c.bf16 %v3477_v59, %v3474_v57  ;;  %v3484_v57 = vld [vmem:[%s6874_s14 + $0x178] sm:$0xff] }
 0x6b9   : > { %1239 = vmatprep.mubr.f32.mxu0 %v5379_v58  ;;  %4497 = vmatpush1.bf16.msra.mxu0 %v4496_v36 }
 0x6ba   : > { %4499 = vmatprep.subr.bf16.mxu0 %v4498_v53  ;;  %v3475_v53 = vld [vmem:[%s6874_s14 + $0x130] sm:$0xff] }
 0x6bd   : > { %4501 = vmatpush1.bf16.msra.mxu0 %v4500_v56  ;;  %v4518_v56 = vpack.c.bf16 %v3478_v54, %v3475_v53 }
 0x6be   : > { %4503 = vmatprep.subr.bf16.mxu0 %v4502_v62 }
 0x78b   : > { %v3953_v27 = vpop.f32.mrb[4].mxu0 }
 0x78c   : > { %v983_v14 = vadd.f32 %v3953_v27, %v3457_v31  ;;  %v977_v15 = vpop.f32.mrb[5].mxu0  ;;  %v4506_v27 = vpack.c.bf16 %v3483_v9, %v3480_v8 }
 0x78d   : > { %v978_v16 = vadd.f32 %v3457_v31, %v977_v15  ;;  %v4504_v31 = vpack.c.bf16 %v3476_v63, %v3473_v60  ;;  %v3482_v15 = vld [vmem:[%s6874_s14 + $0x168] sm:$0xff] }
 0x78e   : > { %v987_v18 = vmax.f32 %v983_v14, 0.0  ;;  %v3479_v14 = vld [vmem:[%s6874_s14 + $0x150] sm:$0xff] }
 0x78f   : > { %v986_v17 = vmax.f32 %v978_v16, 0.0  ;;  %v3463_v16 = vld [vmem:[%s6874_s14 + $0xd0] sm:$0xff]  ;;  %4505 = vmatpush1.bf16.msra.mxu0 %v4504_v31 }
 0x790   : > { %4507 = vmatprep.subr.bf16.mxu0 %v4506_v27 }
 0x791   : > { %3986 = vmatprep.mubr.f32.mxu1 %v986_v17  ;;  %v3466_v17 = vld [vmem:[%s6874_s14 + $0xe8] sm:$0xff] }
 0x792   : > { %3987 = vmatmul.mubr.f32.vlgmr.msra.gmra.mrb[8].mxu1 %v987_v18  ;;  %v4508_v18 = vpack.c.bf16 %v3482_v15, %v3479_v14 }
 0x793   : > { %4529 = vmatpush3.bf16.msra.mxu1 %v5861_v11 }
 0x794   : > { %4531 = vmatprep.subr.bf16.mxu1 %v5865_v12  ;;  %4509 = vmatpush1.bf16.msra.mxu0 %v4508_v18 }
 0x797   : > { %4533 = vmatpush3.bf16.msra.mxu1 %v5865_v12 }
 0x798   : > { %4535 = vmatprep.subr.bf16.mxu1 %v5898_v45 }
 0x79b   : > { %4537 = vmatpush3.bf16.msra.mxu1 %v5898_v45 }
 0x79c   : > { %4539 = vmatprep.subr.bf16.mxu1 %v5904_v46 }
 0x79f   : > { %4541 = vmatpush3.bf16.msra.mxu1 %v5904_v46 }
 0x865   : > { %v3988_v20 = vpop.f32.mrb[8].mxu1 }
 0x866   : > { %v1081_v22 = vadd.f32 %v3988_v20, %v3460_v19  ;;  %v1075_v23 = vpop.f32.mrb[9].mxu1 }
 0x867   : > { %v1076_v24 = vadd.f32 %v3460_v19, %v1075_v23  ;;  %v4510_v19 = vpack.c.bf16 %v3466_v17, %v3463_v16 }
 0x868   : > { %v6069_v25 = vadd.f32 %v1081_v22, %v5959_v32 }
 0x869   : > { %v6072_v49 = vadd.f32 %v1076_v24, %v5962_v33  ;;  %4511 = vmatprep.subr.bf16.mxu0 %v4510_v19 }
 0x86a   : > { %v1089_v26 = vsel %vm382_vm2, %v6069_v25, 0.0 }
 0x86b   : > { %1090 = vadd.xlane.f32.xlu1 %v1089_v26  ;;  %v1086_v10 = vsel %vm382_vm2, %v6072_v49, 0.0 }
 0x86c   : > { %1087 = vadd.xlane.f32.xlu0 %v1086_v10 }
 0x8f8   : > { %v1091_v30 = vpop.xlane.xlu1 %1090 }
 0x8f9   : > { %v1093_v13 = vmul.f32 0.015625, %v1091_v30  ;;  %v1088_v34 = vpop.xlane.xlu0 %1087 }
 0x8fa   : > { %v1092_v35 = vmul.f32 0.015625, %v1088_v34 }
 0x8fb   : > { %v6079_v37 = vsub.f32 %v6069_v25, %v1093_v13 }
 0x8fc   : > { %v6082_v32 = vsub.f32 %v6072_v49, %v1092_v35 }
 0x8fd   : > { %v1097_v33 = vmul.f32 %v6079_v37, %v6079_v37 }
 0x8fe   : > { %v1096_v38 = vmul.f32 %v6082_v32, %v6082_v32 }
 0x8ff   : > { %v1101_v39 = vsel %vm382_vm2, %v1097_v33, 0.0 }
 0x900   : > { %1102 = vadd.xlane.f32.xlu1 %v1101_v39  ;;  %v1098_v40 = vsel %vm382_vm2, %v1096_v38, 0.0 }
 0x901   : > { %1099 = vadd.xlane.f32.xlu0 %v1098_v40 }
 0x98d   : > { %v1103_v20 = vpop.xlane.xlu1 %1102 }
 0x98e   : > { %v1105_v22 = vmul.f32 0.015873017, %v1103_v20  ;;  %v1100_v23 = vpop.xlane.xlu0 %1099 }
 0x98f   : > { %v1104_v24 = vmul.f32 0.015873017, %v1100_v23 }
 0x990   : > { %4887 = vrsqrt.f32 %v1105_v22  ;;  %vm1115_vm11 = vcmp.eq.f32.partialorder %v1105_v22, inf  ;;  %v1118_v13 = vand.u32 2147483648, %v1105_v22  ;;  %vm1117_vm12 = vcmp.eq.f32.partialorder %v1105_v22, 0.0 }
 0x991   : > { %4889 = vrsqrt.f32 %v1104_v24  ;;  %vm1108_vm13 = vcmp.eq.f32.partialorder %v1104_v24, inf  ;;  %v1111_v33 = vand.u32 2147483648, %v1104_v24  ;;  %vm1110_vm14 = vcmp.eq.f32.partialorder %v1104_v24, 0.0 }
 0x99a   : > { %v4888_v26 = vpop.eup %4887 }
 0x99b   : > { %v4890_v10 = vpop.eup %4889  ;;  %v1114_v30 = vmul.f32 %v4888_v26, %v1105_v22  ;;  %v1462_v26 = vld [vmem:[#allocation15 + $0x48] sm:$0xff] }
 0x99c   : > { %v1107_v34 = vmul.f32 %v4890_v10, %v1104_v24 }
 0x99d   : > { %v1116_v35 = vsel %vm1115_vm11, %v1105_v22, %v1114_v30  ;;  %v1463_v30 = vld [vmem:[#allocation15 + $0x50] sm:$0xff] }
 0x99e   : > { %v1109_v38 = vsel %vm1108_vm13, %v1104_v24, %v1107_v34  ;;  %v1119_v39 = vsel %vm1117_vm12, %v1118_v13, %v1116_v35  ;;  %v1461_v24 = vld [vmem:[#allocation15 + $0x40] sm:$0xff]  ;;  %v1464_v13 = vld [vmem:[#allocation15 + $0x58] sm:$0xff] }
 0x99f   : > { %v1112_v40 = vsel %vm1110_vm14, %v1111_v33, %v1109_v38  ;;  %v1121_v41 = vadd.f32 1e-06, %v1119_v39  ;;  %v4542_v10 = vpack.c.bf16 %v1462_v26, %v1461_v24  ;;  %v4546_v34 = vpack.c.bf16 %v1464_v13, %v1463_v30  ;;  %v1465_v35 = vld [vmem:[#allocation15 + $0x60] sm:$0xff]  ;;  %v1466_v33 = vld [vmem:[#allocation15 + $0x68] sm:$0xff]  ;;  %v1467_v39 = vld [vmem:[#allocation15 + $0x70] sm:$0xff] }
 0x9a0   : > { %v1120_v21 = vadd.f32 1e-06, %v1112_v40  ;;  %v4550_v38 = vpack.c.bf16 %v1466_v33, %v1465_v35  ;;  %v1468_v40 = vld [vmem:[#allocation15 + $0x78] sm:$0xff] }
 0x9a2   : > { %4891 = vrcp.f32 %v1120_v21  ;;  %v4554_v21 = vpack.c.bf16 %v1468_v40, %v1467_v39 }
 0x9a3   : > { %4893 = vrcp.f32 %v1121_v41 }
 0x9ac   : > { %v4892_v44 = vpop.eup %4891 }
 0x9ad   : > { %v1124_v36 = vmul.f32 %v4892_v44, %v6082_v32  ;;  %v4894_v52 = vpop.eup %4893  ;;  %v3481_v32 = vld [vmem:[%s6874_s14 + $0x160] sm:$0xff] }
 0x9ae   : > { %v1125_v55 = vmul.f32 %v4894_v52, %v6079_v37  ;;  %v4522_v59 = vpack.c.bf16 %v3484_v57, %v3481_v32  ;;  %v6172_v37 = vld [vmem:[%s6875_s9 + $0x1] ss:$2 sm:$0x7] }
 0x9af   : > { %3486 = vmatmul.mubr.msk.f32.vlgmr.msra.gmra.mrb[6].mxu0 %vm382_vm2, %v1124_v36  ;;  %v1157_v60 = vrot.slane %v6172_v37, %v5911_v48  ;;  %v1161_v62 = vrot.slane %v6172_v37, %v5919_v50 }
 0x9b0   : > { %4513 = vmatpush3.bf16.msra.mxu0 %v4510_v19  ;;  %1245 = vmatprep.mubr.f32.mxu0 %v5379_v58 }
 0x9b1   : > { %4515 = vmatprep.subr.bf16.mxu0 %v4514_v51 }
 0x9b3   : > { %3487 = vmatmul.mubr.msk.f32.gmra.mrb[8].mxu0 %vm382_vm2, %v1125_v55 }
 0x9b4   : > { %4517 = vmatpush3.bf16.msra.mxu0 %v4514_v51  ;;  %4005 = vmatprep.mubr.msk.f32.mxu0 %vm382_vm2, %v1124_v36 }
 0x9b5   : > { %4519 = vmatprep.subr.bf16.mxu0 %v4518_v56 }
 0x9b8   : > { %4521 = vmatpush3.bf16.msra.mxu0 %v4518_v56 }
 0x9b9   : > { %4523 = vmatprep.subr.bf16.mxu0 %v4522_v59 }
 0x9bc   : > { %4525 = vmatpush3.bf16.msra.mxu0 %v4522_v59 }
 0x9bd   : > { %4543 = vmatprep.subr.bf16.mxu0 %v4542_v10 }
 0x9bf   : > { %4006 = vmatmul.mubr.msk.f32.vlgmr.msra.gmra.mrb[10].mxu0 %vm382_vm2, %v1125_v55 }
 0x9c0   : > { %4545 = vmatpush3.bf16.msra.mxu0 %v4542_v10 }
 0x9c1   : > { %4547 = vmatprep.subr.bf16.mxu0 %v4546_v34 }
 0x9c4   : > { %4549 = vmatpush3.bf16.msra.mxu0 %v4546_v34 }
 0x9c5   : > { %4551 = vmatprep.subr.bf16.mxu0 %v4550_v38 }
 0x9c8   : > { %4553 = vmatpush3.bf16.msra.mxu0 %v4550_v38 }
 0x9c9   : > { %4555 = vmatprep.subr.bf16.mxu0 %v4554_v21 }
 0x9cc   : > { %4557 = vmatpush3.bf16.msra.mxu0 %v4554_v21 }
 0xa82   : > { %v1241_v63 = vpop.f32.mrb[6].mxu0 }
 0xa83   : > { %v1242_v8 = vadd.f32 %v1241_v63, %v1157_v60  ;;  %v1243_v9 = vpop.f32.mrb[7].mxu0 }
 0xa84   : > { %v1244_v31 = vadd.f32 %v1243_v9, %v1161_v62 }
 0xa86   : > { %v1327_v27 = vmul.f32 %v1244_v31, %v1242_v8  ;;  %v1247_v14 = vpop.f32.mrb[8].mxu0 }
 0xa87   : > { %v1248_v15 = vadd.f32 %v1247_v14, %v1157_v60  ;;  %v1249_v16 = vpop.f32.mrb[9].mxu0 }
 0xa88   : > { %v1250_v17 = vadd.f32 %v1249_v16, %v1161_v62  ;;  %4024 = vmatprep.mubr.msk.f32.mxu1 %vm382_vm2, %v1327_v27 }
 0xa89   : > { %v1329_v18 = vmul.f32 %v1248_v15, %v1244_v31 }
 0xa8a   : > { %v1328_v19 = vmul.f32 %v1250_v17, %v1242_v8  ;;  %v1330_v20 = vmul.f32 %v1250_v17, %v1248_v15 }
 0xa8c   : > { %4025 = vmatmul.mubr.msk.f32.vlgmr.msra.gmra.mrb[10].mxu1 %vm382_vm2, %v1328_v19 }
 0xa8d   : > { %4027 = vmatprep.mubr.msk.f32.mxu1 %vm382_vm2, %v1329_v18 }
 0xa90   : > { %4028 = vmatmul.mubr.msk.f32.gmra.mrb[12].mxu1 %vm382_vm2, %v1330_v20 }
 0xa92   : > { %v4007_v22 = vpop.f32.mrb[10].mxu0 }
 0xa93   : > { %v1318_v23 = vpop.f32.mrb[11].mxu0 }
 0xb5f   : > { %v4026_v41 = vpop.f32.mrb[10].mxu1 }
 0xb60   : > { %v1429_v42 = vadd.f32 %v4026_v41, %v5939_v28  ;;  %v1409_v43 = vpop.f32.mrb[11].mxu1 }
 0xb61   : > { %v1428_v44 = vadd.f32 %v1409_v43, %v5944_v29 }
 0xb63   : > { %v1430_v36 = vmax.f32 %v1428_v44, %v1429_v42  ;;  %v4029_v51 = vpop.f32.mrb[12].mxu1 }
 0xb64   : > { %v1445_v52 = vadd.f32 %v4029_v51, %v5939_v28  ;;  %v1419_v53 = vpop.f32.mrb[13].mxu1 }
 0xb65   : > { %v1431_v54 = vsub.f32 %v1428_v44, %v1430_v36  ;;  %v1434_v55 = vsub.f32 %v1429_v42, %v1430_v36  ;;  %v1444_v56 = vadd.f32 %v1419_v53, %v5944_v29  ;;  %v1165_v29 = vrot.slane %v6172_v37, %v460_v61 }
 0xb67   : > { %v1432_v32 = vmul.f32 1.442695, %v1431_v54  ;;  %v1435_v57 = vmul.f32 1.442695, %v1434_v55  ;;  %v1446_v59 = vmax.f32 %v1444_v56, %v1445_v52  ;;  %v1324_v17 = vadd.f32 %v4007_v22, %v1165_v29  ;;  %v6213_v54 = vld [vmem:[%s1833_s4] sm:$0xff] }
 0xb68   : > { %v1319_v18 = vadd.f32 %v1318_v23, %v1165_v29 }
 0xb69   : > { %4895 = vpow2.f32 %v1432_v32  ;;  %v1447_v60 = vsub.f32 %v1444_v56, %v1446_v59  ;;  %v1450_v62 = vsub.f32 %v1445_v52, %v1446_v59  ;;  %v1835_v56 = vsel %vm382_vm2, %v6213_v54, 0.0  ;;  %v3497_v32 = vld [vmem:[%s6830_s18 + $0x40] sm:$0xff] }
 0xb6a   : > { %4897 = vpow2.f32 %v1435_v57  ;;  %v3498_v57 = vld [vmem:[%s6830_s18 + $0x48] sm:$0xff] }
 0xb6b   : > { %v1448_v63 = vmul.f32 1.442695, %v1447_v60  ;;  %v1451_v8 = vmul.f32 1.442695, %v1450_v62  ;;  %v4558_v59 = vpack.c.bf16 %v3498_v57, %v3497_v32  ;;  %v3499_v60 = vld [vmem:[%s6830_s18 + $0x50] sm:$0xff]  ;;  %v3500_v62 = vld [vmem:[%s6830_s18 + $0x58] sm:$0xff] }
 0xb6c   : > { %v1859_v32 = vld [vmem:[#allocation18 + $0x20] sm:$0xff]  ;;  %v1861_v57 = vld [vmem:[#allocation18 + $0x30] sm:$0xff] }
 0xb6d   : > { %4899 = vpow2.f32 %v1448_v63  ;;  %4559 = vmatprep.subr.bf16.mxu1 %v4558_v59  ;;  %v3501_v63 = vld [vmem:[%s6830_s18 + $0x60] sm:$0xff] }
 0xb6e   : > { %4901 = vpow2.f32 %v1451_v8  ;;  %4561 = vmatpush3.bf16.msra.mxu1 %v4558_v59  ;;  %v4562_v8 = vpack.c.bf16 %v3500_v62, %v3499_v60  ;;  %v1862_v59 = vld [vmem:[#allocation18 + $0x38] sm:$0xff]  ;;  %v3508_v62 = vld [vmem:[%s6832_s20 + $0x80] sm:$0xff] }
 0xb6f   : > { %v4616_v60 = vpack.c.bf16 %v1862_v59, %v1861_v57  ;;  %v3525_v57 = vld [vmem:[#allocation20] ss:$0 sm:$0xff] }
 0xb70   : > { %4563 = vmatprep.subr.bf16.mxu1 %v4562_v8 }
 0xb72   : > { %4565 = vmatpush3.bf16.msra.mxu1 %v4562_v8  ;;  %v3510_v8 = vld [vmem:[%s6832_s20 + $0x90] sm:$0xff] }
 0xb73   : > { %v4896_v9 = vpop.eup %4895 }
 0xb74   : > { %v4898_v31 = vpop.eup %4897 }
 0xb75   : > { %v1437_v27 = vadd.f32 %v4898_v31, %v4896_v9 }
 0xb77   : > { %v4900_v28 = vpop.eup %4899  ;;  %4903 = vrcp.f32 %v1437_v27  ;;  %v3503_v27 = vld [vmem:[%s6830_s18 + $0x70] sm:$0xff] }
 0xb78   : > { %v4902_v14 = vpop.eup %4901 }
 0xb79   : > { %v1453_v15 = vadd.f32 %v4902_v14, %v4900_v28 }
 0xb7b   : > { %4905 = vrcp.f32 %v1453_v15 }
 0xb81   : > { %v4904_v16 = vpop.eup %4903 }
 0xb82   : > { %v1439_v19 = vmul.f32 %v4904_v16, %v4896_v9  ;;  %v1441_v20 = vmul.f32 %v4904_v16, %v4898_v31  ;;  %v3502_v9 = vld [vmem:[%s6830_s18 + $0x68] sm:$0xff] }
 0xb83   : > { %v4566_v31 = vpack.c.bf16 %v3502_v9, %v3501_v63  ;;  %v3509_v63 = vld [vmem:[%s6832_s20 + $0x88] sm:$0xff] }
 0xb84   : > { %v1440_v24 = vmul.f32 %v1439_v19, %v1319_v18  ;;  %v1442_v26 = vmul.f32 %v1441_v20, %v1324_v17  ;;  %v4574_v9 = vpack.c.bf16 %v3509_v63, %v3508_v62 }
 0xb85   : > { %v4906_v10 = vpop.eup %4905  ;;  %4567 = vmatprep.subr.bf16.mxu1 %v4566_v31 }
 0xb86   : > { %v1455_v30 = vmul.f32 %v4906_v10, %v4900_v28  ;;  %v1443_v13 = vadd.f32 %v1442_v26, %v1440_v24  ;;  %v1457_v34 = vmul.f32 %v4906_v10, %v4902_v14  ;;  %v3504_v28 = vld [vmem:[%s6830_s18 + $0x78] sm:$0xff]  ;;  %4569 = vmatpush3.bf16.msra.mxu1 %v4566_v31  ;;  %4575 = vmatprep.subr.bf16.mxu0 %v4574_v9 }
 0xb87   : > { %v4570_v14 = vpack.c.bf16 %v3504_v28, %v3503_v27  ;;  %v3511_v31 = vld [vmem:[%s6832_s20 + $0x98] sm:$0xff]  ;;  %v3512_v28 = vld [vmem:[%s6832_s20 + $0xa0] sm:$0xff] }
 0xb88   : > { %4046 = vmatprep.mubr.msk.f32.mxu0 %vm382_vm2, %v1443_v13  ;;  %v1456_v35 = vmul.f32 %v1455_v30, %v1319_v18  ;;  %v1458_v33 = vmul.f32 %v1457_v34, %v1324_v17  ;;  %v4578_v27 = vpack.c.bf16 %v3511_v31, %v3510_v8  ;;  %v3524_v8 = vld [vmem:[%s6833_s21 + $0x1] ss:$0 sm:$0xff] }
 0xb89   : > { %4571 = vmatprep.subr.bf16.mxu1 %v4570_v14 }
 0xb8a   : > { %v1459_v38 = vadd.f32 %v1458_v33, %v1456_v35  ;;  %4573 = vmatpush3.bf16.msra.mxu1 %v4570_v14  ;;  %v3513_v14 = vld [vmem:[%s6832_s20 + $0xa8] sm:$0xff] }
 0xb8c   : > { %4047 = vmatmul.mubr.msk.f32.vlgmr.msra.gmra.mrb[12].mxu0 %vm382_vm2, %v1459_v38 }
 0xb8d   : > { %4577 = vmatpush3.bf16.msra.mxu0 %v4574_v9 }
 0xb8e   : > { %4579 = vmatprep.subr.bf16.mxu0 %v4578_v27 }
 0xb91   : > { %4581 = vmatpush3.bf16.msra.mxu0 %v4578_v27 }
 0xc5f   : > { %v4048_v61 = vpop.f32.mrb[12].mxu0 }
 0xc60   : > { %v1552_v37 = vadd.f32 %v4048_v61, %v3494_v47  ;;  %v1546_v22 = vpop.f32.mrb[13].mxu0 }
 0xc61   : > { %v1547_v23 = vadd.f32 %v3494_v47, %v1546_v22 }
 0xc62   : > { %v6192_v39 = vadd.f32 %v1552_v37, %v6069_v25 }
 0xc63   : > { %v6195_v40 = vadd.f32 %v1547_v23, %v6072_v49 }
 0xc64   : > { %v1560_v21 = vsel %vm382_vm2, %v6192_v39, 0.0 }
 0xc65   : > { %1561 = vadd.xlane.f32.xlu1 %v1560_v21  ;;  %v1557_v41 = vsel %vm382_vm2, %v6195_v40, 0.0 }
 0xc66   : > { %1558 = vadd.xlane.f32.xlu0 %v1557_v41 }
 0xcf2   : > { %v1562_v42 = vpop.xlane.xlu1 %1561 }
 0xcf3   : > { %v1564_v43 = vmul.f32 0.015625, %v1562_v42  ;;  %v1559_v44 = vpop.xlane.xlu0 %1558 }
 0xcf4   : > { %v1563_v36 = vmul.f32 0.015625, %v1559_v44  ;;  %v1855_v44 = vld [vmem:[#allocation18] sm:$0xff] }
 0xcf5   : > { %v6202_v51 = vsub.f32 %v6192_v39, %v1564_v43 }
 0xcf6   : > { %v6205_v25 = vsub.f32 %v6195_v40, %v1563_v36  ;;  %v1856_v36 = vld [vmem:[#allocation18 + $0x8] sm:$0xff] }
 0xcf7   : > { %v1568_v49 = vmul.f32 %v6202_v51, %v6202_v51 }
 0xcf8   : > { %v1567_v52 = vmul.f32 %v6205_v25, %v6205_v25 }
 0xcf9   : > { %v1572_v53 = vsel %vm382_vm2, %v1568_v49, 0.0  ;;  %v4607_v49 = vpack.c.bf16 %v1856_v36, %v1855_v44 }
 0xcfa   : > { %1573 = vadd.xlane.f32.xlu1 %v1572_v53  ;;  %v1569_v55 = vsel %vm382_vm2, %v1567_v52, 0.0  ;;  %v5380_v52 = vmov 0.0|0.0   ;;  %v1857_v53 = vld [vmem:[#allocation18 + $0x10] sm:$0xff] }
 0xcfb   : > { %1570 = vadd.xlane.f32.xlu0 %v1569_v55  ;;  %4606 = vmatprep.subr.bf16.mxu1 %v5380_v52  ;;  %v1858_v55 = vld [vmem:[#allocation18 + $0x18] sm:$0xff] }
 0xcff   : > { %1836 = vadd.xlane.f32.xlu0 %v1835_v56  ;;  %v4610_v56 = vpack.c.bf16 %v1858_v55, %v1857_v53 }
 0xd87   : > { %v1574_v15 = vpop.xlane.xlu1 %1573 }
 0xd88   : > { %v1576_v29 = vmul.f32 0.015873017, %v1574_v15  ;;  %v1571_v16 = vpop.xlane.xlu0 %1570  ;;  %v4582_v15 = vpack.c.bf16 %v3513_v14, %v3512_v28 }
 0xd89   : > { %v1575_v17 = vmul.f32 0.015873017, %v1571_v16  ;;  %v3515_v16 = vld [vmem:[%s6832_s20 + $0xb8] sm:$0xff] }
 0xd8a   : > { %4907 = vrsqrt.f32 %v1576_v29  ;;  %vm1586_vm15 = vcmp.eq.f32.partialorder %v1576_v29, inf  ;;  %v1589_v34 = vand.u32 2147483648, %v1576_v29  ;;  %vm1588_vm0 = vcmp.eq.f32.partialorder %v1576_v29, 0.0  ;;  %4583 = vmatprep.subr.bf16.mxu0 %v4582_v15 }
 0xd8b   : > { %4909 = vrsqrt.f32 %v1575_v17  ;;  %vm1579_vm1 = vcmp.eq.f32.partialorder %v1575_v17, inf  ;;  %v1582_v38 = vand.u32 2147483648, %v1575_v17  ;;  %vm1581_vm3 = vcmp.eq.f32.partialorder %v1575_v17, 0.0  ;;  %4585 = vmatpush3.bf16.msra.mxu0 %v4582_v15 }
 0xd8c   : > { %v1837_v18 = vpop.xlane.xlu0 %1836 }
 0xd8d   : > { %v1838_v19 = vmul.f32 0.015625, %v1837_v18  ;;  %v3516_v18 = vld [vmem:[%s6832_s20 + $0xc0] sm:$0xff] }
 0xd8f   : > { %v6243_v20 = vsub.f32 %v6213_v54, %v1838_v19  ;;  %v3517_v19 = vld [vmem:[%s6832_s20 + $0xc8] sm:$0xff] }
 0xd91   : > { %v1840_v24 = vmul.f32 %v6243_v20, %v6243_v20 }
 0xd93   : > { %v1841_v26 = vsel %vm382_vm2, %v1840_v24, 0.0  ;;  %v4590_v24 = vpack.c.bf16 %v3517_v19, %v3516_v18 }
 0xd94   : > { %v4908_v10 = vpop.eup %4907  ;;  %1842 = vadd.xlane.f32.xlu1 %v1841_v26  ;;  %v3518_v26 = vld [vmem:[%s6832_s20 + $0xd0] sm:$0xff] }
 0xd95   : > { %v4910_v30 = vpop.eup %4909  ;;  %v1585_v13 = vmul.f32 %v4908_v10, %v1576_v29  ;;  %v3519_v10 = vld [vmem:[%s6832_s20 + $0xd8] sm:$0xff] }
 0xd96   : > { %v1578_v35 = vmul.f32 %v4910_v30, %v1575_v17  ;;  %v4594_v30 = vpack.c.bf16 %v3519_v10, %v3518_v26  ;;  %v1963_v26 = vld [vmem:[#allocation21 + $0x8] sm:$0xff] }
 0xd97   : > { %v1587_v33 = vsel %vm1586_vm15, %v1576_v29, %v1585_v13  ;;  %v3514_v29 = vld [vmem:[%s6832_s20 + $0xb0] sm:$0xff]  ;;  %v3520_v13 = vld [vmem:[%s6832_s20 + $0xe0] sm:$0xff] }
 0xd98   : > { %v1590_v47 = vsel %vm1588_vm0, %v1589_v34, %v1587_v33  ;;  %v1580_v61 = vsel %vm1579_vm1, %v1575_v17, %v1578_v35  ;;  %v4586_v17 = vpack.c.bf16 %v3515_v16, %v3514_v29  ;;  %v3521_v34 = vld [vmem:[%s6832_s20 + $0xe8] sm:$0xff]  ;;  %v3522_v33 = vld [vmem:[%s6832_s20 + $0xf0] sm:$0xff] }
 0xd99   : > { %v1592_v37 = vadd.f32 1e-06, %v1590_v47  ;;  %v1583_v22 = vsel %vm1581_vm3, %v1582_v38, %v1580_v61  ;;  %v4598_v35 = vpack.c.bf16 %v3521_v34, %v3520_v13  ;;  %v3523_v38 = vld [vmem:[%s6832_s20 + $0xf8] sm:$0xff]  ;;  %v1966_v34 = vld [vmem:[#allocation21 + $0x20] sm:$0xff] }
 0xd9a   : > { %v1591_v23 = vadd.f32 1e-06, %v1583_v22  ;;  %4587 = vmatprep.subr.bf16.mxu0 %v4586_v17  ;;  %v4602_v47 = vpack.c.bf16 %v3523_v38, %v3522_v33  ;;  %v1968_v38 = vld [vmem:[#allocation21 + $0x30] sm:$0xff] }
 0xd9b   : > { %4911 = vrcp.f32 %v1592_v37  ;;  %4589 = vmatpush3.bf16.msra.mxu0 %v4586_v17 }
 0xd9c   : > { %4913 = vrcp.f32 %v1591_v23  ;;  %4591 = vmatprep.subr.bf16.mxu0 %v4590_v24 }
 0xd9f   : > { %4593 = vmatpush3.bf16.msra.mxu0 %v4590_v24 }
 0xda0   : > { %4595 = vmatprep.subr.bf16.mxu0 %v4594_v30 }
 0xda3   : > { %4597 = vmatpush3.bf16.msra.mxu0 %v4594_v30  ;;  %v1965_v30 = vld [vmem:[#allocation21 + $0x18] sm:$0xff] }
 0xda4   : > { %4599 = vmatprep.subr.bf16.mxu0 %v4598_v35 }
 0xda5   : > { %v4912_v21 = vpop.eup %4911 }
 0xda6   : > { %v4914_v41 = vpop.eup %4913  ;;  %v1596_v43 = vmul.f32 %v4912_v21, %v6202_v51 }
 0xda7   : > { %v1595_v42 = vmul.f32 %v4914_v41, %v6205_v25  ;;  %v1860_v25 = vld [vmem:[#allocation18 + $0x28] sm:$0xff]  ;;  %4601 = vmatpush3.bf16.msra.mxu0 %v4598_v35 }
 0xda8   : > { %v4613_v51 = vpack.c.bf16 %v1860_v25, %v1859_v32  ;;  %4603 = vmatprep.subr.bf16.mxu0 %v4602_v47  ;;  %v1967_v35 = vld [vmem:[#allocation21 + $0x28] sm:$0xff] }
 0xda9   : > { %4065 = vmatprep.mubr.msk.f32.mxu1 %vm382_vm2, %v1595_v42  ;;  %v4625_v33 = vpack.c.bf16 %v1967_v35, %v1966_v34 }
 0xdaa   : > { %4066 = vmatmul.mubr.msk.f32.vlgmr.msra.gmra.mrb[14].mxu1 %vm382_vm2, %v1596_v43 }
 0xdab   : > { %4608 = vmatpush3.bf16.msra.mxu1 %v4607_v49  ;;  %4119 = vmatprep.mubr.msk.f32.mxu1 %vm5381_vm4, %v5379_v58  ;;  %v3505_v49 = vld [vmem:[#allocation29 + $0x1] ss:$0 sm:$0xff] }
 0xdac   : > { %4609 = vmatprep.subr.bf16.mxu1 %v5380_v52  ;;  %4605 = vmatpush3.bf16.msra.mxu0 %v4602_v47  ;;  %v1969_v47 = vld [vmem:[#allocation21 + $0x38] sm:$0xff] }
 0xdaf   : > { %4611 = vmatpush3.bf16.msra.mxu1 %v4610_v56 }
 0xdb0   : > { %4612 = vmatprep.subr.bf16.mxu1 %v5380_v52 }
 0xdb3   : > { %4614 = vmatpush3.bf16.msra.mxu1 %v4613_v51 }
 0xdb4   : > { %4615 = vmatprep.subr.bf16.mxu1 %v5380_v52 }
 0xdb7   : > { %4617 = vmatpush3.bf16.msra.mxu1 %v4616_v60 }
 0xdb8   : > { %4618 = vmatprep.subr.bf16.mxu1 %v5380_v52 }
 0xe21   : > { %v1843_v61 = vpop.xlane.xlu1 %1842 }
 0xe22   : > { %v1844_v37 = vmul.f32 0.015873017, %v1843_v61  ;;  %v4628_v61 = vpack.c.bf16 %v1969_v47, %v1968_v38 }
 0xe24   : > { %4915 = vrsqrt.f32 %v1844_v37  ;;  %vm1847_vm5 = vcmp.eq.f32.partialorder %v1844_v37, inf  ;;  %v1850_v23 = vand.u32 2147483648, %v1844_v37  ;;  %vm1849_vm6 = vcmp.eq.f32.partialorder %v1844_v37, 0.0 }
 0xe2e   : > { %v4916_v22 = vpop.eup %4915 }
 0xe2f   : > { %v1846_v21 = vmul.f32 %v4916_v22, %v1844_v37 }
 0xe31   : > { %v1848_v41 = vsel %vm1847_vm5, %v1844_v37, %v1846_v21 }
 0xe32   : > { %v1851_v42 = vsel %vm1849_vm6, %v1850_v23, %v1848_v41 }
 0xe33   : > { %v1852_v43 = vadd.f32 1e-06, %v1851_v42 }
 0xe35   : > { %4917 = vrcp.f32 %v1852_v43 }
 0xe3f   : > { %v4918_v44 = vpop.eup %4917 }
 0xe40   : > { %v1854_v36 = vmul.f32 %v4918_v44, %v6243_v20 }
 0xe42   : > { %4120 = vmatmul.mubr.msk.f32.vlgmr.msra.gmra.mrb[16].mxu1 %vm382_vm2, %v1854_v36 }
 0xe43   : > { %4138 = vmatprep.mubr.msk.f32.mxu1 %vm5381_vm4, %v5379_v58 }
 0xe7d   : > { %v4067_v53 = vpop.f32.mrb[14].mxu1 }
 0xe7e   : > { %v1689_v55 = vadd.f32 %v4067_v53, %v3505_v49  ;;  %v1683_v56 = vpop.f32.mrb[15].mxu1  ;;  %v2049_v53 = vld [vmem:[%s6876_s13 + $0x8] sm:$0xff] }
 0xe7f   : > { %v1684_v32 = vadd.f32 %v3505_v49, %v1683_v56 }
 0xe80   : > { %v1693_v51 = vmax.f32 %v1689_v55, 0.0  ;;  %v2051_v55 = vld [vmem:[%s6876_s13 + $0x18] sm:$0xff] }
 0xe81   : > { %v1692_v25 = vmax.f32 %v1684_v32, 0.0  ;;  %v4630_v56 = vpack.c.bf16 %v2051_v55, %v2049_v53  ;;  %v2048_v32 = vld [vmem:[%s6876_s13] sm:$0xff] }
 0xe83   : > { %4100 = vmatprep.mubr.f32.mxu0 %v1692_v25  ;;  %v2050_v25 = vld [vmem:[%s6876_s13 + $0x10] sm:$0xff]  ;;  %4631 = vmatprep.subr.bf16.mxu0 %v4630_v56 }
 0xe84   : > { %4101 = vmatmul.mubr.f32.vlgmr.msra.gmra.mrb[14].mxu0 %v1693_v51  ;;  %v4632_v51 = vpack.c.bf16 %v2050_v25, %v2048_v32 }
 0xe85   : > { %2146 = vmatprep.mubr.f32.mxu0 %v5379_v58 }
 0xe86   : > { %4633 = vmatpush1.bf16.msra.mxu0 %v4632_v51 }
 0xf15   : > { %v1937_v59 = vpop.f32.mrb[16].mxu1 }
 0xf16   : > { %v1938_v60 = vadd.f32 %v3525_v57, %v1937_v59  ;;  %v4121_v20 = vpop.f32.mrb[17].mxu1  ;;  %v2053_v57 = vld [vmem:[%s6876_s13 + $0x28] sm:$0xff]  ;;  %v2055_v59 = vld [vmem:[%s6876_s13 + $0x38] sm:$0xff] }
 0xf17   : > { %v2052_v20 = vld [vmem:[%s6876_s13 + $0x20] sm:$0xff] }
 0xf18   : > { %v6313_v62 = vadd.f32 %v1938_v60, %v6213_v54  ;;  %v4634_v60 = vpack.c.bf16 %v2055_v59, %v2053_v57 }
 0xf1a   : > { %v1942_v63 = vsel %vm382_vm2, %v6313_v62, 0.0  ;;  %4635 = vmatprep.subr.bf16.mxu0 %v4634_v60 }
 0xf1b   : > { %1943 = vadd.xlane.f32.xlu1 %v1942_v63  ;;  %v2054_v63 = vld [vmem:[%s6876_s13 + $0x30] sm:$0xff] }
 0xf57   : > { %v4102_v9 = vpop.f32.mrb[14].mxu0 }
 0xf58   : > { %v1782_v31 = vpop.f32.mrb[15].mxu0  ;;  %v1788_v27 = vadd.f32 %v4102_v9, %v3524_v8  ;;  %v2057_v9 = vld [vmem:[%s6876_s13 + $0x48] sm:$0xff] }
 0xf59   : > { %v1783_v28 = vadd.f32 %v3524_v8, %v1782_v31  ;;  %v4636_v8 = vpack.c.bf16 %v2054_v63, %v2052_v20  ;;  %v2059_v31 = vld [vmem:[%s6876_s13 + $0x58] sm:$0xff] }
 0xf5a   : > { %v1792_v29 = vadd.f32 %v1788_v27, %v6192_v39  ;;  %v1964_v39 = vld [vmem:[#allocation21 + $0x10] sm:$0xff]  ;;  %v2056_v27 = vld [vmem:[%s6876_s13 + $0x40] sm:$0xff] }
 0xf5b   : > { %v1791_v14 = vadd.f32 %v1783_v28, %v6195_v40  ;;  %v1962_v40 = vld [vmem:[#allocation21] sm:$0xff]  ;;  %v4622_v13 = vpack.c.bf16 %v1965_v30, %v1964_v39  ;;  %v4638_v28 = vpack.c.bf16 %v2059_v31, %v2057_v9  ;;  %4637 = vmatpush1.bf16.msra.mxu0 %v4636_v8 }
 0xf5c   : > { %v1796_v54 = vsel %vm382_vm2, %v1792_v29, 0.0  ;;  %v4619_v10 = vpack.c.bf16 %v1963_v26, %v1962_v40  ;;  %v2064_v8 = vld [vmem:[#allocation24] ss:$2 sm:$0x3]  ;;  %v3527_v9 = vld [vmem:[#allocation23] ss:$0 sm:$0xff] }
 0xf5d   : > { %v1793_v15 = vsel %vm382_vm2, %v1791_v14, 0.0  ;;  %4639 = vmatprep.subr.bf16.mxu0 %v4638_v28 }
 0xf5e   : > { %1794 = vadd.xlane.f32.xlu0 %v1793_v15  ;;  %4620 = vmatpush3.bf16.msra.mxu1 %v4619_v10  ;;  %v2061_v15 = vld [vmem:[%s6876_s13 + $0x68] sm:$0xff] }
 0xf5f   : > { %4621 = vmatprep.subr.bf16.mxu1 %v5380_v52 }
 0xf62   : > { %1797 = vadd.xlane.f32.xlu0 %v1796_v54  ;;  %4623 = vmatpush3.bf16.msra.mxu1 %v4622_v13 }
 0xf63   : > { %4624 = vmatprep.subr.bf16.mxu1 %v5380_v52 }
 0xf66   : > { %4626 = vmatpush3.bf16.msra.mxu1 %v4625_v33 }
 0xf67   : > { %4627 = vmatprep.subr.bf16.mxu1 %v5380_v52 }
 0xf6a   : > { %4629 = vmatpush3.bf16.msra.mxu1 %v4628_v61 }
 0xf6b   : > { %4647 = vmatprep.subr.bf16.mxu1 %v5861_v11 }
 0xfa8   : > { %v1944_v16 = vpop.xlane.xlu1 %1943 }
 0xfa9   : > { %v1945_v17 = vmul.f32 0.015625, %v1944_v16 }
 0xfab   : > { %v6325_v18 = vsub.f32 %v6313_v62, %v1945_v17  ;;  %v2060_v17 = vld [vmem:[%s6876_s13 + $0x60] sm:$0xff] }
 0xfad   : > { %v1947_v19 = vmul.f32 %v6325_v18, %v6325_v18 }
 0xfaf   : > { %v1948_v24 = vsel %vm382_vm2, %v1947_v19, 0.0  ;;  %v2062_v19 = vld [vmem:[%s6876_s13 + $0x70] sm:$0xff] }
 0xfb0   : > { %1949 = vadd.xlane.f32.xlu0 %v1948_v24  ;;  %v4644_v24 = vpack.c.bf16 %v2062_v19, %v2060_v17  ;;  %v2258_v17 = vld [vmem:[#allocation26] sm:$0xff]  ;;  %v2259_v19 = vld [vmem:[#allocation26 + $0x8] sm:$0xff] }
 0xfeb   : > { %v1795_v37 = vpop.xlane.xlu0 %1794 }
 0xfec   : > { %v1799_v22 = vmul.f32 0.015625, %v1795_v37 }
 0xfee   : > { %v6334_v23 = vsub.f32 %v1791_v14, %v1799_v22  ;;  %v2058_v14 = vld [vmem:[%s6876_s13 + $0x50] sm:$0xff] }
 0xfef   : > { %v1798_v21 = vpop.xlane.xlu0 %1797  ;;  %v4640_v54 = vpack.c.bf16 %v2058_v14, %v2056_v27 }
 0xff0   : > { %v1800_v41 = vmul.f32 0.015625, %v1798_v21  ;;  %v1803_v42 = vmul.f32 %v6334_v23, %v6334_v23 }
 0xff1   : > { %4641 = vmatpush1.bf16.msra.mxu0 %v4640_v54 }
 0xff2   : > { %v6338_v43 = vsub.f32 %v1792_v29, %v1800_v41  ;;  %v1805_v44 = vsel %vm382_vm2, %v1803_v42, 0.0  ;;  %v2063_v29 = vld [vmem:[%s6876_s13 + $0x78] sm:$0xff] }
 0xff3   : > { %1806 = vadd.xlane.f32.xlu1 %v1805_v44  ;;  %v4642_v16 = vpack.c.bf16 %v2063_v29, %v2061_v15 }
 0xff4   : > { %v1804_v36 = vmul.f32 %v6338_v43, %v6338_v43 }
 0xff5   : > { %4643 = vmatprep.subr.bf16.mxu0 %v4642_v16 }
 0xff6   : > { %v1808_v49 = vsel %vm382_vm2, %v1804_v36, 0.0  ;;  %4645 = vmatpush1.bf16.msra.mxu0 %v4644_v24  ;;  %v4663_v24 = vpack.c.bf16 %v2259_v19, %v2258_v17  ;;  %v3536_v19 = vld [vmem:[%s6830_s18 + $0x88] sm:$0xff] }
 0xff7   : > { %1809 = vadd.xlane.f32.xlu1 %v1808_v49  ;;  %4662 = vmatprep.subr.bf16.mxu0 %v5380_v52 }
0x103d   : > { %v1950_v40 = vpop.xlane.xlu0 %1949 }
0x103e   : > { %v1951_v26 = vmul.f32 0.015873017, %v1950_v40  ;;  %v2260_v40 = vld [vmem:[#allocation26 + $0x10] sm:$0xff] }
0x1040   : > { %4919 = vrsqrt.f32 %v1951_v26  ;;  %vm1954_vm7 = vcmp.eq.f32.partialorder %v1951_v26, inf  ;;  %v1957_v30 = vand.u32 2147483648, %v1951_v26  ;;  %vm1956_vm8 = vcmp.eq.f32.partialorder %v1951_v26, 0.0 }
0x104a   : > { %v4920_v10 = vpop.eup %4919 }
0x104b   : > { %v1953_v39 = vmul.f32 %v4920_v10, %v1951_v26 }
0x104d   : > { %v1955_v13 = vsel %vm1954_vm7, %v1951_v26, %v1953_v39  ;;  %v2261_v26 = vld [vmem:[#allocation26 + $0x18] sm:$0xff]  ;;  %v2262_v39 = vld [vmem:[#allocation26 + $0x20] sm:$0xff] }
0x104e   : > { %v1958_v34 = vsel %vm1956_vm8, %v1957_v30, %v1955_v13  ;;  %v4666_v10 = vpack.c.bf16 %v2261_v26, %v2260_v40  ;;  %v2263_v30 = vld [vmem:[#allocation26 + $0x28] sm:$0xff]  ;;  %v3538_v26 = vld [vmem:[%s6830_s18 + $0x98] sm:$0xff]  ;;  %vm5383_vm8 = vmmov (%p290_p13), 0  }
0x104f   : > { %v1959_v35 = vadd.f32 1e-06, %v1958_v34  ;;  %v4669_v13 = vpack.c.bf16 %v2263_v30, %v2262_v39  ;;  %v2264_v34 = vld [vmem:[#allocation26 + $0x30] sm:$0xff]  ;;  %v3539_v39 = vld [vmem:[%s6830_s18 + $0xa0] sm:$0xff]  ;;  %v3540_v30 = vld [vmem:[%s6830_s18 + $0xa8] sm:$0xff] }
0x1050   : > { %v3537_v40 = vld [vmem:[%s6830_s18 + $0x90] sm:$0xff] }
0x1051   : > { %4921 = vrcp.f32 %v1959_v35  ;;  %v2265_v35 = vld [vmem:[#allocation26 + $0x38] sm:$0xff] }
0x105b   : > { %v4922_v33 = vpop.eup %4921 }
0x105c   : > { %v1961_v38 = vmul.f32 %v4922_v33, %v6325_v18  ;;  %v4672_v33 = vpack.c.bf16 %v2265_v35, %v2264_v34  ;;  %v3541_v34 = vld [vmem:[%s6830_s18 + $0xb0] sm:$0xff]  ;;  %v3542_v35 = vld [vmem:[%s6830_s18 + $0xb8] sm:$0xff] }
0x105e   : > { %4139 = vmatmul.mubr.msk.f32.vlgmr.msra.gmra.mrb[18].mxu1 %vm382_vm2, %v1961_v38 }
0x105f   : > { %4649 = vmatpush3.bf16.msra.mxu1 %v5861_v11 }
0x1060   : > { %4651 = vmatprep.subr.bf16.mxu1 %v5865_v12 }
0x1063   : > { %4653 = vmatpush3.bf16.msra.mxu1 %v5865_v12 }
0x1064   : > { %4655 = vmatprep.subr.bf16.mxu1 %v5898_v45 }
0x1067   : > { %4657 = vmatpush3.bf16.msra.mxu1 %v5898_v45 }
0x1068   : > { %4659 = vmatprep.subr.bf16.mxu1 %v5904_v46 }
0x106b   : > { %4661 = vmatpush3.bf16.msra.mxu1 %v5904_v46 }
0x106c   : > { %4674 = vmatprep.subr.bf16.mxu1 %v5380_v52 }
0x1080   : > { %v1807_v47 = vpop.xlane.xlu1 %1806 }
0x1081   : > { %v1811_v18 = vmul.f32 0.015873017, %v1807_v47  ;;  %v6427_v47 = vld [vmem:[%s380_s10] sm:$0xff] }
0x1083   : > { %4923 = vrsqrt.f32 %v1811_v18  ;;  %vm1815_vm9 = vcmp.eq.f32.partialorder %v1811_v18, inf  ;;  %v1818_v41 = vand.u32 2147483648, %v1811_v18  ;;  %vm1817_vm10 = vcmp.eq.f32.partialorder %v1811_v18, 0.0 }
0x1084   : > { %v1810_v61 = vpop.xlane.xlu1 %1809 }
0x1085   : > { %v1812_v37 = vmul.f32 0.015873017, %v1810_v61 }
0x1087   : > { %4925 = vrsqrt.f32 %v1812_v37  ;;  %vm1822_vm11 = vcmp.eq.f32.partialorder %v1812_v37, inf  ;;  %v1825_v55 = vand.u32 2147483648, %v1812_v37  ;;  %vm1824_vm12 = vcmp.eq.f32.partialorder %v1812_v37, 0.0 }
0x108d   : > { %v4924_v22 = vpop.eup %4923 }
0x108e   : > { %v1814_v21 = vmul.f32 %v4924_v22, %v1811_v18 }
0x1090   : > { %v1816_v42 = vsel %vm1815_vm9, %v1811_v18, %v1814_v21  ;;  %vm3379_vm9 = vcmask (%p290_p13), 24576  }
0x1091   : > { %v4926_v44 = vpop.eup %4925  ;;  %v1819_v36 = vsel %vm1817_vm10, %v1818_v41, %v1816_v42 }
0x1092   : > { %v1827_v49 = vadd.f32 1e-06, %v1819_v36  ;;  %v1821_v53 = vmul.f32 %v4926_v44, %v1812_v37 }
0x1094   : > { %4927 = vrcp.f32 %v1827_v49  ;;  %v1823_v56 = vsel %vm1822_vm11, %v1812_v37, %v1821_v53  ;;  %v6432_v37 = vld [vmem:[%s378_s17] sm:$0xff] }
0x1095   : > { %v1826_v32 = vsel %vm1824_vm12, %v1825_v55, %v1823_v56  ;;  %v2073_v56 = vrot.slane %v2064_v8, %v5919_v50 }
0x1096   : > { %v1828_v25 = vadd.f32 1e-06, %v1826_v32 }
0x1098   : > { %4929 = vrcp.f32 %v1828_v25 }
0x109e   : > { %v4928_v51 = vpop.eup %4927 }
0x109f   : > { %v6404_v57 = vmul.f32 %v4928_v51, %v6334_v23  ;;  %v2069_v23 = vrot.slane %v2064_v8, %v5911_v48 }
0x10a1   : > { %3529 = vmatmul.mubr.msk.f32.vlgmr.msra.gmra.mrb[16].mxu0 %vm382_vm2, %v6404_v57 }
0x10a2   : > { %v4930_v59 = vpop.eup %4929  ;;  %2152 = vmatprep.mubr.f32.mxu0 %v5379_v58  ;;  %4664 = vmatpush3.bf16.msra.mxu0 %v4663_v24 }
0x10a3   : > { %v6410_v60 = vmul.f32 %v4930_v59, %v6338_v43  ;;  %4665 = vmatprep.subr.bf16.mxu0 %v5380_v52 }
0x10a5   : > { %3530 = vmatmul.mubr.msk.f32.gmra.mrb[18].mxu0 %vm382_vm2, %v6410_v60 }
0x10a6   : > { %4176 = vmatprep.mubr.msk.f32.mxu0 %vm5381_vm4, %v5379_v58  ;;  %4667 = vmatpush3.bf16.msra.mxu0 %v4666_v10  ;;  %v4678_v10 = vpack.c.bf16 %v3538_v26, %v3537_v40  ;;  %v3567_v26 = vld [vmem:[%s6876_s13 + $0x88] sm:$0xff] }
0x10a7   : > { %4668 = vmatprep.subr.bf16.mxu0 %v5380_v52 }
0x10aa   : > { %4670 = vmatpush3.bf16.msra.mxu0 %v4669_v13  ;;  %v4681_v13 = vpack.c.bf16 %v3540_v30, %v3539_v39  ;;  %v3543_v39 = vld [vmem:[#allocation29 + $0x2] ss:$0 sm:$0xff]  ;;  %v3566_v30 = vld [vmem:[%s6876_s13 + $0x80] sm:$0xff] }
0x10ab   : > { %4671 = vmatprep.subr.bf16.mxu0 %v5380_v52 }
0x10ae   : > { %4673 = vmatpush3.bf16.msra.mxu0 %v4672_v33  ;;  %v4684_v33 = vpack.c.bf16 %v3542_v35, %v3541_v34  ;;  %v3571_v35 = vld [vmem:[%s6876_s13 + $0xa8] sm:$0xff] }
0x10af   : > { %4686 = vmatprep.subr.bf16.mxu0 %v5380_v52 }
0x1131   : > { %v2044_v20 = vpop.f32.mrb[18].mxu1 }
0x1132   : > { %v4140_v63 = vpop.f32.mrb[19].mxu1  ;;  %v2045_v27 = vadd.f32 %v3527_v9, %v2044_v20 }
0x1174   : > { %v2148_v31 = vpop.f32.mrb[16].mxu0 }
0x1175   : > { %v2149_v28 = vadd.f32 %v2148_v31, %v2069_v23  ;;  %v2150_v14 = vpop.f32.mrb[17].mxu0  ;;  %v3533_v31 = vld [vmem:[#allocation27] ss:$0 sm:$0xff] }
0x1176   : > { %v2151_v25 = vadd.f32 %v2150_v14, %v2073_v56 }
0x1177   : > { %v2159_v15 = vmul.f32 %v2149_v28, %v2045_v27 }
0x1178   : > { %v2154_v29 = vpop.f32.mrb[18].mxu0 }
0x1179   : > { %v2155_v43 = vadd.f32 %v2154_v29, %v2069_v23  ;;  %v2156_v54 = vpop.f32.mrb[19].mxu0  ;;  %4157 = vmatprep.mubr.msk.f32.mxu1 %vm382_vm2, %v2159_v15 }
0x117a   : > { %v2157_v51 = vadd.f32 %v2156_v54, %v2073_v56  ;;  %v3553_v56 = vld [vmem:[%s6832_s20 + $0x140] sm:$0xff] }
0x117b   : > { %v2160_v16 = vmul.f32 %v2155_v43, %v2045_v27 }
0x117d   : > { %4158 = vmatmul.mubr.msk.f32.vlgmr.msra.gmra.mrb[20].mxu1 %vm382_vm2, %v2160_v16 }
0x117e   : > { %4195 = vmatprep.mubr.msk.f32.mxu1 %vm5381_vm4, %v5379_v58 }
0x1250   : > { %v4159_v38 = vpop.f32.mrb[20].mxu1 }
0x1251   : > { %v2243_v18 = vadd.f32 %v6427_v47, %v4159_v38  ;;  %v2233_v61 = vpop.f32.mrb[21].mxu1  ;;  %v3545_v38 = vld [vmem:[%s6832_s20 + $0x100] sm:$0xff] }
0x1252   : > { %v2242_v22 = vadd.f32 %v6432_v37, %v2233_v61  ;;  %v3547_v61 = vld [vmem:[%s6832_s20 + $0x110] sm:$0xff] }
0x1254   : > { %v2244_v21 = vmax.f32 %v2242_v22, %v2243_v18 }
0x1256   : > { %v2245_v41 = vsub.f32 %v2242_v22, %v2244_v21  ;;  %v2248_v42 = vsub.f32 %v2243_v18, %v2244_v21  ;;  %v3546_v18 = vld [vmem:[%s6832_s20 + $0x108] sm:$0xff]  ;;  %v3548_v21 = vld [vmem:[%s6832_s20 + $0x118] sm:$0xff] }
0x1257   : > { %v4687_v22 = vpack.c.bf16 %v3546_v18, %v3545_v38 }
0x1258   : > { %v2246_v44 = vmul.f32 1.442695, %v2245_v41  ;;  %v2249_v36 = vmul.f32 1.442695, %v2248_v42  ;;  %v4690_v41 = vpack.c.bf16 %v3548_v21, %v3547_v61  ;;  %v3549_v42 = vld [vmem:[%s6832_s20 + $0x120] sm:$0xff] }
0x125a   : > { %4931 = vpow2.f32 %v2246_v44  ;;  %v3550_v44 = vld [vmem:[%s6832_s20 + $0x128] sm:$0xff] }
0x125b   : > { %4933 = vpow2.f32 %v2249_v36  ;;  %v4693_v36 = vpack.c.bf16 %v3550_v44, %v3549_v42  ;;  %v3572_v42 = vld [vmem:[%s6876_s13 + $0xb0] sm:$0xff]  ;;  %v3575_v44 = vld [vmem:[%s6876_s13 + $0xc8] sm:$0xff] }
0x1264   : > { %v4932_v49 = vpop.eup %4931 }
0x1265   : > { %v4934_v53 = vpop.eup %4933 }
0x1266   : > { %v2251_v55 = vadd.f32 %v4934_v53, %v4932_v49 }
0x1268   : > { %4935 = vrcp.f32 %v2251_v55 }
0x1272   : > { %v4936_v32 = vpop.eup %4935 }
0x1273   : > { %v2253_v59 = vmul.f32 %v4936_v32, %v4932_v49  ;;  %v2255_v20 = vmul.f32 %v4936_v32, %v4934_v53  ;;  %v3551_v49 = vld [vmem:[%s6832_s20 + $0x130] sm:$0xff]  ;;  %v3552_v53 = vld [vmem:[%s6832_s20 + $0x138] sm:$0xff]  ;;  %v3554_v32 = vld [vmem:[%s6832_s20 + $0x148] sm:$0xff] }
0x1274   : > { %v4696_v55 = vpack.c.bf16 %v3552_v53, %v3551_v49 }
0x1275   : > { %v2254_v63 = vmul.f32 %v2253_v59, %v2151_v25  ;;  %v2256_v23 = vmul.f32 %v2255_v20, %v2157_v51  ;;  %v4699_v25 = vpack.c.bf16 %v3554_v32, %v3553_v56  ;;  %v3555_v51 = vld [vmem:[%s6832_s20 + $0x150] sm:$0xff]  ;;  %v3556_v59 = vld [vmem:[%s6832_s20 + $0x158] sm:$0xff]  ;;  %v3579_v32 = vld [vmem:[%s6876_s13 + $0xe8] sm:$0xff] }
0x1276   : > { %v4702_v20 = vpack.c.bf16 %v3556_v59, %v3555_v51  ;;  %v3576_v56 = vld [vmem:[%s6876_s13 + $0xd0] sm:$0xff] }
0x1277   : > { %v2257_v9 = vadd.f32 %v2256_v23, %v2254_v63  ;;  %v3557_v63 = vld [vmem:[%s6832_s20 + $0x160] sm:$0xff]  ;;  %v3558_v23 = vld [vmem:[%s6832_s20 + $0x168] sm:$0xff] }
0x1279   : > { %4177 = vmatmul.mubr.msk.f32.vlgmr.msra.gmra.mrb[20].mxu0 %vm382_vm2, %v2257_v9  ;;  %v4705_v9 = vpack.c.bf16 %v3558_v23, %v3557_v63  ;;  %v3580_v63 = vld [vmem:[%s6876_s13 + $0xf0] sm:$0xff] }
0x127a   : > { %4230 = vmatprep.mubr.msk.f32.mxu0 %vm5381_vm4, %v5379_v58  ;;  %4688 = vmatpush3.bf16.msra.mxu0 %v4687_v22 }
0x127b   : > { %4689 = vmatprep.subr.bf16.mxu0 %v5380_v52 }
0x127e   : > { %4691 = vmatpush3.bf16.msra.mxu0 %v4690_v41  ;;  %v3570_v41 = vld [vmem:[%s6876_s13 + $0xa0] sm:$0xff] }
0x127f   : > { %4692 = vmatprep.subr.bf16.mxu0 %v5380_v52  ;;  %v4740_v49 = vpack.c.bf16 %v3572_v42, %v3570_v41 }
0x1282   : > { %4694 = vmatpush3.bf16.msra.mxu0 %v4693_v36  ;;  %v3577_v36 = vld [vmem:[%s6876_s13 + $0xd8] sm:$0xff] }
0x1283   : > { %4695 = vmatprep.subr.bf16.mxu0 %v5380_v52  ;;  %v4742_v53 = vpack.c.bf16 %v3577_v36, %v3575_v44 }
0x1286   : > { %4697 = vmatpush3.bf16.msra.mxu0 %v4696_v55  ;;  %v3574_v55 = vld [vmem:[%s6876_s13 + $0xc0] sm:$0xff] }
0x1287   : > { %4698 = vmatprep.subr.bf16.mxu0 %v5380_v52  ;;  %v4744_v51 = vpack.c.bf16 %v3576_v56, %v3574_v55 }
0x128a   : > { %4700 = vmatpush3.bf16.msra.mxu0 %v4699_v25  ;;  %v3581_v25 = vld [vmem:[%s6876_s13 + $0xf8] sm:$0xff] }
0x128b   : > { %4701 = vmatprep.subr.bf16.mxu0 %v5380_v52  ;;  %v4746_v59 = vpack.c.bf16 %v3581_v25, %v3579_v32  ;;  %v3562_v25 = vld [vmem:[#allocation20 + $0x1] ss:$0 sm:$0xff] }
0x128e   : > { %4703 = vmatpush3.bf16.msra.mxu0 %v4702_v20  ;;  %v3578_v20 = vld [vmem:[%s6876_s13 + $0xe0] sm:$0xff] }
0x128f   : > { %4704 = vmatprep.subr.bf16.mxu0 %v5380_v52  ;;  %v4748_v23 = vpack.c.bf16 %v3580_v63, %v3578_v20 }
0x1292   : > { %4706 = vmatpush3.bf16.msra.mxu0 %v4705_v9  ;;  %v3561_v9 = vld [vmem:[%s6833_s21 + $0x2] ss:$0 sm:$0xff] }
0x1293   : > { %4707 = vmatprep.subr.bf16.mxu0 %v5380_v52 }
0x134c   : > { %v2340_v27 = vpop.f32.mrb[20].mxu0 }
0x134d   : > { %v2341_v28 = vadd.f32 %v3533_v31, %v2340_v27  ;;  %v4178_v15 = vpop.f32.mrb[21].mxu0 }
0x134f   : > { %v6440_v29 = vadd.f32 %v2341_v28, %v6313_v62  ;;  %v3535_v62 = vld [vmem:[%s6830_s18 + $0x80] sm:$0xff] }
0x1350   : > { %v4675_v24 = vpack.c.bf16 %v3536_v19, %v3535_v62  ;;  %v3559_v19 = vld [vmem:[%s6832_s20 + $0x170] sm:$0xff] }
0x1351   : > { %v2345_v8 = vsel %vm382_vm2, %v6440_v29, 0.0 }
0x1352   : > { %2346 = vadd.xlane.f32.xlu0 %v2345_v8  ;;  %4676 = vmatpush3.bf16.msra.mxu1 %v4675_v24  ;;  %v3560_v24 = vld [vmem:[%s6832_s20 + $0x178] sm:$0xff] }
0x1353   : > { %4677 = vmatprep.subr.bf16.mxu1 %v5380_v52  ;;  %v4708_v40 = vpack.c.bf16 %v3560_v24, %v3559_v19 }
0x1355   : > { %4709 = vmatpush3.bf16.msra.mxu0 %v4708_v40 }
0x1356   : > { %4679 = vmatpush3.bf16.msra.mxu1 %v4678_v10 }
0x1357   : > { %4680 = vmatprep.subr.bf16.mxu1 %v5380_v52 }
0x135a   : > { %4682 = vmatpush3.bf16.msra.mxu1 %v4681_v13  ;;  %v3568_v13 = vld [vmem:[%s6876_s13 + $0x90] sm:$0xff] }
0x135b   : > { %4683 = vmatprep.subr.bf16.mxu1 %v5380_v52  ;;  %v4736_v61 = vpack.c.bf16 %v3568_v13, %v3566_v30  ;;  %v2569_v30 = vld [vmem:[#allocation18 + $0x50] sm:$0xff]  ;;  %v2570_v13 = vld [vmem:[#allocation18 + $0x58] sm:$0xff] }
0x135e   : > { %4685 = vmatpush3.bf16.msra.mxu1 %v4684_v33  ;;  %v3573_v33 = vld [vmem:[%s6876_s13 + $0xb8] sm:$0xff] }
0x135f   : > { %4710 = vmatprep.subr.bf16.mxu1 %v5380_v52  ;;  %v4738_v21 = vpack.c.bf16 %v3573_v33, %v3571_v35  ;;  %v4714_v35 = vpack.c.bf16 %v2570_v13, %v2569_v30  ;;  %v2572_v33 = vld [vmem:[#allocation18 + $0x68] sm:$0xff] }
0x13df   : > { %v2347_v14 = vpop.xlane.xlu0 %2346 }
0x13e0   : > { %v2348_v43 = vmul.f32 0.015625, %v2347_v14 }
0x13e2   : > { %v6445_v54 = vsub.f32 %v6440_v29, %v2348_v43 }
0x13e4   : > { %v2350_v16 = vmul.f32 %v6445_v54, %v6445_v54 }
0x13e6   : > { %v2351_v17 = vsel %vm382_vm2, %v2350_v16, 0.0 }
0x13e7   : > { %2352 = vadd.xlane.f32.xlu1 %v2351_v17 }
0x1474   : > { %v2353_v31 = vpop.xlane.xlu1 %2352 }
0x1475   : > { %v2354_v27 = vmul.f32 0.015873017, %v2353_v31 }
0x1477   : > { %4937 = vrsqrt.f32 %v2354_v27  ;;  %vm2357_vm13 = vcmp.eq.f32.partialorder %v2354_v27, inf  ;;  %v2360_v8 = vand.u32 2147483648, %v2354_v27  ;;  %vm2359_vm14 = vcmp.eq.f32.partialorder %v2354_v27, 0.0 }
0x1481   : > { %v4938_v28 = vpop.eup %4937 }
0x1482   : > { %v2356_v15 = vmul.f32 %v4938_v28, %v2354_v27 }
0x1484   : > { %v2358_v14 = vsel %vm2357_vm13, %v2354_v27, %v2356_v15 }
0x1485   : > { %v2361_v43 = vsel %vm2359_vm14, %v2360_v8, %v2358_v14 }
0x1486   : > { %v2362_v16 = vadd.f32 1e-06, %v2361_v43 }
0x1488   : > { %4939 = vrcp.f32 %v2362_v16 }
0x1492   : > { %v4940_v17 = vpop.eup %4939 }
0x1493   : > { %v2364_v62 = vmul.f32 %v4940_v17, %v6445_v54  ;;  %v3569_v54 = vld [vmem:[%s6876_s13 + $0x98] sm:$0xff] }
0x1494   : > { %v4734_v10 = vpack.c.bf16 %v3569_v54, %v3567_v26 }
0x1495   : > { %4196 = vmatmul.mubr.msk.f32.vlgmr.msra.gmra.mrb[22].mxu1 %vm382_vm2, %v2364_v62 }
0x1496   : > { %4249 = vmatprep.mubr.msk.f32.mxu1 %vm5381_vm4, %v5379_v58  ;;  %4735 = vmatprep.subr.bf16.mxu0 %v4734_v10  ;;  %v2567_v10 = vld [vmem:[#allocation18 + $0x40] sm:$0xff] }
0x1568   : > { %v2448_v34 = vpop.f32.mrb[22].mxu1 }
0x1569   : > { %v2449_v38 = vadd.f32 %v3543_v39, %v2448_v34  ;;  %v4197_v18 = vpop.f32.mrb[23].mxu1  ;;  %v2568_v39 = vld [vmem:[#allocation18 + $0x48] sm:$0xff]  ;;  %v2571_v34 = vld [vmem:[#allocation18 + $0x60] sm:$0xff] }
0x156a   : > { %v2573_v18 = vld [vmem:[#allocation18 + $0x70] sm:$0xff] }
0x156b   : > { %v2452_v22 = vmax.f32 %v2449_v38, 0.0  ;;  %v4717_v38 = vpack.c.bf16 %v2572_v33, %v2571_v34 }
0x156d   : > { %4231 = vmatmul.mubr.f32.vlgmr.msra.gmra.mrb[22].mxu0 %v2452_v22 }
0x156e   : > { %4737 = vmatpush1.bf16.msra.mxu0 %v4736_v61  ;;  %2855 = vmatprep.mubr.f32.mxu0 %v5379_v58  ;;  %v2574_v61 = vld [vmem:[#allocation18 + $0x78] sm:$0xff] }
0x156f   : > { %4739 = vmatprep.subr.bf16.mxu0 %v4738_v21  ;;  %v4720_v22 = vpack.c.bf16 %v2574_v61, %v2573_v18 }
0x1572   : > { %4741 = vmatpush1.bf16.msra.mxu0 %v4740_v49 }
0x1573   : > { %4743 = vmatprep.subr.bf16.mxu0 %v4742_v53 }
0x1576   : > { %4745 = vmatpush1.bf16.msra.mxu0 %v4744_v51 }
0x1577   : > { %4747 = vmatprep.subr.bf16.mxu0 %v4746_v59 }
0x157a   : > { %4749 = vmatpush1.bf16.msra.mxu0 %v4748_v23 }
0x157b   : > { %4766 = vmatprep.subr.bf16.mxu0 %v5380_v52 }
0x157d   : > { %3582 = vmatmul.mubr.msk.f32.vlgmr.msra.gmra.mrb[24].mxu0 %vm382_vm2, %v6404_v57  ;;  %v6599_v57 = vld [vmem:[#allocation24 + $0x1] ss:$2 sm:$0x3] }
0x157e   : > { %2861 = vmatprep.mubr.f32.mxu0 %v5379_v58 }
0x1581   : > { %3583 = vmatmul.mubr.msk.f32.gmra.mrb[26].mxu0 %vm382_vm2, %v6410_v60  ;;  %v2788_v60 = vrot.slane %v6599_v57, %v5919_v50  ;;  %v4711_v50 = vpack.c.bf16 %v2568_v39, %v2567_v10  ;;  %v2681_v10 = vld [vmem:[#allocation21 + $0x70] sm:$0xff]  ;;  %v2682_v39 = vld [vmem:[#allocation21 + $0x78] sm:$0xff] }
0x1582   : > { %4306 = vmatprep.mubr.msk.f32.mxu0 %vm5381_vm4, %v5379_v58 }
0x1583   : > { %4712 = vmatpush3.bf16.msra.mxu1 %v4711_v50  ;;  %v4732_v50 = vpack.c.bf16 %v2682_v39, %v2681_v10 }
0x1584   : > { %4713 = vmatprep.subr.bf16.mxu1 %v5380_v52 }
0x1587   : > { %4715 = vmatpush3.bf16.msra.mxu1 %v4714_v35 }
0x1588   : > { %4716 = vmatprep.subr.bf16.mxu1 %v5380_v52 }
0x158b   : > { %4718 = vmatpush3.bf16.msra.mxu1 %v4717_v38 }
0x158c   : > { %4719 = vmatprep.subr.bf16.mxu1 %v5380_v52 }
0x158f   : > { %4721 = vmatpush3.bf16.msra.mxu1 %v4720_v22 }
0x1590   : > { %4722 = vmatprep.subr.bf16.mxu1 %v5380_v52 }
0x1640   : > { %v2541_v31 = vpop.f32.mrb[22].mxu0 }
0x1641   : > { %v2542_v27 = vadd.f32 %v3561_v9, %v2541_v31  ;;  %v4232_v28 = vpop.f32.mrb[23].mxu0 }
0x1643   : > { %v2545_v15 = vadd.f32 %v2542_v27, %v6440_v29 }
0x1645   : > { %v2546_v8 = vsel %vm382_vm2, %v2545_v15, 0.0 }
0x1646   : > { %2547 = vadd.xlane.f32.xlu0 %v2546_v8 }
0x1650   : > { %v6603_v14 = vpop.f32.mrb[24].mxu0 }
0x1651   : > { %v2859_v43 = vpop.f32.mrb[25].mxu0 }
0x1652   : > { %v6605_v16 = vadd.f32 %v2859_v43, %v2788_v60  ;;  %v2676_v43 = vld [vmem:[#allocation21 + $0x48] sm:$0xff] }
0x1654   : > { %v6607_v17 = vpop.f32.mrb[26].mxu0 }
0x1655   : > { %v2865_v62 = vpop.f32.mrb[27].mxu0 }
0x1656   : > { %v6609_v19 = vadd.f32 %v2865_v62, %v2788_v60  ;;  %v2675_v60 = vld [vmem:[#allocation21 + $0x40] sm:$0xff] }
0x1657   : > { %v4723_v62 = vpack.c.bf16 %v2676_v43, %v2675_v60 }
0x16d3   : > { %v2548_v24 = vpop.xlane.xlu0 %2547 }
0x16d4   : > { %v2549_v29 = vmul.f32 0.015625, %v2548_v24  ;;  %v2678_v24 = vld [vmem:[#allocation21 + $0x58] sm:$0xff] }
0x16d6   : > { %v2550_v40 = vsub.f32 %v2545_v15, %v2549_v29  ;;  %v2679_v29 = vld [vmem:[#allocation21 + $0x60] sm:$0xff] }
0x16d8   : > { %v2551_v26 = vmul.f32 %v2550_v40, %v2550_v40 }
0x16da   : > { %v2552_v54 = vsel %vm382_vm2, %v2551_v26, 0.0  ;;  %v2680_v26 = vld [vmem:[#allocation21 + $0x68] sm:$0xff] }
0x16db   : > { %2553 = vadd.xlane.f32.xlu1 %v2552_v54  ;;  %v4729_v54 = vpack.c.bf16 %v2680_v26, %v2679_v29 }
0x1768   : > { %v2554_v21 = vpop.xlane.xlu1 %2553 }
0x1769   : > { %v2555_v41 = vmul.f32 0.015873017, %v2554_v21 }
0x176b   : > { %4941 = vrsqrt.f32 %v2555_v41  ;;  %vm2558_vm15 = vcmp.eq.f32.partialorder %v2555_v41, inf  ;;  %v2561_v36 = vand.u32 2147483648, %v2555_v41  ;;  %vm2560_vm0 = vcmp.eq.f32.partialorder %v2555_v41, 0.0 }
0x1775   : > { %v4942_v42 = vpop.eup %4941 }
0x1776   : > { %v2557_v44 = vmul.f32 %v4942_v42, %v2555_v41  ;;  %v3564_v42 = vld [vmem:[#allocation23 + $0x1] ss:$0 sm:$0xff] }
0x1778   : > { %v2559_v49 = vsel %vm2558_vm15, %v2555_v41, %v2557_v44  ;;  %v2784_v41 = vrot.slane %v6599_v57, %v5911_v48  ;;  %v2970_v57 = vld [vmem:[#allocation26 + $0x50] sm:$0xff] }
0x1779   : > { %v2562_v53 = vsel %vm2560_vm0, %v2561_v36, %v2559_v49 }
0x177a   : > { %v2563_v55 = vadd.f32 1e-06, %v2562_v53  ;;  %v2864_v36 = vadd.f32 %v6607_v17, %v2784_v41 }
0x177c   : > { %4943 = vrcp.f32 %v2563_v55 }
0x1786   : > { %v4944_v56 = vpop.eup %4943 }
0x1787   : > { %v2565_v32 = vmul.f32 %v4944_v56, %v2550_v40  ;;  %v2972_v56 = vld [vmem:[#allocation26 + $0x60] sm:$0xff] }
0x1789   : > { %4250 = vmatmul.mubr.msk.f32.vlgmr.msra.gmra.mrb[24].mxu1 %vm382_vm2, %v2565_v32  ;;  %v2973_v32 = vld [vmem:[#allocation26 + $0x68] sm:$0xff] }
0x178a   : > { %4268 = vmatprep.mubr.msk.f32.mxu1 %vm5381_vm4, %v5379_v58  ;;  %4724 = vmatpush3.bf16.msra.mxu1 %v4723_v62 }
0x178b   : > { %4725 = vmatprep.subr.bf16.mxu1 %v5380_v52 }
0x185c   : > { %v2649_v51 = vpop.f32.mrb[24].mxu1 }
0x185d   : > { %v2650_v59 = vadd.f32 %v3562_v25, %v2649_v51  ;;  %v4251_v20 = vpop.f32.mrb[25].mxu1  ;;  %v4773_v25 = vpack.c.bf16 %v2973_v32, %v2972_v56  ;;  %v2974_v51 = vld [vmem:[#allocation26 + $0x70] sm:$0xff] }
0x185e   : > { %v3604_v32 = vld [vmem:[%s6832_s20 + $0x1b0] sm:$0xff] }
0x185f   : > { %v6619_v63 = vadd.f32 %v2650_v59, %v2545_v15  ;;  %v2677_v15 = vld [vmem:[#allocation21 + $0x50] sm:$0xff]  ;;  %v2975_v59 = vld [vmem:[#allocation26 + $0x78] sm:$0xff] }
0x1860   : > { %v4726_v40 = vpack.c.bf16 %v2678_v24, %v2677_v15  ;;  %v4776_v20 = vpack.c.bf16 %v2975_v59, %v2974_v51  ;;  %v3606_v59 = vld [vmem:[%s6832_s20 + $0x1c0] sm:$0xff] }
0x1861   : > { %v2654_v23 = vsel %vm382_vm2, %v6619_v63, 0.0 }
0x1862   : > { %2655 = vadd.xlane.f32.xlu0 %v2654_v23  ;;  %4727 = vmatpush3.bf16.msra.mxu1 %v4726_v40 }
0x1863   : > { %4728 = vmatprep.subr.bf16.mxu1 %v5380_v52 }
0x1866   : > { %4730 = vmatpush3.bf16.msra.mxu1 %v4729_v54 }
0x1867   : > { %4731 = vmatprep.subr.bf16.mxu1 %v5380_v52 }
0x186a   : > { %4733 = vmatpush3.bf16.msra.mxu1 %v4732_v50 }
0x186b   : > { %4751 = vmatprep.subr.bf16.mxu1 %v5861_v11 }
0x18ef   : > { %v2656_v9 = vpop.xlane.xlu0 %2655 }
0x18f0   : > { %v2657_v31 = vmul.f32 0.015625, %v2656_v9 }
0x18f2   : > { %v2658_v27 = vsub.f32 %v6619_v63, %v2657_v31 }
0x18f4   : > { %v2659_v28 = vmul.f32 %v2658_v27, %v2658_v27 }
0x18f6   : > { %v2660_v8 = vsel %vm382_vm2, %v2659_v28, 0.0 }
0x18f7   : > { %2661 = vadd.xlane.f32.xlu1 %v2660_v8 }
0x1984   : > { %v2662_v30 = vpop.xlane.xlu1 %2661 }
0x1985   : > { %v2663_v13 = vmul.f32 0.015873017, %v2662_v30 }
0x1987   : > { %4945 = vrsqrt.f32 %v2663_v13  ;;  %vm2666_vm1 = vcmp.eq.f32.partialorder %v2663_v13, inf  ;;  %v2669_v33 = vand.u32 2147483648, %v2663_v13  ;;  %vm2668_vm3 = vcmp.eq.f32.partialorder %v2663_v13, 0.0 }
0x1991   : > { %v4946_v34 = vpop.eup %4945 }
0x1992   : > { %v2665_v35 = vmul.f32 %v4946_v34, %v2663_v13 }
0x1994   : > { %v2667_v38 = vsel %vm2666_vm1, %v2663_v13, %v2665_v35 }
0x1995   : > { %v2670_v18 = vsel %vm2668_vm3, %v2669_v33, %v2667_v38 }
0x1996   : > { %v2671_v61 = vadd.f32 1e-06, %v2670_v18  ;;  %v3589_v18 = vld [vmem:[%s6830_s18 + $0xc8] sm:$0xff] }
0x1998   : > { %4947 = vrcp.f32 %v2671_v61 }
0x19a2   : > { %v4948_v22 = vpop.eup %4947 }
0x19a3   : > { %v2673_v21 = vmul.f32 %v4948_v22, %v2658_v27  ;;  %v3590_v22 = vld [vmem:[%s6830_s18 + $0xd0] sm:$0xff] }
0x19a5   : > { %4269 = vmatmul.mubr.msk.f32.vlgmr.msra.gmra.mrb[26].mxu1 %vm382_vm2, %v2673_v21  ;;  %v3591_v21 = vld [vmem:[%s6830_s18 + $0xd8] sm:$0xff] }
0x19a6   : > { %4753 = vmatpush3.bf16.msra.mxu1 %v5861_v11  ;;  %v2858_v11 = vadd.f32 %v6603_v14, %v2784_v41  ;;  %v2971_v14 = vld [vmem:[#allocation26 + $0x58] sm:$0xff]  ;;  %v4782_v41 = vpack.c.bf16 %v3591_v21, %v3590_v22 }
0x19a7   : > { %4755 = vmatprep.subr.bf16.mxu1 %v5865_v12  ;;  %v4770_v17 = vpack.c.bf16 %v2971_v14, %v2970_v57  ;;  %v3602_v14 = vld [vmem:[%s6832_s20 + $0x1a0] sm:$0xff] }
0x19aa   : > { %4757 = vmatpush3.bf16.msra.mxu1 %v5865_v12 }
0x19ab   : > { %4759 = vmatprep.subr.bf16.mxu1 %v5898_v45 }
0x19ae   : > { %4761 = vmatpush3.bf16.msra.mxu1 %v5898_v45  ;;  %v2968_v45 = vld [vmem:[#allocation26 + $0x40] sm:$0xff] }
0x19af   : > { %4763 = vmatprep.subr.bf16.mxu1 %v5904_v46 }
0x19b2   : > { %4765 = vmatpush3.bf16.msra.mxu1 %v5904_v46  ;;  %v2969_v46 = vld [vmem:[#allocation26 + $0x48] sm:$0xff] }
0x19b3   : > { %4778 = vmatprep.subr.bf16.mxu1 %v5380_v52  ;;  %v4767_v48 = vpack.c.bf16 %v2969_v46, %v2968_v45  ;;  %v3600_v45 = vld [vmem:[%s6832_s20 + $0x190] sm:$0xff] }
0x19b5   : > { %4768 = vmatpush3.bf16.msra.mxu0 %v4767_v48  ;;  %v3601_v48 = vld [vmem:[%s6832_s20 + $0x198] sm:$0xff] }
0x19b6   : > { %4769 = vmatprep.subr.bf16.mxu0 %v5380_v52  ;;  %v4794_v57 = vpack.c.bf16 %v3601_v48, %v3600_v45 }
0x19b9   : > { %4771 = vmatpush3.bf16.msra.mxu0 %v4770_v17  ;;  %v3603_v17 = vld [vmem:[%s6832_s20 + $0x1a8] sm:$0xff] }
0x19ba   : > { %4772 = vmatprep.subr.bf16.mxu0 %v5380_v52  ;;  %v4797_v56 = vpack.c.bf16 %v3603_v17, %v3602_v14 }
0x19bd   : > { %4774 = vmatpush3.bf16.msra.mxu0 %v4773_v25  ;;  %v3605_v25 = vld [vmem:[%s6832_s20 + $0x1b8] sm:$0xff] }
0x19be   : > { %4775 = vmatprep.subr.bf16.mxu0 %v5380_v52  ;;  %v4800_v51 = vpack.c.bf16 %v3605_v25, %v3604_v32  ;;  %v3297_v32 = vld [vmem:[%s6836_s24 + $0x8] sm:$0xff] (%p290_p13)  ;;  %v3298_v25 = vld [vmem:[%s6836_s24 + $0x10] sm:$0xff] (%p290_p13) }
0x19c1   : > { %4777 = vmatpush3.bf16.msra.mxu0 %v4776_v20  ;;  %v3607_v20 = vld [vmem:[%s6832_s20 + $0x1c8] sm:$0xff] }
0x19c2   : > { %4790 = vmatprep.subr.bf16.mxu0 %v5380_v52 }
0x1a78   : > { %v2757_v44 = vpop.f32.mrb[26].mxu1 }
0x1a79   : > { %v2758_v12 = vadd.f32 %v3564_v42, %v2757_v44  ;;  %v4270_v49 = vpop.f32.mrb[27].mxu1  ;;  %v3592_v42 = vld [vmem:[%s6830_s18 + $0xe0] sm:$0xff]  ;;  %v3593_v44 = vld [vmem:[%s6830_s18 + $0xe8] sm:$0xff] }
0x1a7b   : > { %v2868_v53 = vmul.f32 %v2858_v11, %v2758_v12  ;;  %v2869_v55 = vmul.f32 %v2864_v36, %v2758_v12  ;;  %v4785_v11 = vpack.c.bf16 %v3593_v44, %v3592_v42  ;;  %v3594_v36 = vld [vmem:[%s6830_s18 + $0xf0] sm:$0xff]  ;;  %v3595_v12 = vld [vmem:[%s6830_s18 + $0xf8] sm:$0xff] }
0x1a7c   : > { %v4788_v49 = vpack.c.bf16 %v3595_v12, %v3594_v36 }
0x1a7d   : > { %4287 = vmatprep.mubr.msk.f32.mxu1 %vm382_vm2, %v2868_v53  ;;  %v3598_v53 = vld [vmem:[%s6832_s20 + $0x180] sm:$0xff] }
0x1a7e   : > { %4288 = vmatmul.mubr.msk.f32.vlgmr.msra.gmra.mrb[28].mxu1 %vm382_vm2, %v2869_v55  ;;  %v3599_v55 = vld [vmem:[%s6832_s20 + $0x188] sm:$0xff] }
0x1a7f   : > { %4325 = vmatprep.mubr.msk.f32.mxu1 %vm5381_vm4, %v5379_v58  ;;  %v4791_v46 = vpack.c.bf16 %v3599_v55, %v3598_v53 }
0x1b51   : > { %v4289_v23 = vpop.f32.mrb[28].mxu1 }
0x1b52   : > { %v2952_v9 = vadd.f32 %v6427_v47, %v4289_v23  ;;  %v2942_v31 = vpop.f32.mrb[29].mxu1  ;;  %v4803_v23 = vpack.c.bf16 %v3607_v20, %v3606_v59  ;;  %v3299_v20 = vld [vmem:[%s6836_s24 + $0x18] sm:$0xff] (%p290_p13) }
0x1b53   : > { %v2951_v27 = vadd.f32 %v6432_v37, %v2942_v31  ;;  %v3586_v37 = vld [vmem:[#allocation27 + $0x1] ss:$0 sm:$0xff]  ;;  %v3609_v31 = vld [vmem:[%s6832_s20 + $0x1d8] sm:$0xff]  ;;  %v4818_v1 = vpack.c.bf16 (%p290_p13), %v3299_v20, %v3298_v25 }
0x1b55   : > { %v2953_v28 = vmax.f32 %v2951_v27, %v2952_v9 }
0x1b57   : > { %v2954_v8 = vsub.f32 %v2951_v27, %v2953_v28  ;;  %v2957_v60 = vsub.f32 %v2952_v9, %v2953_v28  ;;  %v3608_v9 = vld [vmem:[%s6832_s20 + $0x1d0] sm:$0xff]  ;;  %v3610_v28 = vld [vmem:[%s6832_s20 + $0x1e0] sm:$0xff] }
0x1b58   : > { %v4806_v27 = vpack.c.bf16 %v3609_v31, %v3608_v9  ;;  %v3304_v9 = vld [vmem:[%s6877_s2] sm:$0x1] (%p290_p13) }
0x1b59   : > { %v2955_v43 = vmul.f32 1.442695, %v2954_v8  ;;  %v2958_v62 = vmul.f32 1.442695, %v2957_v60  ;;  %v3611_v8 = vld [vmem:[%s6832_s20 + $0x1e8] sm:$0xff] }
0x1b5a   : > { %v4809_v60 = vpack.c.bf16 %v3611_v8, %v3610_v28 }
0x1b5b   : > { %4949 = vpow2.f32 %v2955_v43 }
0x1b5c   : > { %4951 = vpow2.f32 %v2958_v62 }
0x1b65   : > { %v4950_v15 = vpop.eup %4949 }
0x1b66   : > { %v4952_v24 = vpop.eup %4951 }
0x1b67   : > { %v2960_v29 = vadd.f32 %v4952_v24, %v4950_v15 }
0x1b69   : > { %4953 = vrcp.f32 %v2960_v29 }
0x1b73   : > { %v4954_v40 = vpop.eup %4953 }
0x1b74   : > { %v2962_v26 = vmul.f32 %v4954_v40, %v4950_v15  ;;  %v2964_v54 = vmul.f32 %v4954_v40, %v4952_v24 }
0x1b76   : > { %v2963_v10 = vmul.f32 %v2962_v26, %v6605_v16  ;;  %v2965_v47 = vmul.f32 %v2964_v54, %v6609_v19 }
0x1b78   : > { %v2966_v39 = vadd.f32 %v2965_v47, %v2963_v10 }
0x1b7a   : > { %4307 = vmatmul.mubr.msk.f32.vlgmr.msra.gmra.mrb[28].mxu0 %vm382_vm2, %v2966_v39  ;;  %v3613_v39 = vld [vmem:[%s6832_s20 + $0x1f8] sm:$0xff] }
0x1b7b   : > { %4360 = vmatprep.mubr.msk.f32.mxu0 %vm5381_vm4, %v5379_v58  ;;  %4792 = vmatpush3.bf16.msra.mxu0 %v4791_v46  ;;  %v3615_v46 = vld [vmem:[%s6834_s22] ss:$0 sm:$0xff] }
0x1b7c   : > { %4793 = vmatprep.subr.bf16.mxu0 %v5380_v52 }
0x1b7f   : > { %4795 = vmatpush3.bf16.msra.mxu0 %v4794_v57  ;;  %v3616_v57 = vld [vmem:[%s6835_s23] ss:$0 sm:$0xff] }
0x1b80   : > { %4796 = vmatprep.subr.bf16.mxu0 %v5380_v52 }
0x1b83   : > { %4798 = vmatpush3.bf16.msra.mxu0 %v4797_v56  ;;  %v3296_v56 = vld [vmem:[%s6836_s24] sm:$0xff] (%p290_p13)  ;;  %s5385_s24 = smov (%p290_p13), [#allocation30]  }
0x1b84   : > { %4799 = vmatprep.subr.bf16.mxu0 %v5380_v52  ;;  %v4815_v59 = vpack.c.bf16 (%p290_p13), %v3297_v32, %v3296_v56  ;;  %s3398_s29 = sshll.u32 (%p290_p13), %s5385_s24, 4  ;;  %s3399_s29 = int_to_ptr.vmem [resolvable:$true] %s3398_s29 }
0x1b85   :  { %s5311_s26 = scalar_lea.vmem (%p290_p13), %s3399_s29, 16  ;;  %s5315_s25 = scalar_lea.vmem (%p290_p13), %s3399_s29, 32 }
0x1b86   :  { %p5312_p0 = scmp.ne.s32.totalorder (%p290_p13), %s3399_s29, %s5311_s26  ;;  %p5316_p1 = scmp.lt.s32.totalorder (%p290_p13), %s3399_s29, %s3399_s29 }
0x1b87   : > { %4801 = vmatpush3.bf16.msra.mxu0 %v4800_v51  ;;  %v5382_v51 = vmov (%p290_p13), 0.0|0.0   ;;  %p5317_p2 = scmp.lt.s32.totalorder (%p290_p13), %s5315_s25, %s5311_s26 }
0x1b88   : > { %4802 = vmatprep.subr.bf16.mxu0 %v5380_v52 }
0x1b89   :  { %p5318_p3 = por (%p290_p13), %p5317_p2, %p5316_p1 }
0x1b8b   : > { %4804 = vmatpush3.bf16.msra.mxu0 %v4803_v23  ;;  %p5319_p4 = pnand (%p290_p13), %p5318_p3, %p5312_p0 }
0x1b8c   : > { %4805 = vmatprep.subr.bf16.mxu0 %v5380_v52 }
0x1b8f   : > { %4807 = vmatpush3.bf16.msra.mxu0 %v4806_v27 }
0x1b90   : > { %4808 = vmatprep.subr.bf16.mxu0 %v5380_v52 }
0x1b93   : > { %4810 = vmatpush3.bf16.msra.mxu0 %v4809_v60 }
0x1b94   : > { %4811 = vmatprep.subr.bf16.mxu0 %v5380_v52 }
0x1c4d   : > { %v3050_v50 = vpop.f32.mrb[28].mxu0 }
0x1c4e   : > { %v3051_v30 = vadd.f32 %v3586_v37, %v3050_v50  ;;  %v4308_v13 = vpop.f32.mrb[29].mxu0  ;;  %v3596_v50 = vld [vmem:[#allocation29 + $0x3] ss:$0 sm:$0xff] }
0x1c50   : > { %v6658_v34 = vadd.f32 %v3051_v30, %v6619_v63  ;;  %v3588_v63 = vld [vmem:[%s6830_s18 + $0xc0] sm:$0xff] }
0x1c51   : > { %v4779_v61 = vpack.c.bf16 %v3589_v18, %v3588_v63 }
0x1c52   : > { %v3055_v35 = vsel %vm382_vm2, %v6658_v34, 0.0 }
0x1c53   : > { %3056 = vadd.xlane.f32.xlu0 %v3055_v35  ;;  %4780 = vmatpush3.bf16.msra.mxu1 %v4779_v61 }
0x1c54   : > { %4781 = vmatprep.subr.bf16.mxu1 %v5380_v52 }
0x1c57   : > { %4783 = vmatpush3.bf16.msra.mxu1 %v4782_v41 }
0x1c58   : > { %4784 = vmatprep.subr.bf16.mxu1 %v5380_v52 }
0x1c5b   : > { %4786 = vmatpush3.bf16.msra.mxu1 %v4785_v11 }
0x1c5c   : > { %4787 = vmatprep.subr.bf16.mxu1 %v5380_v52  ;;  %v3612_v52 = vld [vmem:[%s6832_s20 + $0x1f0] sm:$0xff] }
0x1c5d   : > { %v4812_v37 = vpack.c.bf16 %v3613_v39, %v3612_v52 }
0x1c5f   : > { %4789 = vmatpush3.bf16.msra.mxu1 %v4788_v49  ;;  %4813 = vmatpush3.bf16.msra.mxu0 %v4812_v37 }
0x1c60   :  { %4814 = vmatprep.subr.bf16.mxu0 (%p290_p13), %v5382_v51 }
0x1ce0   : > { %v3057_v16 = vpop.xlane.xlu0 %3056 }
0x1ce1   : > { %v3058_v33 = vmul.f32 0.015625, %v3057_v16 }
0x1ce3   : > { %v6663_v19 = vsub.f32 %v6658_v34, %v3058_v33  ;;  %v3614_v33 = vld [vmem:[%s6833_s21 + $0x3] ss:$0 sm:$0xff] }
0x1ce5   : > { %v3060_v38 = vmul.f32 %v6663_v19, %v6663_v19 }
0x1ce7   : > { %v3061_v58 = vsel %vm382_vm2, %v3060_v38, 0.0 }
0x1ce8   : > { %3062 = vadd.xlane.f32.xlu1 %v3061_v58 }
0x1d75   : > { %v3063_v43 = vpop.xlane.xlu1 %3062 }
0x1d76   : > { %v3064_v62 = vmul.f32 0.015873017, %v3063_v43 }
0x1d78   : > { %4955 = vrsqrt.f32 %v3064_v62  ;;  %vm3067_vm4 = vcmp.eq.f32.partialorder %v3064_v62, inf  ;;  %v3070_v29 = vand.u32 2147483648, %v3064_v62  ;;  %vm3069_vm5 = vcmp.eq.f32.partialorder %v3064_v62, 0.0 }
0x1d82   : > { %v4956_v15 = vpop.eup %4955 }
0x1d83   : > { %v3066_v24 = vmul.f32 %v4956_v15, %v3064_v62 }
0x1d85   : > { %v3068_v40 = vsel %vm3067_vm4, %v3064_v62, %v3066_v24 }
0x1d86   : > { %v3071_v26 = vsel %vm3069_vm5, %v3070_v29, %v3068_v40 }
0x1d87   : > { %v3072_v54 = vadd.f32 1e-06, %v3071_v26 }
0x1d89   : > { %4957 = vrcp.f32 %v3072_v54 }
0x1d93   : > { %v4958_v10 = vpop.eup %4957 }
0x1d94   : > { %v3074_v47 = vmul.f32 %v4958_v10, %v6663_v19 }
0x1d96   : > { %4326 = vmatmul.mubr.msk.f32.vlgmr.msra.gmra.mrb[30].mxu1 %vm382_vm2, %v3074_v47 }
0x1e69   : > { %v3158_v30 = vpop.f32.mrb[30].mxu1 }
0x1e6a   : > { %v3159_v13 = vadd.f32 %v3596_v50, %v3158_v30  ;;  %v4327_v35 = vpop.f32.mrb[31].mxu1 }
0x1e6c   : > { %v3162_v16 = vmax.f32 %v3159_v13, 0.0 }
0x1e6e   : > { %4361 = vmatmul.mubr.f32.vlgmr.msra.gmra.mrb[30].mxu0 %v3162_v16 }
0x1e6f   :  { %4379 = vmatprep.mubr.msk.f32.mxu0 (%p290_p13), %vm5383_vm8, %v5384_v0  ;;  %4816 = vmatpush3.bf16.msra.mxu0 (%p290_p13), %v4815_v59 }
0x1e70   :  { %4817 = vmatprep.subr.bf16.mxu0 (%p290_p13), %v5382_v51 }
0x1e73   :  { %4819 = vmatpush3.bf16.msra.mxu0 (%p290_p13), %v4818_v1 }
0x1e74   :  { %4820 = vmatprep.subr.bf16.mxu0 (%p290_p13), %v5382_v51 }
0x1e77   :  { %4822 = vmatpush3.bf16.msra.mxu0 (%p290_p13), %v4821_v4 }
0x1e78   :  { %4823 = vmatprep.subr.bf16.mxu0 (%p290_p13), %v5382_v51 }
0x1e7b   :  { %4825 = vmatpush3.bf16.msra.mxu0 (%p290_p13), %v4824_v7 }
0x1f41   : > { %v3251_v19 = vpop.f32.mrb[30].mxu0 }
0x1f42   : > { %v3252_v38 = vadd.f32 %v3614_v33, %v3251_v19  ;;  %v4362_v58 = vpop.f32.mrb[31].mxu0 }
0x1f44   : > { %v3255_v63 = vadd.f32 %v3252_v38, %v6658_v34 }
0x1f46   : > { %v3257_v18 = vsel %vm382_vm2, %v3255_v63, 0.0 }
0x1f47   : > { %3258 = vadd.xlane.f32.xlu0 %v3257_v18 }
0x1fd4   : > { %v3259_v61 = vpop.xlane.xlu0 %3258 }
0x1fd5   : > { %v3260_v22 = vmul.f32 0.015625, %v3259_v61 }
0x1fd7   : > { %v3261_v21 = vsub.f32 %v3255_v63, %v3260_v22 }
0x1fd9   : > { %v3262_v41 = vmul.f32 %v3261_v21, %v3261_v21 }
0x1fdb   : > { %v3263_v42 = vsel %vm382_vm2, %v3262_v41, 0.0 }
0x1fdc   : > { %3264 = vadd.xlane.f32.xlu1 %v3263_v42 }
0x2069   : > { %v3265_v44 = vpop.xlane.xlu1 %3264 }
0x206a   : > { %v3266_v11 = vmul.f32 0.015873017, %v3265_v44 }
0x206c   : > { %4959 = vrsqrt.f32 %v3266_v11  ;;  %vm3269_vm6 = vcmp.eq.f32.partialorder %v3266_v11, inf  ;;  %v3272_v49 = vand.u32 2147483648, %v3266_v11  ;;  %vm3271_vm7 = vcmp.eq.f32.partialorder %v3266_v11, 0.0 }
0x2076   : > { %v4960_v36 = vpop.eup %4959 }
0x2077   : > { %v3268_v12 = vmul.f32 %v4960_v36, %v3266_v11 }
0x2079   : > { %v3270_v53 = vsel %vm3269_vm6, %v3266_v11, %v3268_v12 }
0x207a   : > { %v3273_v34 = vsel %vm3271_vm7, %v3272_v49, %v3270_v53 }
0x207b   : > { %v3274_v55 = vadd.f32 1e-06, %v3273_v34 }
0x207d   : > { %4961 = vrcp.f32 %v3274_v55 }
0x2087   : > { %v4962_v45 = vpop.eup %4961 }
0x2088   : > { %v3276_v48 = vmul.f32 %v4962_v45, %v3261_v21  ;;  %292 = sbr.rel (!%p290_p13) target bundleno = 344 (0x158), region = 221 }
0x208a   : > { %v3283_v14 = vmul.f32 %v3615_v46, %v3276_v48 }
0x208c   : > { %v3291_v17 = vadd.f32 %v3616_v57, %v3283_v14 }
0x208e   : > { %3618 = vst.msk [vmem:[%s3437_s6 + $0x8] sm:$0xff] %vm382_vm2, %v3291_v17 }
0x2095   :  { %v3295_v23 = vld [vmem:[#allocation2 + $0x10] sm:$0x1] }
0x2096   :  { %4380 = vmatmul.mubr.msk.f32.vlgmr.msra.gmra.mrb[0].mxu0 %vm382_vm2, %v3295_v23 }
0x2169   :  { %v3375_v31 = vpop.f32.mrb[0].mxu0 }
0x216a   :  { %v3376_v27 = vadd.f32 %v3375_v31, %v3304_v9  ;;  %v4381_v28 = vpop.f32.mrb[1].mxu0 }
0x216c   :  { %v3380_v8 = vsel %vm3379_vm9, %v3376_v27, -inf }
0x216d   :  { %3381 = vmax.xlane.f32.xlu0 %v3380_v8 }
0x21fa   :  { %v3382_v60 = vpop.xlane.xlu0 %3381 }
0x21fb   :  { %v3383_v43 = vsub.f32 %v3376_v27, %v3382_v60 }
0x21fd   :  { %v3384_v62 = vmul.f32 1.442695, %v3383_v43 }
0x21ff   :  { %4965 = vpow2.f32 %v3384_v62 }
0x2209   :  { %v4966_v15 = vpop.eup %4965 }
0x220a   :  { %v3386_v24 = vsel %vm3379_vm9, %v4966_v15, 0.0 }
0x220b   :  { %3387 = vadd.xlane.f32.xlu0 %v3386_v24 }
0x2298   :  { %v3388_v29 = vpop.xlane.xlu0 %3387 }
0x2299   :  { %4967 = vrcp.f32 %v3388_v29 }
0x22a3   :  { %v4968_v40 = vpop.eup %4967 }
0x22a4   :  { %v3390_v26 = vmul.f32 %v4968_v40, %v4966_v15 }
0x22a6   :  { %3391 = vst.msk [vmem:[#allocation30] sm:$0x1] %vm3379_vm9, %v3390_v26 }
0x22a7   :  { %5322 = shalt.err (!%p5319_p4)
}
0x22a8   :  { %s6878_s4 = sld [smem:[#allocation54_spill]] }
0x22ae   :  { %s5323_s1 = scalar_lea.hbm %s6878_s4, 16 }
0x22af   :  { %p5324_p5 = scmp.ne.s32.totalorder %s6878_s4, %s5323_s1  ;;  %p5327_p6 = scmp.lt.u32.totalorder %s5323_s1, %s6878_s4 }
0x22b1   :  { %p5329_p7 = pnand %p5327_p6, %p5324_p5 }
0x22b3   :  { %5332 = shalt.err (!%p5329_p7)
}
0x22b4   :  { %3401 = dma.vmem_to_hbm [thread:$0]  %s3399_s29, 16, %s6878_s4, [#allocation8]  }
0x22b5   :  { %5355 = dma.done.wait [#allocation8], 16  }
0x22b6   :  { %5356 = vsyncadd [#allocation8], 4294967280 }
0x22b7   :  { %3405 = vsyncpa [#allocation7], 1 }
0x22b8   :  { %3406 = vsyncpa [#allocation10], 1 }
0x22b9   :  { %3407 = vsyncpa [#allocation13], 1 }
0x22ba   :  { %3408 = vsyncpa [#allocation16], 1 }
0x22bb   :  { %3409 = vsyncpa [#allocation19], 1 }
0x22bc   :  { %3410 = vsyncpa [#allocation22], 1 }
0x22bd   :  { %3411 = vsyncpa [#allocation25], 1 }
0x22be   :  { %3412 = vsyncpa [#allocation28], 1 }
0x22bf   :  { %3413 = vsyncpa [#allocation8], 1 }

</bundles_post_ra>
